<compile_context>
chip_gen: v7x
topology: tpu7x:2x2x1
jax: 0.10.0
libtpu: 0.0.40
codegen_flags: <defaults>
</compile_context>

<pallas_src>
import jax
import jax.numpy as jnp
from jax.experimental import pallas as pl
from jax.experimental.pallas import tpu as pltpu

LATENT = 29
INP_CH = 3
D0 = LATENT + INP_CH          # 32
HID = 64
TN = 1024                     # batch tile (rows per grid step), tunable

# Packed-parameter layouts (all slice starts are 128-lane aligned).
# WA (32, 192) bf16: [ W0 (32,64) | W2[32:,:] (32,64) | W2[:32,:] (32,64) ]
# WB (64, 192) bf16: [ W1 (64,32) | zeros (64,96)     | W3 (64,64)        ]
# PV (1, 768)  f32 : b0@0, b1@128, b2@256, b3@384, w4_row@512, b4@640
B0_OFF, B1_OFF, B2_OFF, B3_OFF, W4_OFF, B4_OFF = 0, 128, 256, 384, 512, 640
PV_W = 768


def decoder_kernel(x_ref, wa_ref, wb_ref, p_ref, o_ref):
    x = x_ref[...]                                   # (TN, 32) f32
    xb = x.astype(jnp.bfloat16)

    b0 = p_ref[:, B0_OFF:B0_OFF + HID]               # (1, 64)
    b1 = p_ref[:, B1_OFF:B1_OFF + D0]                # (1, 32)
    b2 = p_ref[:, B2_OFF:B2_OFF + HID]               # (1, 64)
    b3 = p_ref[:, B3_OFF:B3_OFF + HID]               # (1, 64)
    w4 = p_ref[:, W4_OFF:W4_OFF + HID]               # (1, 64) last-layer weights
    b4 = p_ref[:, B4_OFF:B4_OFF + 1]                 # (1, 1)

    # Fused layer 0 + x-branch of layer 2: one lane-dense (TN,32)@(32,128) matmul.
    h0x = jnp.dot(xb, wa_ref[:, 0:2 * HID],
                  preferred_element_type=jnp.float32)           # (TN, 128)
    h0 = jnp.maximum(h0x[:, 0:HID] + b0, 0.0)                   # layer-0 output
    xc = h0x[:, HID:2 * HID]                                    # x @ W2[32:, :]

    # layer 1: 64 -> 32, ReLU
    h1 = jnp.dot(h0.astype(jnp.bfloat16), wb_ref[:, 0:D0],
                 preferred_element_type=jnp.float32) + b1
    h1 = jnp.maximum(h1, 0.0)

    # layer 2: concat([h1, x]) @ W2  ==  h1 @ W2[:32,:] + x @ W2[32:,:]
    # (no lane-dim concatenate / XLU relayout)
    h2 = jnp.dot(h1.astype(jnp.bfloat16), wa_ref[:, 2 * HID:3 * HID],
                 preferred_element_type=jnp.float32) + xc + b2
    h2 = jnp.maximum(h2, 0.0)

    # layer 3: 64 -> 64, ReLU
    h3 = jnp.dot(h2.astype(jnp.bfloat16), wb_ref[:, 128:128 + HID],
                 preferred_element_type=jnp.float32) + b3
    h3 = jnp.maximum(h3, 0.0)

    # layer 4: 64 -> 1 on the VPU (+ one cross-lane reduce); a 1-column matmul
    # would waste >99% of the MXU and still pay push/pop latency.
    y = jnp.sum(h3 * w4, axis=-1, keepdims=True) + b4            # (TN, 1) f32
    # TODO(synk): if the masked (TN,1) store ever shows up in the bundle
    # profile, switch to a lane-dense (rows,128) output slab + wrapper reshape.
    o_ref[...] = jnp.tanh(y)


def make_params(key):
    """PyTorch-Linear-style uniform(-1/sqrt(in), 1/sqrt(in)) init, deterministic."""
    shapes = [  # (in_dim, out_dim) per layer, matching the Decoder __init__
        (D0, HID),        # lin0
        (HID, D0),        # lin1 (out_dim = dims[2] - dims[0] = 64 - 32 = 32)
        (HID, HID),       # lin2 (input re-concatenated before this layer)
        (HID, HID),       # lin3
        (HID, 1),         # lin4
    ]
    params = []
    for (din, dout) in shapes:
        key, kw, kb = jax.random.split(key, 3)
        bound = 1.0 / (din ** 0.5)
        w = jax.random.uniform(kw, (din, dout), jnp.float32, -bound, bound)
        b = jax.random.uniform(kb, (1, dout), jnp.float32, -bound, bound)
        params.append((w, b))
    return params


def pack_params(params):
    """Pack 5 (W, b) pairs into 3 arrays (2x bf16 weight slabs, 1x f32 vector)."""
    (w0, b0), (w1, b1), (w2, b2), (w3, b3), (w4, b4) = params

    wa = jnp.concatenate([w0, w2[D0:, :], w2[:D0, :]], axis=1)   # (32, 192)
    wa = wa.astype(jnp.bfloat16)

    wb = jnp.zeros((HID, 192), jnp.float32)
    wb = wb.at[:, 0:D0].set(w1)
    wb = wb.at[:, 128:128 + HID].set(w3)
    wb = wb.astype(jnp.bfloat16)                                  # (64, 192)

    pv = jnp.zeros((1, PV_W), jnp.float32)
    pv = pv.at[:, B0_OFF:B0_OFF + HID].set(b0)
    pv = pv.at[:, B1_OFF:B1_OFF + D0].set(b1)
    pv = pv.at[:, B2_OFF:B2_OFF + HID].set(b2)
    pv = pv.at[:, B3_OFF:B3_OFF + HID].set(b3)
    pv = pv.at[:, W4_OFF:W4_OFF + HID].set(w4.T)                  # (1, 64) row
    pv = pv.at[:, B4_OFF:B4_OFF + 1].set(b4)
    return wa, wb, pv


def decoder_forward(x, params, tn=TN):
    N = x.shape[0]
    n_pad = ((N + tn - 1) // tn) * tn
    if n_pad != N:
        x = jnp.pad(x, ((0, n_pad - N), (0, 0)))

    wa, wb, pv = pack_params(params)

    out = pl.pallas_call(
        decoder_kernel,
        out_shape=jax.ShapeDtypeStruct((n_pad, 1), jnp.float32),
        grid_spec=pltpu.PrefetchScalarGridSpec(
            num_scalar_prefetch=0,
            grid=(n_pad // tn,),
            in_specs=[
                pl.BlockSpec((tn, D0), lambda i: (i, 0)),
                pl.BlockSpec(wa.shape, lambda i: (0, 0)),
                pl.BlockSpec(wb.shape, lambda i: (0, 0)),
                pl.BlockSpec(pv.shape, lambda i: (0, 0)),
            ],
            out_specs=pl.BlockSpec((tn, 1), lambda i: (i, 0)),
        ),
        compiler_params=pltpu.CompilerParams(
            dimension_semantics=("parallel",)),
    )(x, wa, wb, pv)
    return out[:N]


def decoder_reference_f32(x, params):
    (w0, b0), (w1, b1), (w2, b2), (w3, b3), (w4, b4) = params
    h = jnp.maximum(x @ w0 + b0, 0.0)
    h = jnp.maximum(h @ w1 + b1, 0.0)
    h = jnp.concatenate([h, x], axis=1)
    h = jnp.maximum(h @ w2 + b2, 0.0)
    h = jnp.maximum(h @ w3 + b3, 0.0)
    return jnp.tanh(h @ w4 + b4)


def decoder_reference_bf16(x, params):
    """Mirrors the kernel's numerics: bf16 matmul inputs, f32 accumulate,
    f32 elementwise, final 64->1 layer in f32."""
    (w0, b0), (w1, b1), (w2, b2), (w3, b3), (w4, b4) = params
    bf = jnp.bfloat16
    dot = lambda a, w: jnp.dot(a.astype(bf), w.astype(bf),
                               preferred_element_type=jnp.float32)
    h = jnp.maximum(dot(x, w0) + b0, 0.0)
    h = jnp.maximum(dot(h, w1) + b1, 0.0)
    h = jnp.concatenate([h, x], axis=1)
    h = jnp.maximum(dot(h, w2) + b2, 0.0)
    h = jnp.maximum(dot(h, w3) + b3, 0.0)
    return jnp.tanh(h @ w4 + b4)


if __name__ == "__main__":
    key = jax.random.PRNGKey(0)
    k_in, k_par = jax.random.split(key)

    N = 2000  # query points; padded to 2048 -> 2 grid steps (both TCs on v7x)
    x = jax.random.normal(k_in, (N, D0), jnp.float32)   # (N, latent+3)
    params = make_params(k_par)

    out = decoder_forward(x, params)
    out = jax.block_until_ready(out)
    assert out.shape == (N, 1)

    ref_bf16 = decoder_reference_bf16(x, params)   # same-precision reference
    ref_f32 = decoder_reference_f32(x, params)     # module-semantics reference
    assert jnp.allclose(out, ref_bf16, atol=1e-3, rtol=1e-3)
    assert jnp.allclose(out, ref_f32, atol=2e-2, rtol=2e-2)

    print("KERNEL_OK")
</pallas_src>

<mosaic_0001>
module attributes {stable_mosaic.version = 11 : i64} {
  func.func @decoder_kernel(%arg0: i32, %arg1: memref<1024x32xf32, #tpu.memory_space<vmem>>, %arg2: memref<32x192xbf16, #tpu.memory_space<vmem>>, %arg3: memref<64x192xbf16, #tpu.memory_space<vmem>>, %arg4: memref<1x768xf32, #tpu.memory_space<vmem>>, %arg5: memref<1024x1xf32, #tpu.memory_space<vmem>>) attributes {dimension_semantics = [#tpu.dimension_semantics<parallel>], iteration_bounds = array<i64: 2>, scalar_prefetch = 0 : i64, scratch_operands = 0 : i64, tpu.core_type = #tpu.core_type<tc>, window_params = [{transform_indices = @transform_0, window_bounds = array<i64: 1024, 32>}, {pipeline_mode = #tpu.pipeline_mode<synchronous>, transform_indices = @transform_1, window_bounds = array<i64: 32, 192>}, {pipeline_mode = #tpu.pipeline_mode<synchronous>, transform_indices = @transform_2, window_bounds = array<i64: 64, 192>}, {pipeline_mode = #tpu.pipeline_mode<synchronous>, transform_indices = @transform_3, window_bounds = array<i64: 1, 768>}, {transform_indices = @transform_4, window_bounds = array<i64: 1024, 1>}]} {
    %c0 = arith.constant 0 : index
    %c0_0 = arith.constant 0 : index
    %0 = vector.load %arg1[%c0, %c0_0] : memref<1024x32xf32, #tpu.memory_space<vmem>>, vector<1024x32xf32>
    %1 = arith.truncf %0 : vector<1024x32xf32> to vector<1024x32xbf16>
    %c0_1 = arith.constant 0 : index
    %c0_2 = arith.constant 0 : index
    %2 = vector.load %arg4[%c0_1, %c0_2] : memref<1x768xf32, #tpu.memory_space<vmem>>, vector<1x64xf32>
    %c0_3 = arith.constant 0 : index
    %c128 = arith.constant 128 : index
    %3 = vector.load %arg4[%c0_3, %c128] : memref<1x768xf32, #tpu.memory_space<vmem>>, vector<1x32xf32>
    %c0_4 = arith.constant 0 : index
    %c256 = arith.constant 256 : index
    %4 = vector.load %arg4[%c0_4, %c256] : memref<1x768xf32, #tpu.memory_space<vmem>>, vector<1x64xf32>
    %c0_5 = arith.constant 0 : index
    %c384 = arith.constant 384 : index
    %5 = vector.load %arg4[%c0_5, %c384] : memref<1x768xf32, #tpu.memory_space<vmem>>, vector<1x64xf32>
    %c0_6 = arith.constant 0 : index
    %c512 = arith.constant 512 : index
    %6 = vector.load %arg4[%c0_6, %c512] : memref<1x768xf32, #tpu.memory_space<vmem>>, vector<1x64xf32>
    %c0_7 = arith.constant 0 : index
    %c640 = arith.constant 640 : index
    %7 = vector.load %arg4[%c0_7, %c640] : memref<1x768xf32, #tpu.memory_space<vmem>>, vector<1x1xf32>
    %c0_8 = arith.constant 0 : index
    %c0_9 = arith.constant 0 : index
    %8 = vector.load %arg2[%c0_8, %c0_9] : memref<32x192xbf16, #tpu.memory_space<vmem>>, vector<32x128xbf16>
    %cst = arith.constant dense<0.000000e+00> : vector<1024x128xf32>
    %9 = tpu.matmul %1, %8, %cst {dimension_numbers = #tpu.dot_dimension_numbers<[1], [0], [0], [1], [0, 0, 1, 1], [], []>} : vector<1024x32xbf16>, vector<32x128xbf16>, vector<1024x128xf32> -> vector<1024x128xf32>
    %10 = vector.extract_strided_slice %9 {offsets = [0, 0], sizes = [1024, 64], strides = [1, 1]} : vector<1024x128xf32> to vector<1024x64xf32>
    %11 = vector.broadcast %2 : vector<1x64xf32> to vector<1024x64xf32>
    %12 = arith.addf %10, %11 : vector<1024x64xf32>
    %cst_10 = arith.constant 0.000000e+00 : f32
    %13 = vector.broadcast %cst_10 : f32 to vector<1024x64xf32>
    %14 = arith.maximumf %12, %13 : vector<1024x64xf32>
    %15 = vector.extract_strided_slice %9 {offsets = [0, 64], sizes = [1024, 64], strides = [1, 1]} : vector<1024x128xf32> to vector<1024x64xf32>
    %16 = arith.truncf %14 : vector<1024x64xf32> to vector<1024x64xbf16>
    %c0_11 = arith.constant 0 : index
    %c0_12 = arith.constant 0 : index
    %17 = vector.load %arg3[%c0_11, %c0_12] : memref<64x192xbf16, #tpu.memory_space<vmem>>, vector<64x32xbf16>
    %cst_13 = arith.constant dense<0.000000e+00> : vector<1024x32xf32>
    %18 = tpu.matmul %16, %17, %cst_13 {dimension_numbers = #tpu.dot_dimension_numbers<[1], [0], [0], [1], [0, 0, 1, 1], [], []>} : vector<1024x64xbf16>, vector<64x32xbf16>, vector<1024x32xf32> -> vector<1024x32xf32>
    %19 = vector.broadcast %3 : vector<1x32xf32> to vector<1024x32xf32>
    %20 = arith.addf %18, %19 : vector<1024x32xf32>
    %cst_14 = arith.constant 0.000000e+00 : f32
    %21 = vector.broadcast %cst_14 : f32 to vector<1024x32xf32>
    %22 = arith.maximumf %20, %21 : vector<1024x32xf32>
    %23 = arith.truncf %22 : vector<1024x32xf32> to vector<1024x32xbf16>
    %c0_15 = arith.constant 0 : index
    %c128_16 = arith.constant 128 : index
    %24 = vector.load %arg2[%c0_15, %c128_16] : memref<32x192xbf16, #tpu.memory_space<vmem>>, vector<32x64xbf16>
    %cst_17 = arith.constant dense<0.000000e+00> : vector<1024x64xf32>
    %25 = tpu.matmul %23, %24, %cst_17 {dimension_numbers = #tpu.dot_dimension_numbers<[1], [0], [0], [1], [0, 0, 1, 1], [], []>} : vector<1024x32xbf16>, vector<32x64xbf16>, vector<1024x64xf32> -> vector<1024x64xf32>
    %26 = arith.addf %25, %15 : vector<1024x64xf32>
    %27 = vector.broadcast %4 : vector<1x64xf32> to vector<1024x64xf32>
    %28 = arith.addf %26, %27 : vector<1024x64xf32>
    %cst_18 = arith.constant 0.000000e+00 : f32
    %29 = vector.broadcast %cst_18 : f32 to vector<1024x64xf32>
    %30 = arith.maximumf %28, %29 : vector<1024x64xf32>
    %31 = arith.truncf %30 : vector<1024x64xf32> to vector<1024x64xbf16>
    %c0_19 = arith.constant 0 : index
    %c128_20 = arith.constant 128 : index
    %32 = vector.load %arg3[%c0_19, %c128_20] : memref<64x192xbf16, #tpu.memory_space<vmem>>, vector<64x64xbf16>
    %cst_21 = arith.constant dense<0.000000e+00> : vector<1024x64xf32>
    %33 = tpu.matmul %31, %32, %cst_21 {dimension_numbers = #tpu.dot_dimension_numbers<[1], [0], [0], [1], [0, 0, 1, 1], [], []>} : vector<1024x64xbf16>, vector<64x64xbf16>, vector<1024x64xf32> -> vector<1024x64xf32>
    %34 = vector.broadcast %5 : vector<1x64xf32> to vector<1024x64xf32>
    %35 = arith.addf %33, %34 : vector<1024x64xf32>
    %cst_22 = arith.constant 0.000000e+00 : f32
    %36 = vector.broadcast %cst_22 : f32 to vector<1024x64xf32>
    %37 = arith.maximumf %35, %36 : vector<1024x64xf32>
    %38 = vector.broadcast %6 : vector<1x64xf32> to vector<1024x64xf32>
    %39 = arith.mulf %37, %38 : vector<1024x64xf32>
    %cst_23 = arith.constant dense<0.000000e+00> : vector<1024xf32>
    %40 = vector.multi_reduction <add>, %39, %cst_23 [1] : vector<1024x64xf32> to vector<1024xf32>
    %41 = vector.shape_cast %40 : vector<1024xf32> to vector<1024x1xf32>
    %42 = vector.broadcast %7 : vector<1x1xf32> to vector<1024x1xf32>
    %43 = arith.addf %41, %42 : vector<1024x1xf32>
    %44 = math.tanh %43 : vector<1024x1xf32>
    %c0_24 = arith.constant 0 : index
    %c0_25 = arith.constant 0 : index
    %45 = vector.load %arg5[%c0_24, %c0_25] : memref<1024x1xf32, #tpu.memory_space<vmem>>, vector<1024x1xf32>
    tpu.vector_store %arg5[%c0_24, %c0_25], %44 {strides = array<i32>} : memref<1024x1xf32, #tpu.memory_space<vmem>>, vector<1024x1xf32>,
    return
  }
  func.func @transform_0(%arg0: i32) -> (i32, i32) {
    %c0_i32 = arith.constant 0 : i32
    %c0_i32_0 = arith.constant 0 : i32
    return %arg0, %c0_i32 : i32, i32
  }
  func.func @transform_1(%arg0: i32) -> (i32, i32) {
    %c0_i32 = arith.constant 0 : i32
    %c0_i32_0 = arith.constant 0 : i32
    %c0_i32_1 = arith.constant 0 : i32
    return %c0_i32, %c0_i32_0 : i32, i32
  }
  func.func @transform_2(%arg0: i32) -> (i32, i32) {
    %c0_i32 = arith.constant 0 : i32
    %c0_i32_0 = arith.constant 0 : i32
    %c0_i32_1 = arith.constant 0 : i32
    return %c0_i32, %c0_i32_0 : i32, i32
  }
  func.func @transform_3(%arg0: i32) -> (i32, i32) {
    %c0_i32 = arith.constant 0 : i32
    %c0_i32_0 = arith.constant 0 : i32
    %c0_i32_1 = arith.constant 0 : i32
    return %c0_i32, %c0_i32_0 : i32, i32
  }
  func.func @transform_4(%arg0: i32) -> (i32, i32) {
    %c0_i32 = arith.constant 0 : i32
    %c0_i32_0 = arith.constant 0 : i32
    return %arg0, %c0_i32 : i32, i32
  }
}

</mosaic_0001>

<bundles_post_ra>
// kernel: tpu_custom_call.1
= control target key start
LH: loop header
LB: loop body
LE: loop exit
PB: predicated region body
PF: predicated region fallthrough
CT: control target
= control target key end

     0   :  { %s7315_s15 = smov 0   ;;  %s9479_s0 = inlined_call_operand.vmem [shape: f32[2048,32], index: 0, kind: input, shape index: {}]   ;;  %s9480_s1 = inlined_call_operand.vmem [shape: bf16[32,192], index: 1, kind: input, shape index: {}]   ;;  %s9481_s2 = inlined_call_operand.vmem [shape: bf16[64,192], index: 2, kind: input, shape index: {}]   ;;  %s9482_s3 = inlined_call_operand.vmem [shape: f32[1,768], index: 3, kind: input, shape index: {}]   ;;  %s9483_s4 = inlined_call_operand.vmem [shape: f32[2048,1], index: 4, kind: output, shape index: {}]  }
   0x1 LB: > { %s5907_s16 = sadd.s32 4294967295, %s7287_s15   ;;  %p5911_p0 = scmp.ge.s32.totalorder %s7287_s15, 1  ;;  %s7287_s15 = sphi %s7315_s15, %s14_s15  }
   0x2   : > { %p163_p1 = scmp.lt.s32.totalorder %s7287_s15, 3 }
   0x4   : > { %p164_p2 = pnand %p5911_p0, %p163_p1 }
   0x6   : > { %167 = sbr.rel (%p164_p2) target bundleno = 1324 (0x52c), region = 36 }
   0xd   : > { %v7005_v0 = vld [vmem:[%s9480_s1] ss:$8 sps:$4 sm:$0xff]   ;;  %v7006_v1 = vld [vmem:[%s9480_s1 + $0x10] ss:$8 sps:$4 sm:$0xff]   ;;  %s5912_s21 = sshll.u32 %s5907_s16, 7  ;;  %vm416_vm0 = vcmask 261120  }
   0xe   : > { %6460 = vmatprep.subr.bf16.mxu0 %v7005_v0  ;;  %p190_p3 = scmp.lt.s32.totalorder %s5912_s21, 255  ;;  %v7007_v53 = vld [vmem:[%s9480_s1 + $0x4] ss:$8 sps:$4 sm:$0xff]   ;;  %s7289_s14 = smov 64   ;;  %vm1518_vm1 = vcmask 523264   ;;  %vm5722_vm2 = vcmask 7168  }
   0xf   : > { %6461 = vmatpush3.bf16.msra.mxu0 %v7005_v0 }
  0x10   : > { %6462 = vmatprep.subr.bf16.mxu0 %v7006_v1  ;;  %s9503_s21 = smov (!%p190_p3, %s5912_s21), 255 }
  0x11   : > { %s5913_s22 = sshll.u32 %s9503_s21, 3 }
  0x12   : > { %s7337_s25 = scalar_lea.vmem %s9479_s0, %s5913_s22 }
  0x13   : > { %6463 = vmatpush3.bf16.msra.mxu0 %v7006_v1  ;;  %v202_v2 = vld [vmem:[%s7337_s25] sm:$0xff]  ;;  %v203_v3 = vld [vmem:[%s7337_s25 + $0x8] sm:$0xff]  ;;  %v204_v4 = vld [vmem:[%s7337_s25 + $0x10] sm:$0xff] }
  0x14   : > { %v330_v5 = vpack.c.bf16 %v203_v3, %v202_v2  ;;  %v205_v6 = vld [vmem:[%s7337_s25 + $0x18] sm:$0xff]  ;;  %v206_v7 = vld [vmem:[%s7337_s25 + $0x20] sm:$0xff]  ;;  %v207_v8 = vld [vmem:[%s7337_s25 + $0x28] sm:$0xff]  ;;  %6728 = vmatprep.subr.bf16.mxu0 %v7007_v53 }
  0x15   : > { %v331_v9 = vpack.c.bf16 %v205_v6, %v204_v4  ;;  %v332_v10 = vpack.c.bf16 %v207_v8, %v206_v7  ;;  %v208_v11 = vld [vmem:[%s7337_s25 + $0x30] sm:$0xff]  ;;  %v209_v12 = vld [vmem:[%s7337_s25 + $0x38] sm:$0xff]  ;;  %v210_v13 = vld [vmem:[%s7337_s25 + $0x40] sm:$0xff] }
  0x16   : > { %6464 = vmatprep.mubr.msk.bf16.mxu0 %vm416_vm0, %v330_v5  ;;  %v211_v14 = vld [vmem:[%s7337_s25 + $0x48] sm:$0xff]  ;;  %v333_v15 = vpack.c.bf16 %v209_v12, %v208_v11  ;;  %v212_v17 = vld [vmem:[%s7337_s25 + $0x50] sm:$0xff]  ;;  %v213_v18 = vld [vmem:[%s7337_s25 + $0x58] sm:$0xff] }
  0x17   : > { %6465 = vmatmul.mubr.msk.bf16.vlgmr.msra.gmra.mrb[0].mxu0 %vm416_vm0, %v331_v9  ;;  %v334_v16 = vpack.c.bf16 %v211_v14, %v210_v13  ;;  %v214_v19 = vld [vmem:[%s7337_s25 + $0x60] sm:$0xff]  ;;  %v215_v20 = vld [vmem:[%s7337_s25 + $0x68] sm:$0xff]  ;;  %v335_v21 = vpack.c.bf16 %v213_v18, %v212_v17  ;;  %v216_v23 = vld [vmem:[%s7337_s25 + $0x70] sm:$0xff] }
  0x18   : > { %6468 = vmatprep.mubr.msk.bf16.mxu0 %vm416_vm0, %v332_v10  ;;  %v336_v22 = vpack.c.bf16 %v215_v20, %v214_v19  ;;  %v217_v24 = vld [vmem:[%s7337_s25 + $0x78] sm:$0xff]  ;;  %v218_v25 = vld [vmem:[%s7337_s25 + $0x80] sm:$0xff]  ;;  %v219_v26 = vld [vmem:[%s7337_s25 + $0x88] sm:$0xff]  ;;  %6729 = vmatpush3.bf16.msra.mxu0 %v7007_v53 }
  0x19   : > { %v337_v27 = vpack.c.bf16 %v217_v24, %v216_v23  ;;  %v338_v28 = vpack.c.bf16 %v219_v26, %v218_v25  ;;  %v220_v29 = vld [vmem:[%s7337_s25 + $0x90] sm:$0xff]  ;;  %v221_v30 = vld [vmem:[%s7337_s25 + $0x98] sm:$0xff]  ;;  %v222_v31 = vld [vmem:[%s7337_s25 + $0xa0] sm:$0xff] }
  0x1a   : > { %v223_v32 = vld [vmem:[%s7337_s25 + $0xa8] sm:$0xff]  ;;  %v339_v33 = vpack.c.bf16 %v221_v30, %v220_v29  ;;  %v224_v35 = vld [vmem:[%s7337_s25 + $0xb0] sm:$0xff]  ;;  %v225_v36 = vld [vmem:[%s7337_s25 + $0xb8] sm:$0xff] }
  0x1b   : > { %v340_v34 = vpack.c.bf16 %v223_v32, %v222_v31  ;;  %v226_v37 = vld [vmem:[%s7337_s25 + $0xc0] sm:$0xff]  ;;  %v227_v38 = vld [vmem:[%s7337_s25 + $0xc8] sm:$0xff]  ;;  %v341_v39 = vpack.c.bf16 %v225_v36, %v224_v35  ;;  %v228_v41 = vld [vmem:[%s7337_s25 + $0xd0] sm:$0xff] }
  0x1c   : > { %v342_v40 = vpack.c.bf16 %v227_v38, %v226_v37  ;;  %v229_v42 = vld [vmem:[%s7337_s25 + $0xd8] sm:$0xff]  ;;  %v230_v43 = vld [vmem:[%s7337_s25 + $0xe0] sm:$0xff]  ;;  %v231_v44 = vld [vmem:[%s7337_s25 + $0xe8] sm:$0xff] }
  0x1d   : > { %v343_v45 = vpack.c.bf16 %v229_v42, %v228_v41  ;;  %v344_v46 = vpack.c.bf16 %v231_v44, %v230_v43  ;;  %v232_v47 = vld [vmem:[%s7337_s25 + $0xf0] sm:$0xff]  ;;  %v233_v48 = vld [vmem:[%s7337_s25 + $0xf8] sm:$0xff]  ;;  %v234_v49 = vld [vmem:[%s7337_s25 + $0x100] sm:$0xff] }
  0x1e   : > { %v235_v50 = vld [vmem:[%s7337_s25 + $0x108] sm:$0xff]  ;;  %v345_v51 = vpack.c.bf16 %v233_v48, %v232_v47  ;;  %v236_v54 = vld [vmem:[%s7337_s25 + $0x110] sm:$0xff]  ;;  %v237_v55 = vld [vmem:[%s7337_s25 + $0x118] sm:$0xff] }
  0x1f   : > { %6469 = vmatmul.mubr.msk.bf16.gmra.mrb[4].mxu0 %vm416_vm0, %v333_v15  ;;  %v346_v52 = vpack.c.bf16 %v235_v50, %v234_v49  ;;  %v238_v56 = vld [vmem:[%s7337_s25 + $0x120] sm:$0xff]  ;;  %v239_v57 = vld [vmem:[%s7337_s25 + $0x128] sm:$0xff]  ;;  %v347_v58 = vpack.c.bf16 %v237_v55, %v236_v54  ;;  %v240_v60 = vld [vmem:[%s7337_s25 + $0x130] sm:$0xff] }
  0x20   : > { %6472 = vmatprep.mubr.msk.bf16.mxu0 %vm416_vm0, %v334_v16  ;;  %v348_v59 = vpack.c.bf16 %v239_v57, %v238_v56  ;;  %v241_v61 = vld [vmem:[%s7337_s25 + $0x138] sm:$0xff]  ;;  %v242_v62 = vld [vmem:[%s7337_s25 + $0x140] sm:$0xff]  ;;  %v243_v63 = vld [vmem:[%s7337_s25 + $0x148] sm:$0xff] }
  0x21   : > { %v349_v0 = vpack.c.bf16 %v241_v61, %v240_v60  ;;  %v350_v1 = vpack.c.bf16 %v243_v63, %v242_v62  ;;  %v7008_v2 = vld [vmem:[%s9481_s2] ss:$8 sps:$4 sm:$0xff]   ;;  %v244_v3 = vld [vmem:[%s7337_s25 + $0x150] sm:$0xff]  ;;  %v245_v4 = vld [vmem:[%s7337_s25 + $0x158] sm:$0xff] }
  0x22   : > { %v246_v5 = vld [vmem:[%s7337_s25 + $0x160] sm:$0xff]  ;;  %v247_v6 = vld [vmem:[%s7337_s25 + $0x168] sm:$0xff]  ;;  %6592 = vmatprep.subr.bf16.mxu1 %v7008_v2  ;;  %v351_v7 = vpack.c.bf16 %v245_v4, %v244_v3  ;;  %v7009_v9 = vld [vmem:[%s9481_s2 + $0x10] ss:$8 sps:$4 sm:$0xff]  }
  0x23   : > { %6593 = vmatpush3.bf16.msra.mxu1 %v7008_v2  ;;  %v352_v8 = vpack.c.bf16 %v247_v6, %v246_v5  ;;  %v248_v10 = vld [vmem:[%s7337_s25 + $0x170] sm:$0xff]  ;;  %v249_v11 = vld [vmem:[%s7337_s25 + $0x178] sm:$0xff]  ;;  %v250_v12 = vld [vmem:[%s7337_s25 + $0x180] sm:$0xff] }
  0x24   : > { %v251_v13 = vld [vmem:[%s7337_s25 + $0x188] sm:$0xff]  ;;  %6594 = vmatprep.subr.bf16.mxu1 %v7009_v9  ;;  %v353_v14 = vpack.c.bf16 %v249_v11, %v248_v10  ;;  %v7011_v17 = vld [vmem:[%s9481_s2 + $0x30] ss:$8 sps:$4 sm:$0xff]   ;;  %v254_v20 = vld [vmem:[%s7337_s25 + $0x1a0] sm:$0xff] }
  0x25   : > { %v7010_v15 = vld [vmem:[%s9481_s2 + $0x20] ss:$8 sps:$4 sm:$0xff]   ;;  %v354_v16 = vpack.c.bf16 %v251_v13, %v250_v12  ;;  %v252_v18 = vld [vmem:[%s7337_s25 + $0x190] sm:$0xff]  ;;  %v253_v19 = vld [vmem:[%s7337_s25 + $0x198] sm:$0xff] }
  0x26   : > { %v256_v24 = vld [vmem:[%s7337_s25 + $0x1b0] sm:$0xff]  ;;  %v257_v25 = vld [vmem:[%s7337_s25 + $0x1b8] sm:$0xff]  ;;  %v258_v26 = vld [vmem:[%s7337_s25 + $0x1c0] sm:$0xff] }
  0x27   : > { %6473 = vmatmul.mubr.msk.bf16.gmra.mrb[8].mxu0 %vm416_vm0, %v335_v21  ;;  %6595 = vmatpush3.bf16.msra.mxu1 %v7009_v9  ;;  %v255_v21 = vld [vmem:[%s7337_s25 + $0x1a8] sm:$0xff]  ;;  %v260_v30 = vld [vmem:[%s7337_s25 + $0x1d0] sm:$0xff]  ;;  %v261_v31 = vld [vmem:[%s7337_s25 + $0x1d8] sm:$0xff] }
  0x28   : > { %6476 = vmatprep.mubr.msk.bf16.mxu0 %vm416_vm0, %v336_v22  ;;  %6596 = vmatprep.subr.bf16.mxu1 %v7010_v15  ;;  %v355_v22 = vpack.c.bf16 %v253_v19, %v252_v18  ;;  %v356_v23 = vpack.c.bf16 %v255_v21, %v254_v20  ;;  %v262_v32 = vld [vmem:[%s7337_s25 + $0x1e0] sm:$0xff]  ;;  %v264_v36 = vld [vmem:[%s7337_s25 + $0x1f0] sm:$0xff]  ;;  %v265_v37 = vld [vmem:[%s7337_s25 + $0x1f8] sm:$0xff] }
  0x29   : > { %v266_v38 = vld [vmem:[%s7337_s25 + $0x200] sm:$0xff]  ;;  %v268_v42 = vld [vmem:[%s7337_s25 + $0x210] sm:$0xff]  ;;  %v269_v43 = vld [vmem:[%s7337_s25 + $0x218] sm:$0xff] }
  0x2a   : > { %v270_v44 = vld [vmem:[%s7337_s25 + $0x220] sm:$0xff]  ;;  %v272_v48 = vld [vmem:[%s7337_s25 + $0x230] sm:$0xff]  ;;  %v273_v49 = vld [vmem:[%s7337_s25 + $0x238] sm:$0xff] }
  0x2b   : > { %6597 = vmatpush3.bf16.msra.mxu1 %v7010_v15  ;;  %v274_v50 = vld [vmem:[%s7337_s25 + $0x240] sm:$0xff]  ;;  %v276_v54 = vld [vmem:[%s7337_s25 + $0x250] sm:$0xff]  ;;  %v277_v55 = vld [vmem:[%s7337_s25 + $0x258] sm:$0xff] }
  0x2c   : > { %6598 = vmatprep.subr.bf16.mxu1 %v7011_v17  ;;  %v278_v56 = vld [vmem:[%s7337_s25 + $0x260] sm:$0xff]  ;;  %v279_v57 = vld [vmem:[%s7337_s25 + $0x268] sm:$0xff]  ;;  %v280_v60 = vld [vmem:[%s7337_s25 + $0x270] sm:$0xff] }
  0x2d   : > { %v281_v61 = vld [vmem:[%s7337_s25 + $0x278] sm:$0xff]  ;;  %v282_v62 = vld [vmem:[%s7337_s25 + $0x280] sm:$0xff]  ;;  %v283_v63 = vld [vmem:[%s7337_s25 + $0x288] sm:$0xff] }
  0x2e   : > { %v284_v2 = vld [vmem:[%s7337_s25 + $0x290] sm:$0xff]  ;;  %v285_v3 = vld [vmem:[%s7337_s25 + $0x298] sm:$0xff]  ;;  %v286_v4 = vld [vmem:[%s7337_s25 + $0x2a0] sm:$0xff] }
  0x2f   : > { %6477 = vmatmul.mubr.msk.bf16.gmra.mrb[12].mxu0 %vm416_vm0, %v337_v27  ;;  %6599 = vmatpush3.bf16.msra.mxu1 %v7011_v17  ;;  %v259_v27 = vld [vmem:[%s7337_s25 + $0x1c8] sm:$0xff]  ;;  %v371_v6 = vpack.c.bf16 %v285_v3, %v284_v2  ;;  %v289_v9 = vld [vmem:[%s7337_s25 + $0x2b8] sm:$0xff]  ;;  %v290_v10 = vld [vmem:[%s7337_s25 + $0x2c0] sm:$0xff] }
  0x30   : > { %6480 = vmatprep.mubr.msk.bf16.mxu0 %vm416_vm0, %v338_v28  ;;  %v357_v28 = vpack.c.bf16 %v257_v25, %v256_v24  ;;  %v358_v29 = vpack.c.bf16 %v259_v27, %v258_v26  ;;  %v287_v5 = vld [vmem:[%s7337_s25 + $0x2a8] sm:$0xff]  ;;  %v293_v15 = vld [vmem:[%s7337_s25 + $0x2d8] sm:$0xff]  ;;  %v296_v20 = vld [vmem:[%s7337_s25 + $0x2f0] sm:$0xff] }
  0x31   : > { %v291_v11 = vld [vmem:[%s7337_s25 + $0x2c8] sm:$0xff]  ;;  %v297_v21 = vld [vmem:[%s7337_s25 + $0x2f8] sm:$0xff]  ;;  %v300_v26 = vld [vmem:[%s7337_s25 + $0x310] sm:$0xff] }
  0x32   : > { %v374_v13 = vpack.c.bf16 %v291_v11, %v290_v10  ;;  %v295_v17 = vld [vmem:[%s7337_s25 + $0x2e8] sm:$0xff]  ;;  %v377_v24 = vpack.c.bf16 %v297_v21, %v296_v20  ;;  %v301_v27 = vld [vmem:[%s7337_s25 + $0x318] sm:$0xff]  ;;  %v318_v3 = vld [vmem:[%s7337_s25 + $0x3a0] sm:$0xff] }
  0x33   : > { %v320_v20 = vld [vmem:[%s7337_s25 + $0x3b0] sm:$0xff]  ;;  %v321_v21 = vld [vmem:[%s7337_s25 + $0x3b8] sm:$0xff] }
  0x37   : > { %6481 = vmatmul.mubr.msk.bf16.gmra.mrb[16].mxu0 %vm416_vm0, %v339_v33  ;;  %v263_v33 = vld [vmem:[%s7337_s25 + $0x1e8] sm:$0xff] }
  0x38   : > { %6484 = vmatprep.mubr.msk.bf16.mxu0 %vm416_vm0, %v340_v34  ;;  %v359_v34 = vpack.c.bf16 %v261_v31, %v260_v30  ;;  %v360_v35 = vpack.c.bf16 %v263_v33, %v262_v32  ;;  %v7012_v30 = vld [vmem:[%s9480_s1 + $0x14] ss:$8 sps:$4 sm:$0xff]   ;;  %v379_v31 = vpack.c.bf16 %v301_v27, %v300_v26 }
  0x39   : > { %6730 = vmatprep.subr.bf16.mxu0 %v7012_v30  ;;  %v304_v33 = vld [vmem:[%s7337_s25 + $0x330] sm:$0xff] }
  0x3a   : > { %6731 = vmatpush3.bf16.msra.mxu0 %v7012_v30 }
  0x3f   : > { %6485 = vmatmul.mubr.msk.bf16.gmra.mrb[20].mxu0 %vm416_vm0, %v341_v39  ;;  %v267_v39 = vld [vmem:[%s7337_s25 + $0x208] sm:$0xff] }
  0x40   : > { %6488 = vmatprep.mubr.msk.bf16.mxu0 %vm416_vm0, %v342_v40  ;;  %v361_v40 = vpack.c.bf16 %v265_v37, %v264_v36  ;;  %v362_v41 = vpack.c.bf16 %v267_v39, %v266_v38  ;;  %v307_v36 = vld [vmem:[%s7337_s25 + $0x348] sm:$0xff]  ;;  %v308_v39 = vld [vmem:[%s7337_s25 + $0x350] sm:$0xff] }
  0x47   : > { %6489 = vmatmul.mubr.msk.bf16.gmra.mrb[24].mxu0 %vm416_vm0, %v343_v45  ;;  %v271_v45 = vld [vmem:[%s7337_s25 + $0x228] sm:$0xff] }
  0x48   : > { %6492 = vmatprep.mubr.msk.bf16.mxu0 %vm416_vm0, %v344_v46  ;;  %v363_v46 = vpack.c.bf16 %v269_v43, %v268_v42  ;;  %v364_v47 = vpack.c.bf16 %v271_v45, %v270_v44  ;;  %v311_v42 = vld [vmem:[%s7337_s25 + $0x368] sm:$0xff]  ;;  %v7524_v45 = vld [vmem:[%s9482_s3] ss:$0 sm:$0xff] }
  0x4f   : > { %6493 = vmatmul.mubr.msk.bf16.gmra.mrb[28].mxu0 %vm416_vm0, %v345_v51  ;;  %v275_v51 = vld [vmem:[%s7337_s25 + $0x248] sm:$0xff] }
  0x50   : > { %6496 = vmatprep.mubr.msk.bf16.mxu0 %vm416_vm0, %v346_v52  ;;  %v365_v52 = vpack.c.bf16 %v273_v49, %v272_v48  ;;  %v366_v53 = vpack.c.bf16 %v275_v51, %v274_v50  ;;  %v314_v48 = vld [vmem:[%s7337_s25 + $0x380] sm:$0xff]  ;;  %v315_v49 = vld [vmem:[%s7337_s25 + $0x388] sm:$0xff] }
  0x57   : > { %6497 = vmatmul.mubr.msk.bf16.gmra.mrb[32].mxu0 %vm416_vm0, %v347_v58  ;;  %v367_v58 = vpack.c.bf16 %v277_v55, %v276_v54 }
  0x58   : > { %6500 = vmatprep.mubr.msk.bf16.mxu0 %vm416_vm0, %v348_v59  ;;  %v368_v59 = vpack.c.bf16 %v279_v57, %v278_v56  ;;  %v386_v56 = vpack.c.bf16 %v315_v49, %v314_v48 }
  0x5f   : > { %6501 = vmatmul.mubr.msk.bf16.gmra.mrb[36].mxu0 %vm416_vm0, %v349_v0  ;;  %v369_v0 = vpack.c.bf16 %v281_v61, %v280_v60 }
  0x60   : > { %6504 = vmatprep.mubr.msk.bf16.mxu0 %vm416_vm0, %v350_v1  ;;  %v370_v1 = vpack.c.bf16 %v283_v63, %v282_v62 }
  0x67   : > { %6505 = vmatmul.mubr.msk.bf16.gmra.mrb[40].mxu0 %vm416_vm0, %v351_v7  ;;  %v372_v7 = vpack.c.bf16 %v287_v5, %v286_v4  ;;  %v319_v4 = vld [vmem:[%s7337_s25 + $0x3a8] sm:$0xff] }
  0x68   : > { %6508 = vmatprep.mubr.msk.bf16.mxu0 %vm416_vm0, %v352_v8  ;;  %v288_v8 = vld [vmem:[%s7337_s25 + $0x2b0] sm:$0xff] }
  0x69   : > { %v373_v12 = vpack.c.bf16 %v289_v9, %v288_v8 }
  0x6f   : > { %6509 = vmatmul.mubr.msk.bf16.gmra.mrb[44].mxu0 %vm416_vm0, %v353_v14  ;;  %v292_v14 = vld [vmem:[%s7337_s25 + $0x2d0] sm:$0xff] }
  0x70   : > { %6512 = vmatprep.mubr.msk.bf16.mxu0 %vm416_vm0, %v354_v16  ;;  %v294_v16 = vld [vmem:[%s7337_s25 + $0x2e0] sm:$0xff]  ;;  %v375_v18 = vpack.c.bf16 %v293_v15, %v292_v14 }
  0x71   : > { %v376_v19 = vpack.c.bf16 %v295_v17, %v294_v16 }
  0x77   : > { %6513 = vmatmul.mubr.msk.bf16.gmra.mrb[48].mxu0 %vm416_vm0, %v355_v22  ;;  %v298_v22 = vld [vmem:[%s7337_s25 + $0x300] sm:$0xff] }
  0x78   : > { %6516 = vmatprep.mubr.msk.bf16.mxu0 %vm416_vm0, %v356_v23  ;;  %v299_v23 = vld [vmem:[%s7337_s25 + $0x308] sm:$0xff] }
  0x79   : > { %v378_v25 = vpack.c.bf16 %v299_v23, %v298_v22  ;;  %v322_v23 = vld [vmem:[%s7337_s25 + $0x3c0] sm:$0xff] }
  0x7f   : > { %6517 = vmatmul.mubr.msk.bf16.gmra.mrb[52].mxu0 %vm416_vm0, %v357_v28  ;;  %v302_v28 = vld [vmem:[%s7337_s25 + $0x320] sm:$0xff] }
  0x80   : > { %6520 = vmatprep.mubr.msk.bf16.mxu0 %vm416_vm0, %v358_v29  ;;  %v303_v29 = vld [vmem:[%s7337_s25 + $0x328] sm:$0xff] }
  0x81   : > { %v380_v32 = vpack.c.bf16 %v303_v29, %v302_v28  ;;  %v389_v29 = vpack.c.bf16 %v321_v21, %v320_v20 }
  0x87   : > { %6521 = vmatmul.mubr.msk.bf16.gmra.mrb[56].mxu0 %vm416_vm0, %v359_v34  ;;  %v305_v34 = vld [vmem:[%s7337_s25 + $0x338] sm:$0xff] }
  0x88   : > { %6524 = vmatprep.mubr.msk.bf16.mxu0 %vm416_vm0, %v360_v35  ;;  %v306_v35 = vld [vmem:[%s7337_s25 + $0x340] sm:$0xff]  ;;  %v381_v37 = vpack.c.bf16 %v305_v34, %v304_v33 }
  0x89   : > { %v382_v38 = vpack.c.bf16 %v307_v36, %v306_v35 }
  0x8f   : > { %6525 = vmatmul.mubr.msk.bf16.gmra.mrb[60].mxu0 %vm416_vm0, %v361_v40  ;;  %v309_v40 = vld [vmem:[%s7337_s25 + $0x358] sm:$0xff] }
  0x90   : > { %6528 = vmatprep.mubr.msk.bf16.mxu0 %vm416_vm0, %v362_v41  ;;  %v310_v41 = vld [vmem:[%s7337_s25 + $0x360] sm:$0xff]  ;;  %v383_v43 = vpack.c.bf16 %v309_v40, %v308_v39  ;;  %v324_v40 = vld [vmem:[%s7337_s25 + $0x3d0] sm:$0xff] }
  0x91   : > { %v384_v44 = vpack.c.bf16 %v311_v42, %v310_v41  ;;  %v325_v41 = vld [vmem:[%s7337_s25 + $0x3d8] sm:$0xff] }
  0x97   : > { %6529 = vmatmul.mubr.msk.bf16.gmra.mrb[64].mxu0 %vm416_vm0, %v363_v46  ;;  %v312_v46 = vld [vmem:[%s7337_s25 + $0x370] sm:$0xff] }
  0x98   : > { %6532 = vmatprep.mubr.msk.bf16.mxu0 %vm416_vm0, %v364_v47  ;;  %v313_v47 = vld [vmem:[%s7337_s25 + $0x378] sm:$0xff] }
  0x9f   : > { %6533 = vmatmul.mubr.msk.bf16.gmra.mrb[68].mxu0 %vm416_vm0, %v365_v52 }
  0xa0   : > { %6536 = vmatprep.mubr.msk.bf16.mxu0 %vm416_vm0, %v366_v53  ;;  %v385_v53 = vpack.c.bf16 %v313_v47, %v312_v46 }
  0xa7   : > { %6537 = vmatmul.mubr.msk.bf16.gmra.mrb[72].mxu0 %vm416_vm0, %v367_v58 }
  0xa8   : > { %6540 = vmatprep.mubr.msk.bf16.mxu0 %vm416_vm0, %v368_v59 }
  0xaf   : > { %6541 = vmatmul.mubr.msk.bf16.gmra.mrb[76].mxu0 %vm416_vm0, %v369_v0  ;;  %v316_v0 = vld [vmem:[%s7337_s25 + $0x390] sm:$0xff] }
  0xb0   : > { %6544 = vmatprep.mubr.msk.bf16.mxu0 %vm416_vm0, %v370_v1  ;;  %v317_v1 = vld [vmem:[%s7337_s25 + $0x398] sm:$0xff] }
  0xb1   : > { %v387_v9 = vpack.c.bf16 %v317_v1, %v316_v0 }
  0xb7   : > { %6545 = vmatmul.mubr.msk.bf16.gmra.mrb[80].mxu0 %vm416_vm0, %v371_v6 }
  0xb8   : > { %6548 = vmatprep.mubr.msk.bf16.mxu0 %vm416_vm0, %v372_v7 }
  0xbf   : > { %6549 = vmatmul.mubr.msk.bf16.gmra.mrb[84].mxu0 %vm416_vm0, %v373_v12  ;;  %v388_v12 = vpack.c.bf16 %v319_v4, %v318_v3 }
  0xc0   : > { %6552 = vmatprep.mubr.msk.bf16.mxu0 %vm416_vm0, %v374_v13 }
  0xc7   : > { %6553 = vmatmul.mubr.msk.bf16.gmra.mrb[88].mxu0 %vm416_vm0, %v375_v18 }
  0xc8   : > { %6556 = vmatprep.mubr.msk.bf16.mxu0 %vm416_vm0, %v376_v19 }
  0xcf   : > { %6557 = vmatmul.mubr.msk.bf16.gmra.mrb[92].mxu0 %vm416_vm0, %v377_v24  ;;  %v323_v24 = vld [vmem:[%s7337_s25 + $0x3c8] sm:$0xff] }
  0xd0   : > { %6560 = vmatprep.mubr.msk.bf16.mxu0 %vm416_vm0, %v378_v25 }
  0xd7   : > { %6561 = vmatmul.mubr.msk.bf16.gmra.mrb[96].mxu0 %vm416_vm0, %v379_v31 }
  0xd8   : > { %6564 = vmatprep.mubr.msk.bf16.mxu0 %vm416_vm0, %v380_v32  ;;  %v390_v32 = vpack.c.bf16 %v323_v24, %v322_v23 }
  0xdf   : > { %6565 = vmatmul.mubr.msk.bf16.gmra.mrb[100].mxu0 %vm416_vm0, %v381_v37 }
  0xe0   : > { %6568 = vmatprep.mubr.msk.bf16.mxu0 %vm416_vm0, %v382_v38 }
  0xe7   : > { %6569 = vmatmul.mubr.msk.bf16.gmra.mrb[104].mxu0 %vm416_vm0, %v383_v43  ;;  %v326_v43 = vld [vmem:[%s7337_s25 + $0x3e0] sm:$0xff] }
  0xe8   : > { %6572 = vmatprep.mubr.msk.bf16.mxu0 %vm416_vm0, %v384_v44  ;;  %v327_v44 = vld [vmem:[%s7337_s25 + $0x3e8] sm:$0xff] }
  0xea   : > { %v6466_v50 = vpop.f32.mrb[0].mxu0 }
  0xeb   : > { %v1162_v51 = vadd.f32 %v6466_v50, %v7524_v45  ;;  %2596 = vrot.lane.b32.xlu1 %v6466_v50, %s7289_s14  ;;  %v643_v52 = vpop.f32.mrb[1].mxu0  ;;  %v391_v50 = vpack.c.bf16 %v325_v41, %v324_v40 }
  0xec   : > { %v1160_v54 = vadd.f32 %v7524_v45, %v643_v52  ;;  %2592 = vrot.lane.b32.xlu0 %v643_v52, %s7289_s14  ;;  %v6467_v55 = vpop.f32.mrb[2].mxu0 }
  0xed   : > { %v1163_v57 = vadd.f32 %v6467_v55, %v7524_v45  ;;  %v646_v58 = vpop.f32.mrb[3].mxu0  ;;  %v1290_v60 = vmax.f32 %v1162_v51, 0.0 }
  0xee   : > { %v1161_v59 = vadd.f32 %v7524_v45, %v646_v58  ;;  %v1288_v62 = vmax.f32 %v1160_v54, 0.0 }
  0xef   : > { %v1291_v61 = vmax.f32 %v1163_v57, 0.0  ;;  %6573 = vmatmul.mubr.msk.bf16.gmra.mrb[108].mxu0 %vm416_vm0, %v385_v53  ;;  %2598 = vrot.lane.b32.xlu1 %v6467_v55, %s7289_s14  ;;  %v392_v53 = vpack.c.bf16 %v327_v44, %v326_v43 }
  0xf0   : > { %v1289_v63 = vmax.f32 %v1161_v59, 0.0  ;;  %2594 = vrot.lane.b32.xlu0 %v646_v58, %s7289_s14  ;;  %6576 = vmatprep.mubr.msk.bf16.mxu0 %vm416_vm0, %v386_v56 }
  0xf1   : > { %v1417_v2 = vpack.c.bf16 %v1291_v61, %v1290_v60  ;;  %v328_v61 = vld [vmem:[%s7337_s25 + $0x3f0] sm:$0xff] }
  0xf2   : > { %v6470_v5 = vpop.f32.mrb[4].mxu0  ;;  %v1416_v6 = vpack.c.bf16 %v1289_v63, %v1288_v62  ;;  %v329_v62 = vld [vmem:[%s7337_s25 + $0x3f8] sm:$0xff]  ;;  %s8941_s25 = scalar_lea.vmem %s9483_s4, %s5913_s22 }
  0xf3   : > { %v1166_v7 = vadd.f32 %v6470_v5, %v7524_v45  ;;  %v659_v8 = vpop.f32.mrb[5].mxu0  ;;  %v393_v4 = vpack.c.bf16 %v329_v62, %v328_v61 }
  0xf4   : > { %v1164_v10 = vadd.f32 %v7524_v45, %v659_v8  ;;  %6600 = vmatprep.mubr.msk.bf16.mxu1 %vm1518_vm1, %v1416_v6  ;;  %2600 = vrot.lane.b32.xlu0 %v659_v8, %s7289_s14  ;;  %v6471_v11 = vpop.f32.mrb[6].mxu0 }
  0xf5   : > { %v1294_v13 = vmax.f32 %v1166_v7, 0.0  ;;  %v1167_v14 = vadd.f32 %v6471_v11, %v7524_v45  ;;  %v662_v15 = vpop.f32.mrb[7].mxu0  ;;  %6601 = vmatmul.mubr.msk.bf16.vlgmr.msra.gmra.mrb[0].mxu1 %vm1518_vm1, %v1417_v2 }
  0xf6   : > { %v1165_v16 = vadd.f32 %v7524_v45, %v662_v15  ;;  %2602 = vrot.lane.b32.xlu1 %v662_v15, %s7289_s14  ;;  %v1292_v18 = vmax.f32 %v1164_v10, 0.0 }
  0xf7   : > { %v1295_v17 = vmax.f32 %v1167_v14, 0.0  ;;  %6577 = vmatmul.mubr.msk.bf16.gmra.mrb[112].mxu0 %vm416_vm0, %v387_v9 }
  0xf8   : > { %v1293_v19 = vmax.f32 %v1165_v16, 0.0  ;;  %2604 = vrot.lane.b32.xlu0 %v6470_v5, %s7289_s14  ;;  %6580 = vmatprep.mubr.msk.bf16.mxu0 %vm416_vm0, %v388_v12 }
  0xf9   : > { %v1419_v22 = vpack.c.bf16 %v1295_v17, %v1294_v13 }
  0xfa   : > { %v1418_v25 = vpack.c.bf16 %v1293_v19, %v1292_v18  ;;  %2606 = vrot.lane.b32.xlu1 %v6471_v11, %s7289_s14  ;;  %v6474_v26 = vpop.f32.mrb[8].mxu0 }
  0xfb   : > { %v1170_v27 = vadd.f32 %v6474_v26, %v7524_v45  ;;  %v675_v28 = vpop.f32.mrb[9].mxu0 }
  0xfc   : > { %v1168_v30 = vadd.f32 %v7524_v45, %v675_v28  ;;  %6604 = vmatprep.mubr.msk.bf16.mxu1 %vm1518_vm1, %v1418_v25  ;;  %2608 = vrot.lane.b32.xlu0 %v675_v28, %s7289_s14  ;;  %v6475_v31 = vpop.f32.mrb[10].mxu0 }
  0xfd   : > { %v1298_v33 = vmax.f32 %v1170_v27, 0.0  ;;  %v1171_v34 = vadd.f32 %v6475_v31, %v7524_v45  ;;  %v678_v35 = vpop.f32.mrb[11].mxu0  ;;  %6605 = vmatmul.mubr.msk.bf16.gmra.mrb[4].mxu1 %vm1518_vm1, %v1419_v22 }
  0xfe   : > { %v1169_v36 = vadd.f32 %v7524_v45, %v678_v35  ;;  %2610 = vrot.lane.b32.xlu1 %v678_v35, %s7289_s14  ;;  %v1296_v38 = vmax.f32 %v1168_v30, 0.0 }
  0xff   : > { %v1299_v37 = vmax.f32 %v1171_v34, 0.0  ;;  %6581 = vmatmul.mubr.msk.bf16.gmra.mrb[116].mxu0 %vm416_vm0, %v389_v29 }
 0x100   : > { %v1297_v39 = vmax.f32 %v1169_v36, 0.0  ;;  %2612 = vrot.lane.b32.xlu0 %v6474_v26, %s7289_s14  ;;  %6584 = vmatprep.mubr.msk.bf16.mxu0 %vm416_vm0, %v390_v32 }
 0x101   : > { %v1421_v42 = vpack.c.bf16 %v1299_v37, %v1298_v33 }
 0x102   : > { %v1420_v46 = vpack.c.bf16 %v1297_v39, %v1296_v38  ;;  %2614 = vrot.lane.b32.xlu1 %v6475_v31, %s7289_s14  ;;  %v6478_v47 = vpop.f32.mrb[12].mxu0 }
 0x103   : > { %v1174_v48 = vadd.f32 %v6478_v47, %v7524_v45  ;;  %v691_v49 = vpop.f32.mrb[13].mxu0 }
 0x104   : > { %v1172_v51 = vadd.f32 %v7524_v45, %v691_v49  ;;  %6608 = vmatprep.mubr.msk.bf16.mxu1 %vm1518_vm1, %v1420_v46  ;;  %2616 = vrot.lane.b32.xlu0 %v691_v49, %s7289_s14  ;;  %v6479_v52 = vpop.f32.mrb[14].mxu0 }
 0x105   : > { %v1302_v54 = vmax.f32 %v1174_v48, 0.0  ;;  %v1175_v55 = vadd.f32 %v6479_v52, %v7524_v45  ;;  %v694_v56 = vpop.f32.mrb[15].mxu0  ;;  %6609 = vmatmul.mubr.msk.bf16.gmra.mrb[8].mxu1 %vm1518_vm1, %v1421_v42 }
 0x106   : > { %v1173_v57 = vadd.f32 %v7524_v45, %v694_v56  ;;  %2618 = vrot.lane.b32.xlu1 %v694_v56, %s7289_s14  ;;  %v1300_v59 = vmax.f32 %v1172_v51, 0.0 }
 0x107   : > { %v1303_v58 = vmax.f32 %v1175_v55, 0.0  ;;  %6585 = vmatmul.mubr.msk.bf16.gmra.mrb[120].mxu0 %vm416_vm0, %v391_v50 }
 0x108   : > { %v1301_v60 = vmax.f32 %v1173_v57, 0.0  ;;  %2620 = vrot.lane.b32.xlu0 %v6478_v47, %s7289_s14  ;;  %6588 = vmatprep.mubr.msk.bf16.mxu0 %vm416_vm0, %v392_v53 }
 0x109   : > { %v1423_v63 = vpack.c.bf16 %v1303_v58, %v1302_v54 }
 0x10a   : > { %v1422_v0 = vpack.c.bf16 %v1301_v60, %v1300_v59  ;;  %2622 = vrot.lane.b32.xlu1 %v6479_v52, %s7289_s14  ;;  %v6482_v1 = vpop.f32.mrb[16].mxu0 }
 0x10b   : > { %v1178_v2 = vadd.f32 %v6482_v1, %v7524_v45  ;;  %v707_v3 = vpop.f32.mrb[17].mxu0 }
 0x10c   : > { %v1176_v5 = vadd.f32 %v7524_v45, %v707_v3  ;;  %6612 = vmatprep.mubr.msk.bf16.mxu1 %vm1518_vm1, %v1422_v0  ;;  %2624 = vrot.lane.b32.xlu0 %v707_v3, %s7289_s14  ;;  %v6483_v6 = vpop.f32.mrb[18].mxu0 }
 0x10d   : > { %v1306_v7 = vmax.f32 %v1178_v2, 0.0  ;;  %v1179_v8 = vadd.f32 %v6483_v6, %v7524_v45  ;;  %v710_v9 = vpop.f32.mrb[19].mxu0  ;;  %6613 = vmatmul.mubr.msk.bf16.gmra.mrb[12].mxu1 %vm1518_vm1, %v1423_v63 }
 0x10e   : > { %v1177_v10 = vadd.f32 %v7524_v45, %v710_v9  ;;  %2626 = vrot.lane.b32.xlu1 %v710_v9, %s7289_s14  ;;  %v1304_v12 = vmax.f32 %v1176_v5, 0.0 }
 0x10f   : > { %v1307_v11 = vmax.f32 %v1179_v8, 0.0  ;;  %6589 = vmatmul.mubr.msk.bf16.gmra.mrb[124].mxu0 %vm416_vm0, %v393_v4 }
 0x110   : > { %v1305_v13 = vmax.f32 %v1177_v10, 0.0  ;;  %2628 = vrot.lane.b32.xlu0 %v6482_v1, %s7289_s14  ;;  %v7013_v10 = vld [vmem:[%s9481_s2 + $0x4] ss:$8 sps:$4 sm:$0xff]  }
 0x111   : > { %v1425_v14 = vpack.c.bf16 %v1307_v11, %v1306_v7  ;;  %6860 = vmatprep.subr.bf16.mxu1 %v7013_v10 }
 0x112   : > { %v1424_v15 = vpack.c.bf16 %v1305_v13, %v1304_v12  ;;  %2630 = vrot.lane.b32.xlu1 %v6483_v6, %s7289_s14  ;;  %v6486_v16 = vpop.f32.mrb[20].mxu0  ;;  %6861 = vmatpush3.bf16.msra.mxu1 %v7013_v10 }
 0x113   : > { %v1182_v17 = vadd.f32 %v6486_v16, %v7524_v45  ;;  %v723_v18 = vpop.f32.mrb[21].mxu0 }
 0x114   : > { %v1180_v19 = vadd.f32 %v7524_v45, %v723_v18  ;;  %6616 = vmatprep.mubr.msk.bf16.mxu1 %vm1518_vm1, %v1424_v15  ;;  %2632 = vrot.lane.b32.xlu0 %v723_v18, %s7289_s14  ;;  %v6487_v20 = vpop.f32.mrb[22].mxu0 }
 0x115   : > { %v1310_v21 = vmax.f32 %v1182_v17, 0.0  ;;  %v1183_v22 = vadd.f32 %v6487_v20, %v7524_v45  ;;  %v726_v23 = vpop.f32.mrb[23].mxu0  ;;  %6617 = vmatmul.mubr.msk.bf16.gmra.mrb[16].mxu1 %vm1518_vm1, %v1425_v14 }
 0x116   : > { %v1181_v24 = vadd.f32 %v7524_v45, %v726_v23  ;;  %2634 = vrot.lane.b32.xlu1 %v726_v23, %s7289_s14  ;;  %v1308_v26 = vmax.f32 %v1180_v19, 0.0 }
 0x117   : > { %v1311_v25 = vmax.f32 %v1183_v22, 0.0 }
 0x118   : > { %v1309_v27 = vmax.f32 %v1181_v24, 0.0  ;;  %2636 = vrot.lane.b32.xlu0 %v6486_v16, %s7289_s14 }
 0x119   : > { %v1427_v28 = vpack.c.bf16 %v1311_v25, %v1310_v21 }
 0x11a   : > { %v1426_v29 = vpack.c.bf16 %v1309_v27, %v1308_v26  ;;  %2638 = vrot.lane.b32.xlu1 %v6487_v20, %s7289_s14  ;;  %v6490_v30 = vpop.f32.mrb[24].mxu0 }
 0x11b   : > { %v1186_v31 = vadd.f32 %v6490_v30, %v7524_v45  ;;  %v739_v32 = vpop.f32.mrb[25].mxu0 }
 0x11c   : > { %v1184_v33 = vadd.f32 %v7524_v45, %v739_v32  ;;  %6620 = vmatprep.mubr.msk.bf16.mxu1 %vm1518_vm1, %v1426_v29  ;;  %2640 = vrot.lane.b32.xlu0 %v739_v32, %s7289_s14  ;;  %v6491_v34 = vpop.f32.mrb[26].mxu0 }
 0x11d   : > { %v1314_v35 = vmax.f32 %v1186_v31, 0.0  ;;  %v1187_v36 = vadd.f32 %v6491_v34, %v7524_v45  ;;  %v742_v37 = vpop.f32.mrb[27].mxu0  ;;  %6621 = vmatmul.mubr.msk.bf16.gmra.mrb[20].mxu1 %vm1518_vm1, %v1427_v28 }
 0x11e   : > { %v1185_v38 = vadd.f32 %v7524_v45, %v742_v37  ;;  %2642 = vrot.lane.b32.xlu1 %v742_v37, %s7289_s14  ;;  %v1312_v40 = vmax.f32 %v1184_v33, 0.0 }
 0x11f   : > { %v1315_v39 = vmax.f32 %v1187_v36, 0.0 }
 0x120   : > { %v1313_v41 = vmax.f32 %v1185_v38, 0.0  ;;  %2644 = vrot.lane.b32.xlu0 %v6490_v30, %s7289_s14 }
 0x121   : > { %v1429_v42 = vpack.c.bf16 %v1315_v39, %v1314_v35 }
 0x122   : > { %v1428_v43 = vpack.c.bf16 %v1313_v41, %v1312_v40  ;;  %2646 = vrot.lane.b32.xlu1 %v6491_v34, %s7289_s14  ;;  %v6494_v44 = vpop.f32.mrb[28].mxu0 }
 0x123   : > { %v1190_v46 = vadd.f32 %v6494_v44, %v7524_v45  ;;  %v755_v47 = vpop.f32.mrb[29].mxu0 }
 0x124   : > { %v1188_v48 = vadd.f32 %v7524_v45, %v755_v47  ;;  %6624 = vmatprep.mubr.msk.bf16.mxu1 %vm1518_vm1, %v1428_v43  ;;  %2648 = vrot.lane.b32.xlu0 %v755_v47, %s7289_s14  ;;  %v6495_v49 = vpop.f32.mrb[30].mxu0 }
 0x125   : > { %v1318_v50 = vmax.f32 %v1190_v46, 0.0  ;;  %v1191_v51 = vadd.f32 %v6495_v49, %v7524_v45  ;;  %v758_v52 = vpop.f32.mrb[31].mxu0  ;;  %6625 = vmatmul.mubr.msk.bf16.gmra.mrb[24].mxu1 %vm1518_vm1, %v1429_v42 }
 0x126   : > { %v1189_v53 = vadd.f32 %v7524_v45, %v758_v52  ;;  %2650 = vrot.lane.b32.xlu1 %v758_v52, %s7289_s14  ;;  %v1316_v55 = vmax.f32 %v1188_v48, 0.0 }
 0x127   : > { %v1319_v54 = vmax.f32 %v1191_v51, 0.0 }
 0x128   : > { %v1317_v56 = vmax.f32 %v1189_v53, 0.0  ;;  %2652 = vrot.lane.b32.xlu0 %v6494_v44, %s7289_s14 }
 0x129   : > { %v1431_v57 = vpack.c.bf16 %v1319_v54, %v1318_v50 }
 0x12a   : > { %v1430_v58 = vpack.c.bf16 %v1317_v56, %v1316_v55  ;;  %2654 = vrot.lane.b32.xlu1 %v6495_v49, %s7289_s14  ;;  %v6498_v59 = vpop.f32.mrb[32].mxu0 }
 0x12b   : > { %v1194_v60 = vadd.f32 %v6498_v59, %v7524_v45  ;;  %v771_v61 = vpop.f32.mrb[33].mxu0 }
 0x12c   : > { %v1192_v62 = vadd.f32 %v7524_v45, %v771_v61  ;;  %6628 = vmatprep.mubr.msk.bf16.mxu1 %vm1518_vm1, %v1430_v58  ;;  %2656 = vrot.lane.b32.xlu0 %v771_v61, %s7289_s14  ;;  %v6499_v63 = vpop.f32.mrb[34].mxu0 }
 0x12d   : > { %v1322_v0 = vmax.f32 %v1194_v60, 0.0  ;;  %v1195_v1 = vadd.f32 %v6499_v63, %v7524_v45  ;;  %v774_v2 = vpop.f32.mrb[35].mxu0  ;;  %6629 = vmatmul.mubr.msk.bf16.gmra.mrb[28].mxu1 %vm1518_vm1, %v1431_v57 }
 0x12e   : > { %v1193_v3 = vadd.f32 %v7524_v45, %v774_v2  ;;  %2658 = vrot.lane.b32.xlu1 %v774_v2, %s7289_s14  ;;  %v1320_v5 = vmax.f32 %v1192_v62, 0.0 }
 0x12f   : > { %v1323_v4 = vmax.f32 %v1195_v1, 0.0 }
 0x130   : > { %v1321_v6 = vmax.f32 %v1193_v3, 0.0  ;;  %2660 = vrot.lane.b32.xlu0 %v6498_v59, %s7289_s14 }
 0x131   : > { %v1433_v7 = vpack.c.bf16 %v1323_v4, %v1322_v0 }
 0x132   : > { %v1432_v8 = vpack.c.bf16 %v1321_v6, %v1320_v5  ;;  %2662 = vrot.lane.b32.xlu1 %v6499_v63, %s7289_s14  ;;  %v6502_v9 = vpop.f32.mrb[36].mxu0 }
 0x133   : > { %v1198_v11 = vadd.f32 %v6502_v9, %v7524_v45  ;;  %v787_v12 = vpop.f32.mrb[37].mxu0 }
 0x134   : > { %v1196_v13 = vadd.f32 %v7524_v45, %v787_v12  ;;  %6632 = vmatprep.mubr.msk.bf16.mxu1 %vm1518_vm1, %v1432_v8  ;;  %2664 = vrot.lane.b32.xlu0 %v787_v12, %s7289_s14  ;;  %v6503_v14 = vpop.f32.mrb[38].mxu0 }
 0x135   : > { %v1326_v15 = vmax.f32 %v1198_v11, 0.0  ;;  %v1199_v16 = vadd.f32 %v6503_v14, %v7524_v45  ;;  %v790_v17 = vpop.f32.mrb[39].mxu0  ;;  %6633 = vmatmul.mubr.msk.bf16.gmra.mrb[32].mxu1 %vm1518_vm1, %v1433_v7 }
 0x136   : > { %v1197_v18 = vadd.f32 %v7524_v45, %v790_v17  ;;  %2666 = vrot.lane.b32.xlu1 %v790_v17, %s7289_s14  ;;  %v1324_v20 = vmax.f32 %v1196_v13, 0.0 }
 0x137   : > { %v1327_v19 = vmax.f32 %v1199_v16, 0.0 }
 0x138   : > { %v1325_v21 = vmax.f32 %v1197_v18, 0.0  ;;  %2668 = vrot.lane.b32.xlu0 %v6502_v9, %s7289_s14 }
 0x139   : > { %v1435_v22 = vpack.c.bf16 %v1327_v19, %v1326_v15 }
 0x13a   : > { %v1434_v23 = vpack.c.bf16 %v1325_v21, %v1324_v20  ;;  %2670 = vrot.lane.b32.xlu1 %v6503_v14, %s7289_s14  ;;  %v6506_v24 = vpop.f32.mrb[40].mxu0 }
 0x13b   : > { %v1202_v25 = vadd.f32 %v6506_v24, %v7524_v45  ;;  %v803_v26 = vpop.f32.mrb[41].mxu0 }
 0x13c   : > { %v1200_v27 = vadd.f32 %v7524_v45, %v803_v26  ;;  %6636 = vmatprep.mubr.msk.bf16.mxu1 %vm1518_vm1, %v1434_v23  ;;  %2672 = vrot.lane.b32.xlu0 %v803_v26, %s7289_s14  ;;  %v6507_v28 = vpop.f32.mrb[42].mxu0 }
 0x13d   : > { %v1330_v29 = vmax.f32 %v1202_v25, 0.0  ;;  %v1203_v30 = vadd.f32 %v6507_v28, %v7524_v45  ;;  %v806_v31 = vpop.f32.mrb[43].mxu0  ;;  %6637 = vmatmul.mubr.msk.bf16.gmra.mrb[36].mxu1 %vm1518_vm1, %v1435_v22 }
 0x13e   : > { %v1201_v32 = vadd.f32 %v7524_v45, %v806_v31  ;;  %2674 = vrot.lane.b32.xlu1 %v806_v31, %s7289_s14  ;;  %v1328_v34 = vmax.f32 %v1200_v27, 0.0 }
 0x13f   : > { %v1331_v33 = vmax.f32 %v1203_v30, 0.0 }
 0x140   : > { %v1329_v35 = vmax.f32 %v1201_v32, 0.0  ;;  %2676 = vrot.lane.b32.xlu0 %v6506_v24, %s7289_s14 }
 0x141   : > { %v1437_v36 = vpack.c.bf16 %v1331_v33, %v1330_v29 }
 0x142   : > { %v1436_v37 = vpack.c.bf16 %v1329_v35, %v1328_v34  ;;  %2678 = vrot.lane.b32.xlu1 %v6507_v28, %s7289_s14  ;;  %v6510_v38 = vpop.f32.mrb[44].mxu0 }
 0x143   : > { %v1206_v39 = vadd.f32 %v6510_v38, %v7524_v45  ;;  %v819_v40 = vpop.f32.mrb[45].mxu0 }
 0x144   : > { %v1204_v41 = vadd.f32 %v7524_v45, %v819_v40  ;;  %6640 = vmatprep.mubr.msk.bf16.mxu1 %vm1518_vm1, %v1436_v37  ;;  %2680 = vrot.lane.b32.xlu0 %v819_v40, %s7289_s14  ;;  %v6511_v42 = vpop.f32.mrb[46].mxu0 }
 0x145   : > { %v1334_v43 = vmax.f32 %v1206_v39, 0.0  ;;  %v1207_v44 = vadd.f32 %v6511_v42, %v7524_v45  ;;  %v822_v46 = vpop.f32.mrb[47].mxu0  ;;  %6641 = vmatmul.mubr.msk.bf16.gmra.mrb[40].mxu1 %vm1518_vm1, %v1437_v36 }
 0x146   : > { %v1205_v47 = vadd.f32 %v7524_v45, %v822_v46  ;;  %2682 = vrot.lane.b32.xlu1 %v822_v46, %s7289_s14  ;;  %v1332_v49 = vmax.f32 %v1204_v41, 0.0 }
 0x147   : > { %v1335_v48 = vmax.f32 %v1207_v44, 0.0 }
 0x148   : > { %v1333_v50 = vmax.f32 %v1205_v47, 0.0  ;;  %2684 = vrot.lane.b32.xlu0 %v6510_v38, %s7289_s14 }
 0x149   : > { %v1439_v51 = vpack.c.bf16 %v1335_v48, %v1334_v43 }
 0x14a   : > { %v1438_v52 = vpack.c.bf16 %v1333_v50, %v1332_v49  ;;  %2686 = vrot.lane.b32.xlu1 %v6511_v42, %s7289_s14  ;;  %v6514_v53 = vpop.f32.mrb[48].mxu0 }
 0x14b   : > { %v1210_v54 = vadd.f32 %v6514_v53, %v7524_v45  ;;  %v835_v55 = vpop.f32.mrb[49].mxu0 }
 0x14c   : > { %v1208_v56 = vadd.f32 %v7524_v45, %v835_v55  ;;  %6644 = vmatprep.mubr.msk.bf16.mxu1 %vm1518_vm1, %v1438_v52  ;;  %2688 = vrot.lane.b32.xlu0 %v835_v55, %s7289_s14  ;;  %v6515_v57 = vpop.f32.mrb[50].mxu0 }
 0x14d   : > { %v1338_v58 = vmax.f32 %v1210_v54, 0.0  ;;  %v1211_v59 = vadd.f32 %v6515_v57, %v7524_v45  ;;  %v838_v60 = vpop.f32.mrb[51].mxu0  ;;  %6645 = vmatmul.mubr.msk.bf16.gmra.mrb[44].mxu1 %vm1518_vm1, %v1439_v51 }
 0x14e   : > { %v1209_v61 = vadd.f32 %v7524_v45, %v838_v60  ;;  %2690 = vrot.lane.b32.xlu1 %v838_v60, %s7289_s14  ;;  %v1336_v63 = vmax.f32 %v1208_v56, 0.0 }
 0x14f   : > { %v1339_v62 = vmax.f32 %v1211_v59, 0.0 }
 0x150   : > { %v1337_v0 = vmax.f32 %v1209_v61, 0.0  ;;  %2692 = vrot.lane.b32.xlu0 %v6514_v53, %s7289_s14 }
 0x151   : > { %v1441_v1 = vpack.c.bf16 %v1339_v62, %v1338_v58 }
 0x152   : > { %v1440_v2 = vpack.c.bf16 %v1337_v0, %v1336_v63  ;;  %2694 = vrot.lane.b32.xlu1 %v6515_v57, %s7289_s14  ;;  %v6518_v3 = vpop.f32.mrb[52].mxu0 }
 0x153   : > { %v1214_v4 = vadd.f32 %v6518_v3, %v7524_v45  ;;  %v851_v5 = vpop.f32.mrb[53].mxu0 }
 0x154   : > { %v1212_v6 = vadd.f32 %v7524_v45, %v851_v5  ;;  %6648 = vmatprep.mubr.msk.bf16.mxu1 %vm1518_vm1, %v1440_v2  ;;  %2696 = vrot.lane.b32.xlu0 %v851_v5, %s7289_s14  ;;  %v6519_v7 = vpop.f32.mrb[54].mxu0 }
 0x155   : > { %v1342_v8 = vmax.f32 %v1214_v4, 0.0  ;;  %v1215_v9 = vadd.f32 %v6519_v7, %v7524_v45  ;;  %v854_v10 = vpop.f32.mrb[55].mxu0  ;;  %6649 = vmatmul.mubr.msk.bf16.gmra.mrb[48].mxu1 %vm1518_vm1, %v1441_v1 }
 0x156   : > { %v1213_v11 = vadd.f32 %v7524_v45, %v854_v10  ;;  %2698 = vrot.lane.b32.xlu1 %v854_v10, %s7289_s14  ;;  %v1340_v13 = vmax.f32 %v1212_v6, 0.0  ;;  %v7014_v6 = vld [vmem:[%s9481_s2 + $0x14] ss:$8 sps:$4 sm:$0xff]  }
 0x157   : > { %v1343_v12 = vmax.f32 %v1215_v9, 0.0  ;;  %6862 = vmatprep.subr.bf16.mxu1 %v7014_v6 }
 0x158   : > { %v1341_v14 = vmax.f32 %v1213_v11, 0.0  ;;  %2700 = vrot.lane.b32.xlu0 %v6518_v3, %s7289_s14  ;;  %6863 = vmatpush3.bf16.msra.mxu1 %v7014_v6 }
 0x159   : > { %v1443_v15 = vpack.c.bf16 %v1343_v12, %v1342_v8 }
 0x15a   : > { %v1442_v16 = vpack.c.bf16 %v1341_v14, %v1340_v13  ;;  %2702 = vrot.lane.b32.xlu1 %v6519_v7, %s7289_s14  ;;  %v6522_v17 = vpop.f32.mrb[56].mxu0 }
 0x15b   : > { %v1218_v18 = vadd.f32 %v6522_v17, %v7524_v45  ;;  %v867_v19 = vpop.f32.mrb[57].mxu0 }
 0x15c   : > { %v1216_v20 = vadd.f32 %v7524_v45, %v867_v19  ;;  %6652 = vmatprep.mubr.msk.bf16.mxu1 %vm1518_vm1, %v1442_v16  ;;  %2704 = vrot.lane.b32.xlu0 %v867_v19, %s7289_s14  ;;  %v6523_v21 = vpop.f32.mrb[58].mxu0 }
 0x15d   : > { %v1346_v22 = vmax.f32 %v1218_v18, 0.0  ;;  %v1219_v23 = vadd.f32 %v6523_v21, %v7524_v45  ;;  %v870_v24 = vpop.f32.mrb[59].mxu0  ;;  %6653 = vmatmul.mubr.msk.bf16.gmra.mrb[52].mxu1 %vm1518_vm1, %v1443_v15 }
 0x15e   : > { %v1217_v25 = vadd.f32 %v7524_v45, %v870_v24  ;;  %2706 = vrot.lane.b32.xlu1 %v870_v24, %s7289_s14  ;;  %v1344_v27 = vmax.f32 %v1216_v20, 0.0 }
 0x15f   : > { %v1347_v26 = vmax.f32 %v1219_v23, 0.0 }
 0x160   : > { %v1345_v28 = vmax.f32 %v1217_v25, 0.0  ;;  %2708 = vrot.lane.b32.xlu0 %v6522_v17, %s7289_s14 }
 0x161   : > { %v1445_v29 = vpack.c.bf16 %v1347_v26, %v1346_v22 }
 0x162   : > { %v1444_v30 = vpack.c.bf16 %v1345_v28, %v1344_v27  ;;  %2710 = vrot.lane.b32.xlu1 %v6523_v21, %s7289_s14  ;;  %v6526_v31 = vpop.f32.mrb[60].mxu0 }
 0x163   : > { %v1222_v32 = vadd.f32 %v6526_v31, %v7524_v45  ;;  %v883_v33 = vpop.f32.mrb[61].mxu0 }
 0x164   : > { %v1220_v34 = vadd.f32 %v7524_v45, %v883_v33  ;;  %6656 = vmatprep.mubr.msk.bf16.mxu1 %vm1518_vm1, %v1444_v30  ;;  %2712 = vrot.lane.b32.xlu0 %v883_v33, %s7289_s14  ;;  %v6527_v35 = vpop.f32.mrb[62].mxu0 }
 0x165   : > { %v1350_v36 = vmax.f32 %v1222_v32, 0.0  ;;  %v1223_v37 = vadd.f32 %v6527_v35, %v7524_v45  ;;  %v886_v38 = vpop.f32.mrb[63].mxu0  ;;  %6657 = vmatmul.mubr.msk.bf16.gmra.mrb[56].mxu1 %vm1518_vm1, %v1445_v29 }
 0x166   : > { %v1221_v39 = vadd.f32 %v7524_v45, %v886_v38  ;;  %2714 = vrot.lane.b32.xlu1 %v886_v38, %s7289_s14  ;;  %v1348_v41 = vmax.f32 %v1220_v34, 0.0 }
 0x167   : > { %v1351_v40 = vmax.f32 %v1223_v37, 0.0 }
 0x168   : > { %v1349_v42 = vmax.f32 %v1221_v39, 0.0  ;;  %2716 = vrot.lane.b32.xlu0 %v6526_v31, %s7289_s14 }
 0x169   : > { %v1447_v43 = vpack.c.bf16 %v1351_v40, %v1350_v36 }
 0x16a   : > { %v1446_v44 = vpack.c.bf16 %v1349_v42, %v1348_v41  ;;  %2718 = vrot.lane.b32.xlu1 %v6527_v35, %s7289_s14  ;;  %v6530_v46 = vpop.f32.mrb[64].mxu0 }
 0x16b   : > { %v1226_v47 = vadd.f32 %v6530_v46, %v7524_v45  ;;  %v899_v48 = vpop.f32.mrb[65].mxu0 }
 0x16c   : > { %v1224_v49 = vadd.f32 %v7524_v45, %v899_v48  ;;  %6660 = vmatprep.mubr.msk.bf16.mxu1 %vm1518_vm1, %v1446_v44  ;;  %2720 = vrot.lane.b32.xlu0 %v899_v48, %s7289_s14  ;;  %v6531_v50 = vpop.f32.mrb[66].mxu0 }
 0x16d   : > { %v1354_v51 = vmax.f32 %v1226_v47, 0.0  ;;  %v1227_v52 = vadd.f32 %v6531_v50, %v7524_v45  ;;  %v902_v53 = vpop.f32.mrb[67].mxu0  ;;  %6661 = vmatmul.mubr.msk.bf16.gmra.mrb[60].mxu1 %vm1518_vm1, %v1447_v43 }
 0x16e   : > { %v1225_v54 = vadd.f32 %v7524_v45, %v902_v53  ;;  %2722 = vrot.lane.b32.xlu1 %v902_v53, %s7289_s14  ;;  %v1352_v56 = vmax.f32 %v1224_v49, 0.0 }
 0x16f   : > { %v1355_v55 = vmax.f32 %v1227_v52, 0.0 }
 0x170   : > { %v1353_v57 = vmax.f32 %v1225_v54, 0.0  ;;  %2724 = vrot.lane.b32.xlu0 %v6530_v46, %s7289_s14 }
 0x171   : > { %v1449_v58 = vpack.c.bf16 %v1355_v55, %v1354_v51 }
 0x172   : > { %v1448_v59 = vpack.c.bf16 %v1353_v57, %v1352_v56  ;;  %2726 = vrot.lane.b32.xlu1 %v6531_v50, %s7289_s14  ;;  %v6534_v60 = vpop.f32.mrb[68].mxu0  ;;  %v7769_v57 = vpop.permute.xlu0 %2592 }
 0x173   : > { %v1230_v61 = vadd.f32 %v6534_v60, %v7524_v45  ;;  %v915_v62 = vpop.f32.mrb[69].mxu0 }
 0x174   : > { %v1228_v63 = vadd.f32 %v7524_v45, %v915_v62  ;;  %6664 = vmatprep.mubr.msk.bf16.mxu1 %vm1518_vm1, %v1448_v59  ;;  %2728 = vrot.lane.b32.xlu0 %v915_v62, %s7289_s14  ;;  %v6535_v0 = vpop.f32.mrb[70].mxu0 }
 0x175   : > { %v1358_v1 = vmax.f32 %v1230_v61, 0.0  ;;  %v1231_v2 = vadd.f32 %v6535_v0, %v7524_v45  ;;  %v918_v3 = vpop.f32.mrb[71].mxu0  ;;  %6665 = vmatmul.mubr.msk.bf16.gmra.mrb[64].mxu1 %vm1518_vm1, %v1449_v58 }
 0x176   : > { %v1229_v4 = vadd.f32 %v7524_v45, %v918_v3  ;;  %2730 = vrot.lane.b32.xlu1 %v918_v3, %s7289_s14  ;;  %v1356_v7 = vmax.f32 %v1228_v63, 0.0 }
 0x177   : > { %v1359_v5 = vmax.f32 %v1231_v2, 0.0 }
 0x178   : > { %v1357_v8 = vmax.f32 %v1229_v4, 0.0  ;;  %2732 = vrot.lane.b32.xlu0 %v6534_v60, %s7289_s14 }
 0x179   : > { %v1451_v9 = vpack.c.bf16 %v1359_v5, %v1358_v1  ;;  %v7778_v1 = vpop.permute.xlu1 %2596  ;;  %v7781_v5 = vpop.permute.xlu0 %2594 }
 0x17a   : > { %v1450_v10 = vpack.c.bf16 %v1357_v8, %v1356_v7  ;;  %2734 = vrot.lane.b32.xlu1 %v6535_v0, %s7289_s14  ;;  %v6538_v11 = vpop.f32.mrb[72].mxu0 }
 0x17b   : > { %v1234_v12 = vadd.f32 %v6538_v11, %v7524_v45  ;;  %v931_v13 = vpop.f32.mrb[73].mxu0 }
 0x17c   : > { %v1232_v14 = vadd.f32 %v7524_v45, %v931_v13  ;;  %6668 = vmatprep.mubr.msk.bf16.mxu1 %vm1518_vm1, %v1450_v10  ;;  %2736 = vrot.lane.b32.xlu0 %v931_v13, %s7289_s14  ;;  %v6539_v15 = vpop.f32.mrb[74].mxu0 }
 0x17d   : > { %v1362_v16 = vmax.f32 %v1234_v12, 0.0  ;;  %v1235_v17 = vadd.f32 %v6539_v15, %v7524_v45  ;;  %v934_v18 = vpop.f32.mrb[75].mxu0  ;;  %6669 = vmatmul.mubr.msk.bf16.gmra.mrb[68].mxu1 %vm1518_vm1, %v1451_v9 }
 0x17e   : > { %v1233_v19 = vadd.f32 %v7524_v45, %v934_v18  ;;  %2738 = vrot.lane.b32.xlu1 %v934_v18, %s7289_s14  ;;  %v1360_v21 = vmax.f32 %v1232_v14, 0.0  ;;  %v7794_v18 = vpop.permute.xlu0 %2600 }
 0x17f   : > { %v1363_v20 = vmax.f32 %v1235_v17, 0.0 }
 0x180   : > { %v1361_v22 = vmax.f32 %v1233_v19, 0.0  ;;  %2740 = vrot.lane.b32.xlu0 %v6538_v11, %s7289_s14 }
 0x181   : > { %v1453_v23 = vpack.c.bf16 %v1363_v20, %v1362_v16 }
 0x182   : > { %v1452_v24 = vpack.c.bf16 %v1361_v22, %v1360_v21  ;;  %2742 = vrot.lane.b32.xlu1 %v6539_v15, %s7289_s14  ;;  %v6542_v25 = vpop.f32.mrb[76].mxu0  ;;  %v7790_v15 = vpop.permute.xlu1 %2598 }
 0x183   : > { %v1238_v26 = vadd.f32 %v6542_v25, %v7524_v45  ;;  %v947_v27 = vpop.f32.mrb[77].mxu0 }
 0x184   : > { %v1236_v28 = vadd.f32 %v7524_v45, %v947_v27  ;;  %6672 = vmatprep.mubr.msk.bf16.mxu1 %vm1518_vm1, %v1452_v24  ;;  %2744 = vrot.lane.b32.xlu0 %v947_v27, %s7289_s14  ;;  %v6543_v29 = vpop.f32.mrb[78].mxu0  ;;  %v7804_v27 = vld [vmem:[%s9482_s3] ss:$0 sm:$0xff] }
 0x185   : > { %v1366_v30 = vmax.f32 %v1238_v26, 0.0  ;;  %v1239_v31 = vadd.f32 %v6543_v29, %v7524_v45  ;;  %v950_v32 = vpop.f32.mrb[79].mxu0  ;;  %6673 = vmatmul.mubr.msk.bf16.gmra.mrb[72].mxu1 %vm1518_vm1, %v1453_v23 }
 0x186   : > { %v1237_v33 = vadd.f32 %v7524_v45, %v950_v32  ;;  %2746 = vrot.lane.b32.xlu1 %v950_v32, %s7289_s14  ;;  %v1364_v35 = vmax.f32 %v1236_v28, 0.0  ;;  %v7797_v22 = vpop.permute.xlu1 %2602 }
 0x187   : > { %v1367_v34 = vmax.f32 %v1239_v31, 0.0 }
 0x188   : > { %v1365_v36 = vmax.f32 %v1237_v33, 0.0  ;;  %2748 = vrot.lane.b32.xlu0 %v6542_v25, %s7289_s14 }
 0x189   : > { %v1455_v37 = vpack.c.bf16 %v1367_v34, %v1366_v30 }
 0x18a   : > { %v1454_v38 = vpack.c.bf16 %v1365_v36, %v1364_v35  ;;  %2750 = vrot.lane.b32.xlu1 %v6543_v29, %s7289_s14  ;;  %v6546_v39 = vpop.f32.mrb[80].mxu0  ;;  %v7815_v35 = vpop.permute.xlu1 %2606 }
 0x18b   : > { %v1242_v40 = vadd.f32 %v6546_v39, %v7524_v45  ;;  %v963_v41 = vpop.f32.mrb[81].mxu0 }
 0x18c   : > { %v1240_v42 = vadd.f32 %v7524_v45, %v963_v41  ;;  %6676 = vmatprep.mubr.msk.bf16.mxu1 %vm1518_vm1, %v1454_v38  ;;  %2752 = vrot.lane.b32.xlu0 %v963_v41, %s7289_s14  ;;  %v6547_v43 = vpop.f32.mrb[82].mxu0 }
 0x18d   : > { %v1370_v44 = vmax.f32 %v1242_v40, 0.0  ;;  %v1243_v46 = vadd.f32 %v6547_v43, %v7524_v45  ;;  %v966_v47 = vpop.f32.mrb[83].mxu0  ;;  %6677 = vmatmul.mubr.msk.bf16.gmra.mrb[76].mxu1 %vm1518_vm1, %v1455_v37 }
 0x18e   : > { %v1241_v48 = vadd.f32 %v7524_v45, %v966_v47  ;;  %2754 = vrot.lane.b32.xlu1 %v966_v47, %s7289_s14  ;;  %v1368_v50 = vmax.f32 %v1240_v42, 0.0 }
 0x18f   : > { %v1371_v49 = vmax.f32 %v1243_v46, 0.0 }
 0x190   : > { %v1369_v51 = vmax.f32 %v1241_v48, 0.0  ;;  %2756 = vrot.lane.b32.xlu0 %v6546_v39, %s7289_s14 }
 0x191   : > { %v1457_v52 = vpack.c.bf16 %v1371_v49, %v1370_v44 }
 0x192   : > { %v1456_v53 = vpack.c.bf16 %v1369_v51, %v1368_v50  ;;  %2758 = vrot.lane.b32.xlu1 %v6547_v43, %s7289_s14  ;;  %v6550_v54 = vpop.f32.mrb[84].mxu0  ;;  %v7827_v50 = vpop.permute.xlu1 %2610 }
 0x193   : > { %v1246_v55 = vadd.f32 %v6550_v54, %v7524_v45  ;;  %v979_v56 = vpop.f32.mrb[85].mxu0 }
 0x194   : > { %v1244_v58 = vadd.f32 %v7524_v45, %v979_v56  ;;  %6680 = vmatprep.mubr.msk.bf16.mxu1 %vm1518_vm1, %v1456_v53  ;;  %2760 = vrot.lane.b32.xlu0 %v979_v56, %s7289_s14  ;;  %v6551_v59 = vpop.f32.mrb[86].mxu0 }
 0x195   : > { %v1374_v60 = vmax.f32 %v1246_v55, 0.0  ;;  %v1247_v61 = vadd.f32 %v6551_v59, %v7524_v45  ;;  %v982_v62 = vpop.f32.mrb[87].mxu0  ;;  %6681 = vmatmul.mubr.msk.bf16.gmra.mrb[80].mxu1 %vm1518_vm1, %v1457_v52 }
 0x196   : > { %v1245_v63 = vadd.f32 %v7524_v45, %v982_v62  ;;  %2762 = vrot.lane.b32.xlu1 %v982_v62, %s7289_s14  ;;  %v1372_v2 = vmax.f32 %v1244_v58, 0.0  ;;  %v7836_v62 = vpop.permute.xlu1 %2614 }
 0x197   : > { %v1375_v0 = vmax.f32 %v1247_v61, 0.0 }
 0x198   : > { %v1373_v3 = vmax.f32 %v1245_v63, 0.0  ;;  %2764 = vrot.lane.b32.xlu0 %v6550_v54, %s7289_s14 }
 0x199   : > { %v1459_v4 = vpack.c.bf16 %v1375_v0, %v1374_v60 }
 0x19a   : > { %v1458_v6 = vpack.c.bf16 %v1373_v3, %v1372_v2  ;;  %2766 = vrot.lane.b32.xlu1 %v6551_v59, %s7289_s14  ;;  %v6554_v7 = vpop.f32.mrb[88].mxu0 }
 0x19b   : > { %v1250_v8 = vadd.f32 %v6554_v7, %v7524_v45  ;;  %v995_v9 = vpop.f32.mrb[89].mxu0 }
 0x19c   : > { %v1248_v10 = vadd.f32 %v7524_v45, %v995_v9  ;;  %6684 = vmatprep.mubr.msk.bf16.mxu1 %vm1518_vm1, %v1458_v6  ;;  %2768 = vrot.lane.b32.xlu0 %v995_v9, %s7289_s14  ;;  %v6555_v11 = vpop.f32.mrb[90].mxu0 }
 0x19d   : > { %v1378_v12 = vmax.f32 %v1250_v8, 0.0  ;;  %v1251_v13 = vadd.f32 %v6555_v11, %v7524_v45  ;;  %v998_v14 = vpop.f32.mrb[91].mxu0  ;;  %6685 = vmatmul.mubr.msk.bf16.gmra.mrb[84].mxu1 %vm1518_vm1, %v1459_v4  ;;  %v7015_v8 = vld [vmem:[%s9481_s2 + $0x24] ss:$8 sps:$4 sm:$0xff]  }
 0x19e   : > { %v1249_v16 = vadd.f32 %v7524_v45, %v998_v14  ;;  %2770 = vrot.lane.b32.xlu1 %v998_v14, %s7289_s14  ;;  %v1376_v19 = vmax.f32 %v1248_v10, 0.0  ;;  %6864 = vmatprep.subr.bf16.mxu1 %v7015_v8 }
 0x19f   : > { %v1379_v17 = vmax.f32 %v1251_v13, 0.0  ;;  %v7851_v13 = vpop.permute.xlu1 %2618  ;;  %6865 = vmatpush3.bf16.msra.mxu1 %v7015_v8 }
 0x1a0   : > { %v1377_v20 = vmax.f32 %v1249_v16, 0.0  ;;  %2772 = vrot.lane.b32.xlu0 %v6554_v7, %s7289_s14 }
 0x1a1   : > { %v1461_v21 = vpack.c.bf16 %v1379_v17, %v1378_v12 }
 0x1a2   : > { %v1460_v23 = vpack.c.bf16 %v1377_v20, %v1376_v19  ;;  %2774 = vrot.lane.b32.xlu1 %v6555_v11, %s7289_s14  ;;  %v6558_v24 = vpop.f32.mrb[92].mxu0 }
 0x1a3   : > { %v1254_v25 = vadd.f32 %v6558_v24, %v7524_v45  ;;  %v1011_v26 = vpop.f32.mrb[93].mxu0  ;;  %v7811_v45 = vpop.permute.xlu0 %2604 }
 0x1a4   : > { %v1252_v28 = vadd.f32 %v7804_v27, %v1011_v26  ;;  %6688 = vmatprep.mubr.msk.bf16.mxu1 %vm1518_vm1, %v1460_v23  ;;  %2776 = vrot.lane.b32.xlu0 %v1011_v26, %s7289_s14  ;;  %v6559_v29 = vpop.f32.mrb[94].mxu0 }
 0x1a5   : > { %v1382_v30 = vmax.f32 %v1254_v25, 0.0  ;;  %v1255_v31 = vadd.f32 %v7804_v27, %v6559_v29  ;;  %v1014_v32 = vpop.f32.mrb[95].mxu0  ;;  %6689 = vmatmul.mubr.msk.bf16.gmra.mrb[88].mxu1 %vm1518_vm1, %v1461_v21 }
 0x1a6   : > { %v1253_v33 = vadd.f32 %v7804_v27, %v1014_v32  ;;  %2778 = vrot.lane.b32.xlu1 %v1014_v32, %s7289_s14  ;;  %v1380_v36 = vmax.f32 %v1252_v28, 0.0 }
 0x1a7   : > { %v1383_v34 = vmax.f32 %v1255_v31, 0.0  ;;  %v7820_v43 = vpop.permute.xlu0 %2608 }
 0x1a8   : > { %v1381_v37 = vmax.f32 %v1253_v33, 0.0  ;;  %2780 = vrot.lane.b32.xlu0 %v6558_v24, %s7289_s14 }
 0x1a9   : > { %v1463_v38 = vpack.c.bf16 %v1383_v34, %v1382_v30  ;;  %v7864_v30 = vpop.permute.xlu1 %2622 }
 0x1aa   : > { %v1462_v39 = vpack.c.bf16 %v1381_v37, %v1380_v36  ;;  %2782 = vrot.lane.b32.xlu1 %v6559_v29, %s7289_s14  ;;  %v6562_v40 = vpop.f32.mrb[96].mxu0 }
 0x1ab   : > { %v1258_v41 = vadd.f32 %v7804_v27, %v6562_v40  ;;  %v1027_v42 = vpop.f32.mrb[97].mxu0  ;;  %v7832_v56 = vpop.permute.xlu0 %2612 }
 0x1ac   : > { %v1256_v44 = vadd.f32 %v7804_v27, %v1027_v42  ;;  %6692 = vmatprep.mubr.msk.bf16.mxu1 %vm1518_vm1, %v1462_v39  ;;  %2784 = vrot.lane.b32.xlu0 %v1027_v42, %s7289_s14  ;;  %v6563_v46 = vpop.f32.mrb[98].mxu0 }
 0x1ad   : > { %v1386_v47 = vmax.f32 %v1258_v41, 0.0  ;;  %v1259_v48 = vadd.f32 %v7804_v27, %v6563_v46  ;;  %v1030_v49 = vpop.f32.mrb[99].mxu0  ;;  %6693 = vmatmul.mubr.msk.bf16.gmra.mrb[92].mxu1 %vm1518_vm1, %v1463_v38 }
 0x1ae   : > { %v1257_v51 = vadd.f32 %v7804_v27, %v1030_v49  ;;  %2786 = vrot.lane.b32.xlu1 %v1030_v49, %s7289_s14  ;;  %v1384_v53 = vmax.f32 %v1256_v44, 0.0  ;;  %v7883_v49 = vld [vmem:[%s9482_s3 + $0x1] ss:$0 sm:$0xff] }
 0x1af   : > { %v1387_v52 = vmax.f32 %v1259_v48, 0.0  ;;  %v7848_v9 = vpop.permute.xlu0 %2616 }
 0x1b0   : > { %v1385_v54 = vmax.f32 %v1257_v51, 0.0  ;;  %2788 = vrot.lane.b32.xlu0 %v6562_v40, %s7289_s14 }
 0x1b1   : > { %v1465_v55 = vpack.c.bf16 %v1387_v52, %v1386_v47  ;;  %v7876_v47 = vpop.permute.xlu1 %2626 }
 0x1b2   : > { %v1464_v58 = vpack.c.bf16 %v1385_v54, %v1384_v53  ;;  %2790 = vrot.lane.b32.xlu1 %v6563_v46, %s7289_s14  ;;  %v6566_v59 = vpop.f32.mrb[100].mxu0 }
 0x1b3   : > { %v1262_v60 = vadd.f32 %v7804_v27, %v6566_v59  ;;  %v1043_v61 = vpop.f32.mrb[101].mxu0  ;;  %v7860_v26 = vpop.permute.xlu0 %2620 }
 0x1b4   : > { %v1260_v63 = vadd.f32 %v7804_v27, %v1043_v61  ;;  %6696 = vmatprep.mubr.msk.bf16.mxu1 %vm1518_vm1, %v1464_v58  ;;  %2792 = vrot.lane.b32.xlu0 %v1043_v61, %s7289_s14  ;;  %v6567_v0 = vpop.f32.mrb[102].mxu0 }
 0x1b5   : > { %v1390_v2 = vmax.f32 %v1262_v60, 0.0  ;;  %v1263_v3 = vadd.f32 %v7804_v27, %v6567_v0  ;;  %v1046_v4 = vpop.f32.mrb[103].mxu0  ;;  %6697 = vmatmul.mubr.msk.bf16.gmra.mrb[96].mxu1 %vm1518_vm1, %v1465_v55 }
 0x1b6   : > { %v1261_v6 = vadd.f32 %v7804_v27, %v1046_v4  ;;  %2794 = vrot.lane.b32.xlu1 %v1046_v4, %s7289_s14  ;;  %v1388_v10 = vmax.f32 %v1260_v63, 0.0 }
 0x1b7   : > { %v1391_v7 = vmax.f32 %v1263_v3, 0.0  ;;  %v7869_v39 = vpop.permute.xlu0 %2624 }
 0x1b8   : > { %v1389_v11 = vmax.f32 %v1261_v6, 0.0  ;;  %2796 = vrot.lane.b32.xlu0 %v6566_v59, %s7289_s14  ;;  %v7892_v6 = vpop.permute.xlu1 %2630 }
 0x1b9   : > { %v1467_v12 = vpack.c.bf16 %v1391_v7, %v1390_v2 }
 0x1ba   : > { %v1466_v14 = vpack.c.bf16 %v1389_v11, %v1388_v10  ;;  %2798 = vrot.lane.b32.xlu1 %v6567_v0, %s7289_s14  ;;  %v6570_v16 = vpop.f32.mrb[104].mxu0 }
 0x1bb   : > { %v1266_v17 = vadd.f32 %v7804_v27, %v6570_v16  ;;  %v1059_v19 = vpop.f32.mrb[105].mxu0  ;;  %v7887_v60 = vpop.permute.xlu0 %2628 }
 0x1bc   : > { %v1264_v20 = vadd.f32 %v7804_v27, %v1059_v19  ;;  %6700 = vmatprep.mubr.msk.bf16.mxu1 %vm1518_vm1, %v1466_v14  ;;  %2800 = vrot.lane.b32.xlu0 %v1059_v19, %s7289_s14  ;;  %v6571_v21 = vpop.f32.mrb[106].mxu0 }
 0x1bd   : > { %v1394_v23 = vmax.f32 %v1266_v17, 0.0  ;;  %v1267_v24 = vadd.f32 %v7804_v27, %v6571_v21  ;;  %v1062_v25 = vpop.f32.mrb[107].mxu0  ;;  %6701 = vmatmul.mubr.msk.bf16.gmra.mrb[100].mxu1 %vm1518_vm1, %v1467_v12 }
 0x1be   : > { %v1265_v28 = vadd.f32 %v7804_v27, %v1062_v25  ;;  %2802 = vrot.lane.b32.xlu1 %v1062_v25, %s7289_s14  ;;  %v1392_v31 = vmax.f32 %v1264_v20, 0.0 }
 0x1bf   : > { %v1395_v29 = vmax.f32 %v1267_v24, 0.0 }
 0x1c0   : > { %v1393_v32 = vmax.f32 %v1265_v28, 0.0  ;;  %2804 = vrot.lane.b32.xlu0 %v6570_v16, %s7289_s14  ;;  %v7903_v28 = vpop.permute.xlu0 %2632 }
 0x1c1   : > { %v1469_v33 = vpack.c.bf16 %v1395_v29, %v1394_v23 }
 0x1c2   : > { %v1468_v34 = vpack.c.bf16 %v1393_v32, %v1392_v31  ;;  %2806 = vrot.lane.b32.xlu1 %v6571_v21, %s7289_s14  ;;  %v6574_v36 = vpop.f32.mrb[108].mxu0 }
 0x1c3   : > { %v1270_v37 = vadd.f32 %v7804_v27, %v6574_v36  ;;  %v1075_v38 = vpop.f32.mrb[109].mxu0 }
 0x1c4   : > { %v1268_v40 = vadd.f32 %v7804_v27, %v1075_v38  ;;  %6704 = vmatprep.mubr.msk.bf16.mxu1 %vm1518_vm1, %v1468_v34  ;;  %2808 = vrot.lane.b32.xlu0 %v1075_v38, %s7289_s14  ;;  %v6575_v41 = vpop.f32.mrb[110].mxu0  ;;  %v7907_v38 = vpop.permute.xlu1 %2634 }
 0x1c5   : > { %v1398_v42 = vmax.f32 %v1270_v37, 0.0  ;;  %v1271_v44 = vadd.f32 %v7804_v27, %v6575_v41  ;;  %v1078_v46 = vpop.f32.mrb[111].mxu0  ;;  %6705 = vmatmul.mubr.msk.bf16.gmra.mrb[104].mxu1 %vm1518_vm1, %v1469_v33 }
 0x1c6   : > { %v1269_v48 = vadd.f32 %v7804_v27, %v1078_v46  ;;  %2810 = vrot.lane.b32.xlu1 %v1078_v46, %s7289_s14  ;;  %v1396_v52 = vmax.f32 %v1268_v40, 0.0 }
 0x1c7   : > { %v1399_v51 = vmax.f32 %v1271_v44, 0.0 }
 0x1c8   : > { %v1397_v53 = vmax.f32 %v1269_v48, 0.0  ;;  %v6602_v54 = vpop.f32.mrb[0].mxu1  ;;  %2812 = vrot.lane.b32.xlu0 %v6574_v36, %s7289_s14 }
 0x1c9   : > { %v1471_v55 = vpack.c.bf16 %v1399_v51, %v1398_v42  ;;  %v1754_v58 = vadd.f32 %v6602_v54, %v7883_v49  ;;  %v1745_v59 = vpop.f32.mrb[1].mxu1 }
 0x1ca   : > { %v1470_v61 = vpack.c.bf16 %v1397_v53, %v1396_v52  ;;  %v1746_v63 = vadd.f32 %v7883_v49, %v1745_v59  ;;  %v6603_v0 = vpop.f32.mrb[2].mxu1  ;;  %2814 = vrot.lane.b32.xlu1 %v6575_v41, %s7289_s14  ;;  %v6578_v3 = vpop.f32.mrb[112].mxu0 }
 0x1cb   : > { %v1757_v2 = vadd.f32 %v6603_v0, %v7883_v49  ;;  %v1748_v4 = vpop.f32.mrb[3].mxu1  ;;  %v1274_v7 = vadd.f32 %v7804_v27, %v6578_v3  ;;  %v1091_v8 = vpop.f32.mrb[113].mxu0  ;;  %v2258_v11 = vmax.f32 %v1754_v58, 0.0 }
 0x1cc   : > { %v1749_v10 = vadd.f32 %v7883_v49, %v1748_v4  ;;  %6708 = vmatprep.mubr.msk.bf16.mxu1 %vm1518_vm1, %v1470_v61  ;;  %v1272_v14 = vadd.f32 %v7804_v27, %v1091_v8  ;;  %2816 = vrot.lane.b32.xlu0 %v1091_v8, %s7289_s14  ;;  %v6579_v16 = vpop.f32.mrb[114].mxu0  ;;  %v2256_v17 = vmax.f32 %v1746_v63, 0.0  ;;  %v7919_v63 = vpop.permute.xlu0 %2636 }
 0x1cd   : > { %v2259_v12 = vmax.f32 %v1757_v2, 0.0  ;;  %6709 = vmatmul.mubr.msk.bf16.gmra.mrb[108].mxu1 %vm1518_vm1, %v1471_v55  ;;  %v1402_v19 = vmax.f32 %v1274_v7, 0.0  ;;  %v1275_v21 = vadd.f32 %v7804_v27, %v6579_v16  ;;  %v1094_v23 = vpop.f32.mrb[115].mxu0 }
 0x1ce   : > { %v2257_v20 = vmax.f32 %v1749_v10, 0.0  ;;  %v1273_v25 = vadd.f32 %v7804_v27, %v1094_v23  ;;  %2818 = vrot.lane.b32.xlu1 %v1094_v23, %s7289_s14  ;;  %v1400_v33 = vmax.f32 %v1272_v14, 0.0 }
 0x1cf   : > { %v2385_v24 = vpack.c.bf16 %v2259_v12, %v2258_v11  ;;  %v1403_v31 = vmax.f32 %v1275_v21, 0.0 }
 0x1d0   : > { %v2384_v29 = vpack.c.bf16 %v2257_v20, %v2256_v17  ;;  %v6606_v32 = vpop.f32.mrb[4].mxu1  ;;  %v1401_v34 = vmax.f32 %v1273_v25, 0.0  ;;  %2820 = vrot.lane.b32.xlu0 %v6578_v3, %s7289_s14 }
 0x1d1   : > { %v1770_v36 = vadd.f32 %v6606_v32, %v7883_v49  ;;  %v1761_v37 = vpop.f32.mrb[5].mxu1  ;;  %v1473_v40 = vpack.c.bf16 %v1403_v31, %v1402_v19 }
 0x1d2   : > { %v1762_v41 = vadd.f32 %v7883_v49, %v1761_v37  ;;  %v6607_v42 = vpop.f32.mrb[6].mxu1  ;;  %6732 = vmatprep.mubr.msk.bf16.mxu0 %vm416_vm0, %v2384_v29  ;;  %v1472_v44 = vpack.c.bf16 %v1401_v34, %v1400_v33  ;;  %2822 = vrot.lane.b32.xlu1 %v6579_v16, %s7289_s14  ;;  %v6582_v48 = vpop.f32.mrb[116].mxu0 }
 0x1d3   : > { %v1773_v46 = vadd.f32 %v6607_v42, %v7883_v49  ;;  %v1764_v51 = vpop.f32.mrb[7].mxu1  ;;  %6733 = vmatmul.mubr.msk.bf16.vlgmr.msra.gmra.mrb[128].mxu0 %vm416_vm0, %v2385_v24  ;;  %v1278_v52 = vadd.f32 %v7804_v27, %v6582_v48  ;;  %v1107_v53 = vpop.f32.mrb[117].mxu0  ;;  %v2262_v55 = vmax.f32 %v1770_v36, 0.0 }
 0x1d4   : > { %v1765_v54 = vadd.f32 %v7883_v49, %v1764_v51  ;;  %v1276_v59 = vadd.f32 %v7804_v27, %v1107_v53  ;;  %6712 = vmatprep.mubr.msk.bf16.mxu1 %vm1518_vm1, %v1472_v44  ;;  %2824 = vrot.lane.b32.xlu0 %v1107_v53, %s7289_s14  ;;  %v6583_v61 = vpop.f32.mrb[118].mxu0  ;;  %v2260_v0 = vmax.f32 %v1762_v41, 0.0  ;;  %v7925_v16 = vpop.permute.xlu1 %2638 }
 0x1d5   : > { %v2263_v58 = vmax.f32 %v1773_v46, 0.0  ;;  %v1406_v2 = vmax.f32 %v1278_v52, 0.0  ;;  %v1279_v4 = vadd.f32 %v7804_v27, %v6583_v61  ;;  %v1110_v7 = vpop.f32.mrb[119].mxu0  ;;  %6713 = vmatmul.mubr.msk.bf16.gmra.mrb[112].mxu1 %vm1518_vm1, %v1473_v40  ;;  %v7934_v34 = vpop.permute.xlu0 %2640 }
 0x1d6   : > { %v2261_v3 = vmax.f32 %v1765_v54, 0.0  ;;  %v1277_v10 = vadd.f32 %v7804_v27, %v1110_v7  ;;  %2826 = vrot.lane.b32.xlu1 %v1110_v7, %s7289_s14  ;;  %v1404_v17 = vmax.f32 %v1276_v59, 0.0 }
 0x1d7   : > { %v2387_v8 = vpack.c.bf16 %v2263_v58, %v2262_v55  ;;  %v1407_v12 = vmax.f32 %v1279_v4, 0.0 }
 0x1d8   : > { %v2386_v11 = vpack.c.bf16 %v2261_v3, %v2260_v0  ;;  %v6610_v14 = vpop.f32.mrb[8].mxu1  ;;  %v1405_v19 = vmax.f32 %v1277_v10, 0.0  ;;  %2828 = vrot.lane.b32.xlu0 %v6582_v48, %s7289_s14  ;;  %v7943_v55 = vpop.permute.xlu1 %2642 }
 0x1d9   : > { %v1786_v20 = vadd.f32 %v6610_v14, %v7883_v49  ;;  %v1777_v21 = vpop.f32.mrb[9].mxu1  ;;  %v1475_v23 = vpack.c.bf16 %v1407_v12, %v1406_v2  ;;  %v7949_v10 = vpop.permute.xlu0 %2644 }
 0x1da   : > { %v1778_v24 = vadd.f32 %v7883_v49, %v1777_v21  ;;  %v6611_v25 = vpop.f32.mrb[10].mxu1  ;;  %6736 = vmatprep.mubr.msk.bf16.mxu0 %vm416_vm0, %v2386_v11  ;;  %v1474_v29 = vpack.c.bf16 %v1405_v19, %v1404_v17  ;;  %2830 = vrot.lane.b32.xlu1 %v6583_v61, %s7289_s14  ;;  %v6586_v32 = vpop.f32.mrb[120].mxu0 }
 0x1db   : > { %v1789_v31 = vadd.f32 %v6611_v25, %v7883_v49  ;;  %v1780_v33 = vpop.f32.mrb[11].mxu1  ;;  %6737 = vmatmul.mubr.msk.bf16.gmra.mrb[132].mxu0 %vm416_vm0, %v2387_v8  ;;  %v1282_v36 = vadd.f32 %v7804_v27, %v6586_v32  ;;  %v1123_v37 = vpop.f32.mrb[121].mxu0  ;;  %v2266_v41 = vmax.f32 %v1786_v20, 0.0 }
 0x1dc   : > { %v1781_v40 = vadd.f32 %v7883_v49, %v1780_v33  ;;  %v1280_v44 = vadd.f32 %v7804_v27, %v1123_v37  ;;  %6716 = vmatprep.mubr.msk.bf16.mxu1 %vm1518_vm1, %v1474_v29  ;;  %2832 = vrot.lane.b32.xlu0 %v1123_v37, %s7289_s14  ;;  %v6587_v46 = vpop.f32.mrb[122].mxu0  ;;  %v2264_v48 = vmax.f32 %v1778_v24, 0.0  ;;  %v7958_v29 = vpop.permute.xlu1 %2646 }
 0x1dd   : > { %v2267_v42 = vmax.f32 %v1789_v31, 0.0  ;;  %v1410_v51 = vmax.f32 %v1282_v36, 0.0  ;;  %v1283_v53 = vadd.f32 %v7804_v27, %v6587_v46  ;;  %v1126_v54 = vpop.f32.mrb[123].mxu0  ;;  %6717 = vmatmul.mubr.msk.bf16.gmra.mrb[116].mxu1 %vm1518_vm1, %v1475_v23 }
 0x1de   : > { %v2265_v52 = vmax.f32 %v1781_v40, 0.0  ;;  %v1281_v59 = vadd.f32 %v7804_v27, %v1126_v54  ;;  %2834 = vrot.lane.b32.xlu1 %v1126_v54, %s7289_s14  ;;  %v1408_v3 = vmax.f32 %v1280_v44, 0.0  ;;  %v7967_v54 = vpop.permute.xlu0 %2648 }
 0x1df   : > { %v2389_v58 = vpack.c.bf16 %v2267_v42, %v2266_v41  ;;  %v1411_v0 = vmax.f32 %v1283_v53, 0.0 }
 0x1e0   : > { %v2388_v61 = vpack.c.bf16 %v2265_v52, %v2264_v48  ;;  %v6614_v2 = vpop.f32.mrb[12].mxu1  ;;  %v1409_v4 = vmax.f32 %v1281_v59, 0.0  ;;  %2836 = vrot.lane.b32.xlu0 %v6586_v32, %s7289_s14 }
 0x1e1   : > { %v1802_v7 = vadd.f32 %v6614_v2, %v7883_v49  ;;  %v1793_v8 = vpop.f32.mrb[13].mxu1  ;;  %v1477_v11 = vpack.c.bf16 %v1411_v0, %v1410_v51 }
 0x1e2   : > { %v1794_v12 = vadd.f32 %v7883_v49, %v1793_v8  ;;  %v6615_v14 = vpop.f32.mrb[14].mxu1  ;;  %6740 = vmatprep.mubr.msk.bf16.mxu0 %vm416_vm0, %v2388_v61  ;;  %v1476_v17 = vpack.c.bf16 %v1409_v4, %v1408_v3  ;;  %2838 = vrot.lane.b32.xlu1 %v6587_v46, %s7289_s14  ;;  %v6590_v20 = vpop.f32.mrb[124].mxu0 }
 0x1e3   : > { %v1805_v19 = vadd.f32 %v6615_v14, %v7883_v49  ;;  %v1796_v21 = vpop.f32.mrb[15].mxu1  ;;  %6741 = vmatmul.mubr.msk.bf16.gmra.mrb[136].mxu0 %vm416_vm0, %v2389_v58  ;;  %v1286_v23 = vadd.f32 %v7804_v27, %v6590_v20  ;;  %v1139_v24 = vpop.f32.mrb[125].mxu0  ;;  %v2270_v31 = vmax.f32 %v1802_v7, 0.0 }
 0x1e4   : > { %v1797_v25 = vadd.f32 %v7883_v49, %v1796_v21  ;;  %v1284_v33 = vadd.f32 %v7804_v27, %v1139_v24  ;;  %6720 = vmatprep.mubr.msk.bf16.mxu1 %vm1518_vm1, %v1476_v17  ;;  %2840 = vrot.lane.b32.xlu0 %v1139_v24, %s7289_s14  ;;  %v6591_v36 = vpop.f32.mrb[126].mxu0  ;;  %v2268_v37 = vmax.f32 %v1794_v12, 0.0 }
 0x1e5   : > { %v2271_v32 = vmax.f32 %v1805_v19, 0.0  ;;  %v1414_v40 = vmax.f32 %v1286_v23, 0.0  ;;  %v1287_v42 = vadd.f32 %v7804_v27, %v6591_v36  ;;  %v1142_v44 = vpop.f32.mrb[127].mxu0  ;;  %6721 = vmatmul.mubr.msk.bf16.gmra.mrb[120].mxu1 %vm1518_vm1, %v1477_v11 }
 0x1e6   : > { %v2269_v41 = vmax.f32 %v1797_v25, 0.0  ;;  %v1285_v48 = vadd.f32 %v7804_v27, %v1142_v44  ;;  %2842 = vrot.lane.b32.xlu1 %v1142_v44, %s7289_s14  ;;  %v1412_v58 = vmax.f32 %v1284_v33, 0.0  ;;  %v7973_v27 = vpop.permute.xlu1 %2650 }
 0x1e7   : > { %v2391_v46 = vpack.c.bf16 %v2271_v32, %v2270_v31  ;;  %v1415_v52 = vmax.f32 %v1287_v42, 0.0 }
 0x1e8   : > { %v2390_v51 = vpack.c.bf16 %v2269_v41, %v2268_v37  ;;  %v6618_v53 = vpop.f32.mrb[16].mxu1  ;;  %v1413_v59 = vmax.f32 %v1285_v48, 0.0  ;;  %2844 = vrot.lane.b32.xlu0 %v6590_v20, %s7289_s14 }
 0x1e9   : > { %v1818_v61 = vadd.f32 %v6618_v53, %v7883_v49  ;;  %v1809_v0 = vpop.f32.mrb[17].mxu1  ;;  %v1479_v2 = vpack.c.bf16 %v1415_v52, %v1414_v40 }
 0x1ea   : > { %v1810_v3 = vadd.f32 %v7883_v49, %v1809_v0  ;;  %v6619_v4 = vpop.f32.mrb[18].mxu1  ;;  %6744 = vmatprep.mubr.msk.bf16.mxu0 %vm416_vm0, %v2390_v51  ;;  %v1478_v7 = vpack.c.bf16 %v1413_v59, %v1412_v58  ;;  %2846 = vrot.lane.b32.xlu1 %v6591_v36, %s7289_s14  ;;  %v7016_v51 = vld [vmem:[%s9481_s2 + $0x34] ss:$8 sps:$4 sm:$0xff]  }
 0x1eb   : > { %v1821_v8 = vadd.f32 %v6619_v4, %v7883_v49  ;;  %v1812_v11 = vpop.f32.mrb[19].mxu1  ;;  %6745 = vmatmul.mubr.msk.bf16.gmra.mrb[140].mxu0 %vm416_vm0, %v2391_v46  ;;  %v2274_v14 = vmax.f32 %v1818_v61, 0.0  ;;  %6866 = vmatprep.subr.bf16.mxu1 %v7016_v51 }
 0x1ec   : > { %v1813_v12 = vadd.f32 %v7883_v49, %v1812_v11  ;;  %6724 = vmatprep.mubr.msk.bf16.mxu1 %vm1518_vm1, %v1478_v7  ;;  %v2272_v19 = vmax.f32 %v1810_v3, 0.0  ;;  %6867 = vmatpush3.bf16.msra.mxu1 %v7016_v51 }
 0x1ed   : > { %v2275_v17 = vmax.f32 %v1821_v8, 0.0  ;;  %6725 = vmatmul.mubr.msk.bf16.gmra.mrb[124].mxu1 %vm1518_vm1, %v1479_v2 }
 0x1ee   : > { %v2273_v20 = vmax.f32 %v1813_v12, 0.0 }
 0x1ef   : > { %v2393_v21 = vpack.c.bf16 %v2275_v17, %v2274_v14 }
 0x1f0   : > { %v2392_v23 = vpack.c.bf16 %v2273_v20, %v2272_v19  ;;  %v6622_v24 = vpop.f32.mrb[20].mxu1 }
 0x1f1   : > { %v1834_v25 = vadd.f32 %v6622_v24, %v7883_v49  ;;  %v1825_v31 = vpop.f32.mrb[21].mxu1 }
 0x1f2   : > { %v1826_v32 = vadd.f32 %v7883_v49, %v1825_v31  ;;  %v6623_v33 = vpop.f32.mrb[22].mxu1  ;;  %6748 = vmatprep.mubr.msk.bf16.mxu0 %vm416_vm0, %v2392_v23 }
 0x1f3   : > { %v1837_v36 = vadd.f32 %v6623_v33, %v7883_v49  ;;  %v1828_v37 = vpop.f32.mrb[23].mxu1  ;;  %6749 = vmatmul.mubr.msk.bf16.gmra.mrb[144].mxu0 %vm416_vm0, %v2393_v21  ;;  %v2278_v41 = vmax.f32 %v1834_v25, 0.0 }
 0x1f4   : > { %v1829_v40 = vadd.f32 %v7883_v49, %v1828_v37  ;;  %v2276_v44 = vmax.f32 %v1826_v32, 0.0 }
 0x1f5   : > { %v2279_v42 = vmax.f32 %v1837_v36, 0.0 }
 0x1f6   : > { %v2277_v46 = vmax.f32 %v1829_v40, 0.0 }
 0x1f7   : > { %v2395_v48 = vpack.c.bf16 %v2279_v42, %v2278_v41 }
 0x1f8   : > { %v2394_v52 = vpack.c.bf16 %v2277_v46, %v2276_v44  ;;  %v6626_v53 = vpop.f32.mrb[24].mxu1 }
 0x1f9   : > { %v1850_v58 = vadd.f32 %v6626_v53, %v7883_v49  ;;  %v1841_v59 = vpop.f32.mrb[25].mxu1 }
 0x1fa   : > { %v1842_v61 = vadd.f32 %v7883_v49, %v1841_v59  ;;  %v6627_v0 = vpop.f32.mrb[26].mxu1  ;;  %6752 = vmatprep.mubr.msk.bf16.mxu0 %vm416_vm0, %v2394_v52 }
 0x1fb   : > { %v1853_v2 = vadd.f32 %v6627_v0, %v7883_v49  ;;  %v1844_v3 = vpop.f32.mrb[27].mxu1  ;;  %6753 = vmatmul.mubr.msk.bf16.gmra.mrb[148].mxu0 %vm416_vm0, %v2395_v48  ;;  %v2282_v7 = vmax.f32 %v1850_v58, 0.0 }
 0x1fc   : > { %v1845_v4 = vadd.f32 %v7883_v49, %v1844_v3  ;;  %v2280_v11 = vmax.f32 %v1842_v61, 0.0 }
 0x1fd   : > { %v2283_v8 = vmax.f32 %v1853_v2, 0.0 }
 0x1fe   : > { %v2281_v12 = vmax.f32 %v1845_v4, 0.0 }
 0x1ff   : > { %v2397_v14 = vpack.c.bf16 %v2283_v8, %v2282_v7 }
 0x200   : > { %v2396_v17 = vpack.c.bf16 %v2281_v12, %v2280_v11  ;;  %v6630_v19 = vpop.f32.mrb[28].mxu1 }
 0x201   : > { %v1866_v20 = vadd.f32 %v6630_v19, %v7883_v49  ;;  %v1857_v21 = vpop.f32.mrb[29].mxu1 }
 0x202   : > { %v1858_v23 = vadd.f32 %v7883_v49, %v1857_v21  ;;  %v6631_v24 = vpop.f32.mrb[30].mxu1  ;;  %6756 = vmatprep.mubr.msk.bf16.mxu0 %vm416_vm0, %v2396_v17 }
 0x203   : > { %v1869_v25 = vadd.f32 %v6631_v24, %v7883_v49  ;;  %v1860_v31 = vpop.f32.mrb[31].mxu1  ;;  %6757 = vmatmul.mubr.msk.bf16.gmra.mrb[152].mxu0 %vm416_vm0, %v2397_v14  ;;  %v2286_v33 = vmax.f32 %v1866_v20, 0.0 }
 0x204   : > { %v1861_v32 = vadd.f32 %v7883_v49, %v1860_v31  ;;  %v2284_v37 = vmax.f32 %v1858_v23, 0.0 }
 0x205   : > { %v2287_v36 = vmax.f32 %v1869_v25, 0.0 }
 0x206   : > { %v2285_v40 = vmax.f32 %v1861_v32, 0.0 }
 0x207   : > { %v2399_v41 = vpack.c.bf16 %v2287_v36, %v2286_v33 }
 0x208   : > { %v2398_v42 = vpack.c.bf16 %v2285_v40, %v2284_v37  ;;  %v6634_v44 = vpop.f32.mrb[32].mxu1 }
 0x209   : > { %v1882_v46 = vadd.f32 %v6634_v44, %v7883_v49  ;;  %v1873_v48 = vpop.f32.mrb[33].mxu1 }
 0x20a   : > { %v1874_v51 = vadd.f32 %v7883_v49, %v1873_v48  ;;  %v6635_v52 = vpop.f32.mrb[34].mxu1  ;;  %6760 = vmatprep.mubr.msk.bf16.mxu0 %vm416_vm0, %v2398_v42 }
 0x20b   : > { %v1885_v53 = vadd.f32 %v6635_v52, %v7883_v49  ;;  %v1876_v58 = vpop.f32.mrb[35].mxu1  ;;  %6761 = vmatmul.mubr.msk.bf16.gmra.mrb[156].mxu0 %vm416_vm0, %v2399_v41  ;;  %v2290_v61 = vmax.f32 %v1882_v46, 0.0 }
 0x20c   : > { %v1877_v59 = vadd.f32 %v7883_v49, %v1876_v58  ;;  %v2288_v2 = vmax.f32 %v1874_v51, 0.0 }
 0x20d   : > { %v2291_v0 = vmax.f32 %v1885_v53, 0.0 }
 0x20e   : > { %v2289_v3 = vmax.f32 %v1877_v59, 0.0 }
 0x20f   : > { %v2401_v4 = vpack.c.bf16 %v2291_v0, %v2290_v61 }
 0x210   : > { %v2400_v7 = vpack.c.bf16 %v2289_v3, %v2288_v2  ;;  %v6638_v8 = vpop.f32.mrb[36].mxu1 }
 0x211   : > { %v1898_v11 = vadd.f32 %v6638_v8, %v7883_v49  ;;  %v1889_v12 = vpop.f32.mrb[37].mxu1 }
 0x212   : > { %v1890_v14 = vadd.f32 %v7883_v49, %v1889_v12  ;;  %v6639_v17 = vpop.f32.mrb[38].mxu1  ;;  %6764 = vmatprep.mubr.msk.bf16.mxu0 %vm416_vm0, %v2400_v7 }
 0x213   : > { %v1901_v19 = vadd.f32 %v6639_v17, %v7883_v49  ;;  %v1892_v20 = vpop.f32.mrb[39].mxu1  ;;  %6765 = vmatmul.mubr.msk.bf16.gmra.mrb[160].mxu0 %vm416_vm0, %v2401_v4  ;;  %v2294_v23 = vmax.f32 %v1898_v11, 0.0 }
 0x214   : > { %v1893_v21 = vadd.f32 %v7883_v49, %v1892_v20  ;;  %v2292_v25 = vmax.f32 %v1890_v14, 0.0 }
 0x215   : > { %v2295_v24 = vmax.f32 %v1901_v19, 0.0 }
 0x216   : > { %v2293_v31 = vmax.f32 %v1893_v21, 0.0 }
 0x217   : > { %v2403_v32 = vpack.c.bf16 %v2295_v24, %v2294_v23 }
 0x218   : > { %v2402_v33 = vpack.c.bf16 %v2293_v31, %v2292_v25  ;;  %v6642_v36 = vpop.f32.mrb[40].mxu1 }
 0x219   : > { %v1914_v37 = vadd.f32 %v6642_v36, %v7883_v49  ;;  %v1905_v40 = vpop.f32.mrb[41].mxu1 }
 0x21a   : > { %v1906_v41 = vadd.f32 %v7883_v49, %v1905_v40  ;;  %v6643_v42 = vpop.f32.mrb[42].mxu1  ;;  %6768 = vmatprep.mubr.msk.bf16.mxu0 %vm416_vm0, %v2402_v33 }
 0x21b   : > { %v1917_v44 = vadd.f32 %v6643_v42, %v7883_v49  ;;  %v1908_v46 = vpop.f32.mrb[43].mxu1  ;;  %6769 = vmatmul.mubr.msk.bf16.gmra.mrb[164].mxu0 %vm416_vm0, %v2403_v32  ;;  %v2298_v51 = vmax.f32 %v1914_v37, 0.0 }
 0x21c   : > { %v1909_v48 = vadd.f32 %v7883_v49, %v1908_v46  ;;  %v2296_v53 = vmax.f32 %v1906_v41, 0.0 }
 0x21d   : > { %v2299_v52 = vmax.f32 %v1917_v44, 0.0 }
 0x21e   : > { %v2297_v58 = vmax.f32 %v1909_v48, 0.0 }
 0x21f   : > { %v2405_v59 = vpack.c.bf16 %v2299_v52, %v2298_v51 }
 0x220   : > { %v2404_v61 = vpack.c.bf16 %v2297_v58, %v2296_v53  ;;  %v6646_v0 = vpop.f32.mrb[44].mxu1 }
 0x221   : > { %v1930_v2 = vadd.f32 %v6646_v0, %v7883_v49  ;;  %v1921_v3 = vpop.f32.mrb[45].mxu1 }
 0x222   : > { %v1922_v4 = vadd.f32 %v7883_v49, %v1921_v3  ;;  %v6647_v7 = vpop.f32.mrb[46].mxu1  ;;  %6772 = vmatprep.mubr.msk.bf16.mxu0 %vm416_vm0, %v2404_v61 }
 0x223   : > { %v1933_v8 = vadd.f32 %v6647_v7, %v7883_v49  ;;  %v1924_v11 = vpop.f32.mrb[47].mxu1  ;;  %6773 = vmatmul.mubr.msk.bf16.gmra.mrb[168].mxu0 %vm416_vm0, %v2405_v59  ;;  %v2302_v14 = vmax.f32 %v1930_v2, 0.0 }
 0x224   : > { %v1925_v12 = vadd.f32 %v7883_v49, %v1924_v11  ;;  %v2300_v19 = vmax.f32 %v1922_v4, 0.0 }
 0x225   : > { %v2303_v17 = vmax.f32 %v1933_v8, 0.0 }
 0x226   : > { %v2301_v20 = vmax.f32 %v1925_v12, 0.0 }
 0x227   : > { %v2407_v21 = vpack.c.bf16 %v2303_v17, %v2302_v14 }
 0x228   : > { %v2406_v23 = vpack.c.bf16 %v2301_v20, %v2300_v19  ;;  %v6650_v24 = vpop.f32.mrb[48].mxu1 }
 0x229   : > { %v1946_v25 = vadd.f32 %v6650_v24, %v7883_v49  ;;  %v1937_v31 = vpop.f32.mrb[49].mxu1 }
 0x22a   : > { %v1938_v32 = vadd.f32 %v7883_v49, %v1937_v31  ;;  %v6651_v33 = vpop.f32.mrb[50].mxu1  ;;  %6776 = vmatprep.mubr.msk.bf16.mxu0 %vm416_vm0, %v2406_v23 }
 0x22b   : > { %v1949_v36 = vadd.f32 %v6651_v33, %v7883_v49  ;;  %v1940_v37 = vpop.f32.mrb[51].mxu1  ;;  %6777 = vmatmul.mubr.msk.bf16.gmra.mrb[172].mxu0 %vm416_vm0, %v2407_v21  ;;  %v2306_v41 = vmax.f32 %v1946_v25, 0.0 }
 0x22c   : > { %v1941_v40 = vadd.f32 %v7883_v49, %v1940_v37  ;;  %v2304_v44 = vmax.f32 %v1938_v32, 0.0 }
 0x22d   : > { %v2307_v42 = vmax.f32 %v1949_v36, 0.0 }
 0x22e   : > { %v2305_v46 = vmax.f32 %v1941_v40, 0.0 }
 0x22f   : > { %v2409_v48 = vpack.c.bf16 %v2307_v42, %v2306_v41 }
 0x230   : > { %v2408_v51 = vpack.c.bf16 %v2305_v46, %v2304_v44  ;;  %v6654_v52 = vpop.f32.mrb[52].mxu1 }
 0x231   : > { %v1962_v53 = vadd.f32 %v6654_v52, %v7883_v49  ;;  %v1953_v58 = vpop.f32.mrb[53].mxu1 }
 0x232   : > { %v1954_v59 = vadd.f32 %v7883_v49, %v1953_v58  ;;  %v6655_v61 = vpop.f32.mrb[54].mxu1  ;;  %6780 = vmatprep.mubr.msk.bf16.mxu0 %vm416_vm0, %v2408_v51 }
 0x233   : > { %v1965_v0 = vadd.f32 %v6655_v61, %v7883_v49  ;;  %v1956_v2 = vpop.f32.mrb[55].mxu1  ;;  %6781 = vmatmul.mubr.msk.bf16.gmra.mrb[176].mxu0 %vm416_vm0, %v2409_v48  ;;  %v2310_v4 = vmax.f32 %v1962_v53, 0.0 }
 0x234   : > { %v1957_v3 = vadd.f32 %v7883_v49, %v1956_v2  ;;  %v2308_v8 = vmax.f32 %v1954_v59, 0.0 }
 0x235   : > { %v2311_v7 = vmax.f32 %v1965_v0, 0.0 }
 0x236   : > { %v2309_v11 = vmax.f32 %v1957_v3, 0.0 }
 0x237   : > { %v2411_v12 = vpack.c.bf16 %v2311_v7, %v2310_v4 }
 0x238   : > { %v2410_v14 = vpack.c.bf16 %v2309_v11, %v2308_v8  ;;  %v6658_v17 = vpop.f32.mrb[56].mxu1 }
 0x239   : > { %v1978_v19 = vadd.f32 %v6658_v17, %v7883_v49  ;;  %v1969_v20 = vpop.f32.mrb[57].mxu1 }
 0x23a   : > { %v1970_v21 = vadd.f32 %v7883_v49, %v1969_v20  ;;  %v6659_v23 = vpop.f32.mrb[58].mxu1  ;;  %6784 = vmatprep.mubr.msk.bf16.mxu0 %vm416_vm0, %v2410_v14 }
 0x23b   : > { %v1981_v24 = vadd.f32 %v6659_v23, %v7883_v49  ;;  %v1972_v25 = vpop.f32.mrb[59].mxu1  ;;  %6785 = vmatmul.mubr.msk.bf16.gmra.mrb[180].mxu0 %vm416_vm0, %v2411_v12  ;;  %v2314_v32 = vmax.f32 %v1978_v19, 0.0 }
 0x23c   : > { %v1973_v31 = vadd.f32 %v7883_v49, %v1972_v25  ;;  %v2312_v36 = vmax.f32 %v1970_v21, 0.0 }
 0x23d   : > { %v2315_v33 = vmax.f32 %v1981_v24, 0.0 }
 0x23e   : > { %v2313_v37 = vmax.f32 %v1973_v31, 0.0 }
 0x23f   : > { %v2413_v40 = vpack.c.bf16 %v2315_v33, %v2314_v32 }
 0x240   : > { %v2412_v41 = vpack.c.bf16 %v2313_v37, %v2312_v36  ;;  %v6662_v42 = vpop.f32.mrb[60].mxu1 }
 0x241   : > { %v1994_v44 = vadd.f32 %v6662_v42, %v7883_v49  ;;  %v1985_v46 = vpop.f32.mrb[61].mxu1 }
 0x242   : > { %v1986_v48 = vadd.f32 %v7883_v49, %v1985_v46  ;;  %v6663_v51 = vpop.f32.mrb[62].mxu1  ;;  %6788 = vmatprep.mubr.msk.bf16.mxu0 %vm416_vm0, %v2412_v41 }
 0x243   : > { %v1997_v52 = vadd.f32 %v6663_v51, %v7883_v49  ;;  %v1988_v53 = vpop.f32.mrb[63].mxu1  ;;  %6789 = vmatmul.mubr.msk.bf16.gmra.mrb[184].mxu0 %vm416_vm0, %v2413_v40  ;;  %v2318_v59 = vmax.f32 %v1994_v44, 0.0 }
 0x244   : > { %v1989_v58 = vadd.f32 %v7883_v49, %v1988_v53  ;;  %v2316_v0 = vmax.f32 %v1986_v48, 0.0 }
 0x245   : > { %v2319_v61 = vmax.f32 %v1997_v52, 0.0 }
 0x246   : > { %v2317_v2 = vmax.f32 %v1989_v58, 0.0 }
 0x247   : > { %v2415_v3 = vpack.c.bf16 %v2319_v61, %v2318_v59 }
 0x248   : > { %v2414_v4 = vpack.c.bf16 %v2317_v2, %v2316_v0  ;;  %v6666_v7 = vpop.f32.mrb[64].mxu1 }
 0x249   : > { %v2010_v8 = vadd.f32 %v6666_v7, %v7883_v49  ;;  %v2001_v11 = vpop.f32.mrb[65].mxu1 }
 0x24a   : > { %v2002_v12 = vadd.f32 %v7883_v49, %v2001_v11  ;;  %v6667_v14 = vpop.f32.mrb[66].mxu1  ;;  %6792 = vmatprep.mubr.msk.bf16.mxu0 %vm416_vm0, %v2414_v4 }
 0x24b   : > { %v2013_v17 = vadd.f32 %v6667_v14, %v7883_v49  ;;  %v2004_v19 = vpop.f32.mrb[67].mxu1  ;;  %6793 = vmatmul.mubr.msk.bf16.gmra.mrb[188].mxu0 %vm416_vm0, %v2415_v3  ;;  %v2322_v21 = vmax.f32 %v2010_v8, 0.0 }
 0x24c   : > { %v2005_v20 = vadd.f32 %v7883_v49, %v2004_v19  ;;  %v2320_v24 = vmax.f32 %v2002_v12, 0.0 }
 0x24d   : > { %v2323_v23 = vmax.f32 %v2013_v17, 0.0 }
 0x24e   : > { %v2321_v25 = vmax.f32 %v2005_v20, 0.0 }
 0x24f   : > { %v2417_v31 = vpack.c.bf16 %v2323_v23, %v2322_v21 }
 0x250   : > { %v2416_v32 = vpack.c.bf16 %v2321_v25, %v2320_v24  ;;  %v6670_v33 = vpop.f32.mrb[68].mxu1 }
 0x251   : > { %v2026_v36 = vadd.f32 %v6670_v33, %v7883_v49  ;;  %v2017_v37 = vpop.f32.mrb[69].mxu1 }
 0x252   : > { %v2018_v40 = vadd.f32 %v7883_v49, %v2017_v37  ;;  %v6671_v41 = vpop.f32.mrb[70].mxu1  ;;  %6796 = vmatprep.mubr.msk.bf16.mxu0 %vm416_vm0, %v2416_v32 }
 0x253   : > { %v2029_v42 = vadd.f32 %v6671_v41, %v7883_v49  ;;  %v2020_v44 = vpop.f32.mrb[71].mxu1  ;;  %6797 = vmatmul.mubr.msk.bf16.gmra.mrb[192].mxu0 %vm416_vm0, %v2417_v31  ;;  %v2326_v48 = vmax.f32 %v2026_v36, 0.0 }
 0x254   : > { %v2021_v46 = vadd.f32 %v7883_v49, %v2020_v44  ;;  %v2324_v52 = vmax.f32 %v2018_v40, 0.0 }
 0x255   : > { %v2327_v51 = vmax.f32 %v2029_v42, 0.0 }
 0x256   : > { %v2325_v53 = vmax.f32 %v2021_v46, 0.0 }
 0x257   : > { %v2419_v58 = vpack.c.bf16 %v2327_v51, %v2326_v48 }
 0x258   : > { %v2418_v59 = vpack.c.bf16 %v2325_v53, %v2324_v52  ;;  %v6674_v61 = vpop.f32.mrb[72].mxu1 }
 0x259   : > { %v2042_v0 = vadd.f32 %v6674_v61, %v7883_v49  ;;  %v2033_v2 = vpop.f32.mrb[73].mxu1 }
 0x25a   : > { %v2034_v3 = vadd.f32 %v7883_v49, %v2033_v2  ;;  %v6675_v4 = vpop.f32.mrb[74].mxu1  ;;  %6800 = vmatprep.mubr.msk.bf16.mxu0 %vm416_vm0, %v2418_v59 }
 0x25b   : > { %v2045_v7 = vadd.f32 %v6675_v4, %v7883_v49  ;;  %v2036_v8 = vpop.f32.mrb[75].mxu1  ;;  %6801 = vmatmul.mubr.msk.bf16.gmra.mrb[196].mxu0 %vm416_vm0, %v2419_v58  ;;  %v2330_v12 = vmax.f32 %v2042_v0, 0.0 }
 0x25c   : > { %v2037_v11 = vadd.f32 %v7883_v49, %v2036_v8  ;;  %v2328_v17 = vmax.f32 %v2034_v3, 0.0 }
 0x25d   : > { %v2331_v14 = vmax.f32 %v2045_v7, 0.0 }
 0x25e   : > { %v2329_v19 = vmax.f32 %v2037_v11, 0.0 }
 0x25f   : > { %v2421_v20 = vpack.c.bf16 %v2331_v14, %v2330_v12 }
 0x260   : > { %v2420_v21 = vpack.c.bf16 %v2329_v19, %v2328_v17  ;;  %v6678_v23 = vpop.f32.mrb[76].mxu1 }
 0x261   : > { %v2058_v24 = vadd.f32 %v6678_v23, %v7883_v49  ;;  %v2049_v25 = vpop.f32.mrb[77].mxu1 }
 0x262   : > { %v2050_v31 = vadd.f32 %v7883_v49, %v2049_v25  ;;  %v6679_v32 = vpop.f32.mrb[78].mxu1  ;;  %6804 = vmatprep.mubr.msk.bf16.mxu0 %vm416_vm0, %v2420_v21 }
 0x263   : > { %v2061_v33 = vadd.f32 %v6679_v32, %v7883_v49  ;;  %v2052_v36 = vpop.f32.mrb[79].mxu1  ;;  %6805 = vmatmul.mubr.msk.bf16.gmra.mrb[200].mxu0 %vm416_vm0, %v2421_v20  ;;  %v2334_v40 = vmax.f32 %v2058_v24, 0.0 }
 0x264   : > { %v2053_v37 = vadd.f32 %v7883_v49, %v2052_v36  ;;  %v2332_v42 = vmax.f32 %v2050_v31, 0.0 }
 0x265   : > { %v2335_v41 = vmax.f32 %v2061_v33, 0.0  ;;  %v8086_v33 = vpop.permute.xlu0 %2652 }
 0x266   : > { %v2333_v44 = vmax.f32 %v2053_v37, 0.0 }
 0x267   : > { %v2423_v46 = vpack.c.bf16 %v2335_v41, %v2334_v40  ;;  %v8088_v41 = vpop.permute.xlu1 %2654 }
 0x268   : > { %v2422_v48 = vpack.c.bf16 %v2333_v44, %v2332_v42  ;;  %v6682_v51 = vpop.f32.mrb[80].mxu1 }
 0x269   : > { %v2074_v52 = vadd.f32 %v6682_v51, %v7883_v49  ;;  %v2065_v53 = vpop.f32.mrb[81].mxu1 }
 0x26a   : > { %v2066_v58 = vadd.f32 %v7883_v49, %v2065_v53  ;;  %v6683_v59 = vpop.f32.mrb[82].mxu1  ;;  %6808 = vmatprep.mubr.msk.bf16.mxu0 %vm416_vm0, %v2422_v48 }
 0x26b   : > { %v2077_v61 = vadd.f32 %v6683_v59, %v7883_v49  ;;  %v2068_v0 = vpop.f32.mrb[83].mxu1  ;;  %6809 = vmatmul.mubr.msk.bf16.gmra.mrb[204].mxu0 %vm416_vm0, %v2423_v46  ;;  %v2338_v3 = vmax.f32 %v2074_v52, 0.0  ;;  %v8095_v59 = vpop.permute.xlu0 %2656 }
 0x26c   : > { %v2069_v2 = vadd.f32 %v7883_v49, %v2068_v0  ;;  %v2336_v7 = vmax.f32 %v2066_v58, 0.0 }
 0x26d   : > { %v2339_v4 = vmax.f32 %v2077_v61, 0.0 }
 0x26e   : > { %v2337_v8 = vmax.f32 %v2069_v2, 0.0 }
 0x26f   : > { %v2425_v11 = vpack.c.bf16 %v2339_v4, %v2338_v3  ;;  %v8098_v3 = vpop.permute.xlu1 %2658 }
 0x270   : > { %v2424_v12 = vpack.c.bf16 %v2337_v8, %v2336_v7  ;;  %v6686_v14 = vpop.f32.mrb[84].mxu1 }
 0x271   : > { %v2090_v17 = vadd.f32 %v6686_v14, %v7883_v49  ;;  %v2081_v19 = vpop.f32.mrb[85].mxu1 }
 0x272   : > { %v2082_v20 = vadd.f32 %v7883_v49, %v2081_v19  ;;  %v6687_v21 = vpop.f32.mrb[86].mxu1  ;;  %6812 = vmatprep.mubr.msk.bf16.mxu0 %vm416_vm0, %v2424_v12  ;;  %v8101_v19 = vpop.permute.xlu0 %2660 }
 0x273   : > { %v2093_v23 = vadd.f32 %v6687_v21, %v7883_v49  ;;  %v2084_v24 = vpop.f32.mrb[87].mxu1  ;;  %6813 = vmatmul.mubr.msk.bf16.gmra.mrb[208].mxu0 %vm416_vm0, %v2425_v11  ;;  %v2342_v31 = vmax.f32 %v2090_v17, 0.0 }
 0x274   : > { %v2085_v25 = vadd.f32 %v7883_v49, %v2084_v24  ;;  %v2340_v36 = vmax.f32 %v2082_v20, 0.0 }
 0x275   : > { %v2343_v32 = vmax.f32 %v2093_v23, 0.0 }
 0x276   : > { %v2341_v37 = vmax.f32 %v2085_v25, 0.0  ;;  %v8107_v25 = vpop.permute.xlu1 %2662 }
 0x277   : > { %v2427_v40 = vpack.c.bf16 %v2343_v32, %v2342_v31 }
 0x278   : > { %v2426_v42 = vpack.c.bf16 %v2341_v37, %v2340_v36  ;;  %v6690_v44 = vpop.f32.mrb[88].mxu1 }
 0x279   : > { %v2106_v46 = vadd.f32 %v6690_v44, %v7883_v49  ;;  %v2097_v48 = vpop.f32.mrb[89].mxu1  ;;  %v8110_v44 = vpop.permute.xlu0 %2664 }
 0x27a   : > { %v2098_v51 = vadd.f32 %v7883_v49, %v2097_v48  ;;  %v6691_v52 = vpop.f32.mrb[90].mxu1  ;;  %6816 = vmatprep.mubr.msk.bf16.mxu0 %vm416_vm0, %v2426_v42 }
 0x27b   : > { %v2109_v53 = vadd.f32 %v6691_v52, %v7883_v49  ;;  %v2100_v58 = vpop.f32.mrb[91].mxu1  ;;  %6817 = vmatmul.mubr.msk.bf16.gmra.mrb[212].mxu0 %vm416_vm0, %v2427_v40  ;;  %v2346_v0 = vmax.f32 %v2106_v46, 0.0 }
 0x27c   : > { %v2101_v61 = vadd.f32 %v7883_v49, %v2100_v58  ;;  %v2344_v4 = vmax.f32 %v2098_v51, 0.0 }
 0x27d   : > { %v2347_v2 = vmax.f32 %v2109_v53, 0.0  ;;  %v8113_v53 = vpop.permute.xlu1 %2666 }
 0x27e   : > { %v2345_v7 = vmax.f32 %v2101_v61, 0.0 }
 0x27f   : > { %v2429_v8 = vpack.c.bf16 %v2347_v2, %v2346_v0 }
 0x280   : > { %v2428_v11 = vpack.c.bf16 %v2345_v7, %v2344_v4  ;;  %v6694_v12 = vpop.f32.mrb[92].mxu1 }
 0x281   : > { %v2122_v14 = vadd.f32 %v6694_v12, %v7883_v49  ;;  %v2113_v17 = vpop.f32.mrb[93].mxu1 }
 0x282   : > { %v2114_v20 = vadd.f32 %v7883_v49, %v2113_v17  ;;  %v6695_v21 = vpop.f32.mrb[94].mxu1  ;;  %6820 = vmatprep.mubr.msk.bf16.mxu0 %vm416_vm0, %v2428_v11  ;;  %v8120_v11 = vpop.permute.xlu0 %2668 }
 0x283   : > { %v2125_v23 = vadd.f32 %v6695_v21, %v7883_v49  ;;  %v2116_v24 = vpop.f32.mrb[95].mxu1  ;;  %6821 = vmatmul.mubr.msk.bf16.gmra.mrb[216].mxu0 %vm416_vm0, %v2429_v8  ;;  %v2350_v32 = vmax.f32 %v2122_v14, 0.0 }
 0x284   : > { %v2117_v31 = vadd.f32 %v7883_v49, %v2116_v24  ;;  %v2348_v37 = vmax.f32 %v2114_v20, 0.0  ;;  %v8122_v20 = vpop.permute.xlu1 %2670  ;;  %v8127_v24 = vld [vmem:[%s9482_s3 + $0x1] ss:$0 sm:$0xff] }
 0x285   : > { %v2351_v36 = vmax.f32 %v2125_v23, 0.0 }
 0x286   : > { %v2349_v40 = vmax.f32 %v2117_v31, 0.0 }
 0x287   : > { %v2431_v42 = vpack.c.bf16 %v2351_v36, %v2350_v32 }
 0x288   : > { %v2430_v46 = vpack.c.bf16 %v2349_v40, %v2348_v37  ;;  %v6698_v48 = vpop.f32.mrb[96].mxu1 }
 0x289   : > { %v2138_v51 = vadd.f32 %v6698_v48, %v7883_v49  ;;  %v2129_v52 = vpop.f32.mrb[97].mxu1 }
 0x28a   : > { %v2130_v58 = vadd.f32 %v7883_v49, %v2129_v52  ;;  %v6699_v61 = vpop.f32.mrb[98].mxu1  ;;  %6824 = vmatprep.mubr.msk.bf16.mxu0 %vm416_vm0, %v2430_v46  ;;  %v8137_v52 = vpop.permute.xlu1 %2674 }
 0x28b   : > { %v2141_v0 = vadd.f32 %v6699_v61, %v7883_v49  ;;  %v2132_v2 = vpop.f32.mrb[99].mxu1  ;;  %6825 = vmatmul.mubr.msk.bf16.gmra.mrb[220].mxu0 %vm416_vm0, %v2431_v42  ;;  %v2354_v7 = vmax.f32 %v2138_v51, 0.0  ;;  %v8134_v42 = vpop.permute.xlu0 %2672  ;;  %9485 = vst [vmem:[#allocation3_spill] sm:$0xff] %v8137_v52 }
 0x28c   : > { %v2133_v4 = vadd.f32 %v7883_v49, %v2132_v2  ;;  %v2352_v12 = vmax.f32 %v2130_v58, 0.0  ;;  %9484 = vst [vmem:[#allocation2_spill] sm:$0xff] %v8134_v42 }
 0x28d   : > { %v2355_v8 = vmax.f32 %v2141_v0, 0.0 }
 0x28e   : > { %v2353_v14 = vmax.f32 %v2133_v4, 0.0 }
 0x28f   : > { %v2433_v17 = vpack.c.bf16 %v2355_v8, %v2354_v7 }
 0x290   : > { %v2432_v21 = vpack.c.bf16 %v2353_v14, %v2352_v12  ;;  %v6702_v23 = vpop.f32.mrb[100].mxu1  ;;  %v8140_v12 = vpop.permute.xlu0 %2676 }
 0x291   : > { %v2154_v31 = vadd.f32 %v8127_v24, %v6702_v23  ;;  %v2145_v32 = vpop.f32.mrb[101].mxu1 }
 0x292   : > { %v2146_v49 = vadd.f32 %v8127_v24, %v2145_v32  ;;  %v6703_v36 = vpop.f32.mrb[102].mxu1  ;;  %6828 = vmatprep.mubr.msk.bf16.mxu0 %vm416_vm0, %v2432_v21 }
 0x293   : > { %v2157_v37 = vadd.f32 %v8127_v24, %v6703_v36  ;;  %v2148_v40 = vpop.f32.mrb[103].mxu1  ;;  %6829 = vmatmul.mubr.msk.bf16.gmra.mrb[224].mxu0 %vm416_vm0, %v2433_v17  ;;  %v2358_v48 = vmax.f32 %v2154_v31, 0.0  ;;  %v8146_v31 = vpop.permute.xlu1 %2678 }
 0x294   : > { %v2149_v46 = vadd.f32 %v8127_v24, %v2148_v40  ;;  %v2356_v58 = vmax.f32 %v2146_v49, 0.0  ;;  %9486 = vst [vmem:[#allocation4_spill] sm:$0xff] %v8146_v31 }
 0x295   : > { %v2359_v51 = vmax.f32 %v2157_v37, 0.0 }
 0x296   : > { %v2357_v61 = vmax.f32 %v2149_v46, 0.0 }
 0x297   : > { %v2435_v0 = vpack.c.bf16 %v2359_v51, %v2358_v48  ;;  %v8149_v48 = vpop.permute.xlu0 %2680 }
 0x298   : > { %v2434_v2 = vpack.c.bf16 %v2357_v61, %v2356_v58  ;;  %v6706_v4 = vpop.f32.mrb[104].mxu1  ;;  %9487 = vst [vmem:[#allocation5_spill] sm:$0xff] %v8149_v48 }
 0x299   : > { %v2170_v7 = vadd.f32 %v8127_v24, %v6706_v4  ;;  %v2161_v8 = vpop.f32.mrb[105].mxu1  ;;  %v8152_v4 = vpop.permute.xlu1 %2682 }
 0x29a   : > { %v2162_v14 = vadd.f32 %v8127_v24, %v2161_v8  ;;  %v6707_v17 = vpop.f32.mrb[106].mxu1  ;;  %6832 = vmatprep.mubr.msk.bf16.mxu0 %vm416_vm0, %v2434_v2  ;;  %9488 = vst [vmem:[#allocation6_spill] sm:$0xff] %v8152_v4 }
 0x29b   : > { %v2173_v21 = vadd.f32 %v8127_v24, %v6707_v17  ;;  %v2164_v23 = vpop.f32.mrb[107].mxu1  ;;  %6833 = vmatmul.mubr.msk.bf16.gmra.mrb[228].mxu0 %vm416_vm0, %v2435_v0  ;;  %v2362_v49 = vmax.f32 %v2170_v7, 0.0 }
 0x29c   : > { %v2165_v32 = vadd.f32 %v8127_v24, %v2164_v23  ;;  %v2360_v37 = vmax.f32 %v2162_v14, 0.0 }
 0x29d   : > { %v2363_v36 = vmax.f32 %v2173_v21, 0.0 }
 0x29e   : > { %v2361_v40 = vmax.f32 %v2165_v32, 0.0  ;;  %v8159_v32 = vpop.permute.xlu0 %2684 }
 0x29f   : > { %v2437_v46 = vpack.c.bf16 %v2363_v36, %v2362_v49  ;;  %9489 = vst [vmem:[#allocation7_spill] sm:$0xff] %v8159_v32 }
 0x2a0   : > { %v2436_v51 = vpack.c.bf16 %v2361_v40, %v2360_v37  ;;  %v6710_v58 = vpop.f32.mrb[108].mxu1  ;;  %v8164_v37 = vld [vmem:[%s9482_s3 + $0x2] ss:$0 sm:$0xff] }
 0x2a1   : > { %v2186_v61 = vadd.f32 %v8127_v24, %v6710_v58  ;;  %v2177_v2 = vpop.f32.mrb[109].mxu1 }
 0x2a2   : > { %v2178_v0 = vadd.f32 %v8127_v24, %v2177_v2  ;;  %v6711_v8 = vpop.f32.mrb[110].mxu1  ;;  %6836 = vmatprep.mubr.msk.bf16.mxu0 %vm416_vm0, %v2436_v51 }
 0x2a3   : > { %v2189_v7 = vadd.f32 %v8127_v24, %v6711_v8  ;;  %v2180_v17 = vpop.f32.mrb[111].mxu1  ;;  %6837 = vmatmul.mubr.msk.bf16.gmra.mrb[232].mxu0 %vm416_vm0, %v2437_v46  ;;  %v2366_v21 = vmax.f32 %v2186_v61, 0.0  ;;  %v8167_v8 = vpop.permute.xlu1 %2686 }
 0x2a4   : > { %v2181_v14 = vadd.f32 %v8127_v24, %v2180_v17  ;;  %v2364_v49 = vmax.f32 %v2178_v0, 0.0  ;;  %9490 = vst [vmem:[#allocation8_spill] sm:$0xff] %v8167_v8 }
 0x2a5   : > { %v2367_v23 = vmax.f32 %v2189_v7, 0.0 }
 0x2a6   : > { %v2365_v36 = vmax.f32 %v2181_v14, 0.0  ;;  %v6734_v40 = vpop.f32.mrb[128].mxu0 }
 0x2a7   : > { %v2439_v51 = vpack.c.bf16 %v2367_v23, %v2366_v21  ;;  %v3211_v58 = vadd.f32 %v6734_v40, %v7778_v1  ;;  %v3202_v2 = vpop.f32.mrb[129].mxu0 }
 0x2a8   : > { %v2438_v46 = vpack.c.bf16 %v2365_v36, %v2364_v49  ;;  %v3203_v61 = vadd.f32 %v3202_v2, %v7769_v57  ;;  %v6735_v7 = vpop.f32.mrb[130].mxu0  ;;  %v6714_v0 = vpop.f32.mrb[112].mxu1 }
 0x2a9   : > { %v3721_v17 = vadd.f32 %v8164_v37, %v3211_v58  ;;  %v3214_v14 = vadd.f32 %v6735_v7, %v7790_v15  ;;  %v3205_v4 = vpop.f32.mrb[131].mxu0  ;;  %v2202_v32 = vadd.f32 %v8127_v24, %v6714_v0  ;;  %v2193_v21 = vpop.f32.mrb[113].mxu1 }
 0x2aa   : > { %v3719_v48 = vadd.f32 %v8164_v37, %v3203_v61  ;;  %v3206_v1 = vadd.f32 %v3205_v4, %v7781_v5  ;;  %6840 = vmatprep.mubr.msk.bf16.mxu0 %vm416_vm0, %v2438_v46  ;;  %v2194_v57 = vadd.f32 %v8127_v24, %v2193_v21  ;;  %v6715_v49 = vpop.f32.mrb[114].mxu1  ;;  %v8179_v36 = vpop.permute.xlu0 %2688 }
 0x2ab   : > { %v3722_v23 = vadd.f32 %v8164_v37, %v3214_v14  ;;  %6841 = vmatmul.mubr.msk.bf16.gmra.mrb[236].mxu0 %vm416_vm0, %v2439_v51  ;;  %9491 = vst [vmem:[#allocation9_spill] sm:$0xff] %v8179_v36  ;;  %v2205_v40 = vadd.f32 %v8127_v24, %v6715_v49  ;;  %v2196_v58 = vpop.f32.mrb[115].mxu1  ;;  %v3849_v2 = vmax.f32 %v3721_v17, 0.0  ;;  %v8184_v4 = vpop.permute.xlu1 %2690  ;;  %v2370_v7 = vmax.f32 %v2202_v32, 0.0 }
 0x2ac   : > { %v3720_v15 = vadd.f32 %v8164_v37, %v3206_v1  ;;  %v2197_v5 = vadd.f32 %v8127_v24, %v2196_v58  ;;  %9492 = vst [vmem:[#allocation10_spill] sm:$0xff] %v8184_v4  ;;  %v3847_v46 = vmax.f32 %v3719_v48, 0.0  ;;  %v2368_v51 = vmax.f32 %v2194_v57, 0.0 }
 0x2ad   : > { %v3850_v61 = vmax.f32 %v3722_v23, 0.0  ;;  %v2371_v14 = vmax.f32 %v2205_v40, 0.0 }
 0x2ae   : > { %v3848_v0 = vmax.f32 %v3720_v15, 0.0  ;;  %v6738_v21 = vpop.f32.mrb[132].mxu0  ;;  %v2369_v52 = vmax.f32 %v2197_v5, 0.0  ;;  %v8190_v15 = vpop.permute.xlu0 %2692 }
 0x2af   : > { %v3976_v8 = vpack.c.bf16 %v3850_v61, %v3849_v2  ;;  %v3227_v36 = vadd.f32 %v6738_v21, %v7811_v45  ;;  %v3218_v1 = vpop.f32.mrb[133].mxu0  ;;  %v2441_v49 = vpack.c.bf16 %v2371_v14, %v2370_v7 }
 0x2b0   : > { %v3975_v31 = vpack.c.bf16 %v3848_v0, %v3847_v46  ;;  %v3219_v17 = vadd.f32 %v3218_v1, %v7794_v18  ;;  %v6739_v23 = vpop.f32.mrb[134].mxu0  ;;  %v2440_v42 = vpack.c.bf16 %v2369_v52, %v2368_v51  ;;  %v6718_v4 = vpop.f32.mrb[116].mxu1 }
 0x2b1   : > { %v3725_v58 = vadd.f32 %v8164_v37, %v3227_v36  ;;  %v3230_v48 = vadd.f32 %v6739_v23, %v7815_v35  ;;  %v3221_v32 = vpop.f32.mrb[135].mxu0  ;;  %v2218_v40 = vadd.f32 %v8127_v24, %v6718_v4  ;;  %v2209_v45 = vpop.f32.mrb[117].mxu1 }
 0x2b2   : > { %v3723_v57 = vadd.f32 %v8164_v37, %v3219_v17  ;;  %v3222_v2 = vadd.f32 %v3221_v32, %v7797_v22  ;;  %6868 = vmatprep.mubr.msk.bf16.mxu1 %vm1518_vm1, %v3975_v31  ;;  %v2210_v52 = vadd.f32 %v8127_v24, %v2209_v45  ;;  %v6719_v36 = vpop.f32.mrb[118].mxu1  ;;  %6844 = vmatprep.mubr.msk.bf16.mxu0 %vm416_vm0, %v2440_v42  ;;  %v8200_v35 = vpop.permute.xlu1 %2694 }
 0x2b3   : > { %v3726_v18 = vadd.f32 %v8164_v37, %v3230_v48  ;;  %6869 = vmatmul.mubr.msk.bf16.vlgmr.msra.gmra.mrb[128].mxu1 %vm1518_vm1, %v3976_v8  ;;  %v2221_v5 = vadd.f32 %v8127_v24, %v6719_v36  ;;  %v2212_v4 = vpop.f32.mrb[119].mxu1  ;;  %6845 = vmatmul.mubr.msk.bf16.gmra.mrb[240].mxu0 %vm416_vm0, %v2441_v49  ;;  %v3853_v22 = vmax.f32 %v3725_v58, 0.0  ;;  %v2374_v0 = vmax.f32 %v2218_v40, 0.0  ;;  %v8207_v48 = vpop.permute.xlu0 %2696 }
 0x2b4   : > { %v3724_v61 = vadd.f32 %v8164_v37, %v3222_v2  ;;  %v2213_v46 = vadd.f32 %v8127_v24, %v2212_v4  ;;  %v3851_v7 = vmax.f32 %v3723_v57, 0.0  ;;  %v2372_v8 = vmax.f32 %v2210_v52, 0.0 }
 0x2b5   : > { %v3854_v31 = vmax.f32 %v3726_v18, 0.0  ;;  %v2375_v21 = vmax.f32 %v2221_v5, 0.0 }
 0x2b6   : > { %v3852_v14 = vmax.f32 %v3724_v61, 0.0  ;;  %v6742_v42 = vpop.f32.mrb[136].mxu0  ;;  %v2373_v1 = vmax.f32 %v2213_v46, 0.0  ;;  %v8212_v61 = vpop.permute.xlu1 %2698 }
 0x2b7   : > { %v3978_v51 = vpack.c.bf16 %v3854_v31, %v3853_v22  ;;  %v3243_v17 = vadd.f32 %v6742_v42, %v7832_v56  ;;  %v3234_v23 = vpop.f32.mrb[137].mxu0  ;;  %v2443_v45 = vpack.c.bf16 %v2375_v21, %v2374_v0 }
 0x2b8   : > { %v3977_v32 = vpack.c.bf16 %v3852_v14, %v3851_v7  ;;  %v3235_v49 = vadd.f32 %v3234_v23, %v7820_v43  ;;  %v6743_v58 = vpop.f32.mrb[138].mxu0  ;;  %v2442_v2 = vpack.c.bf16 %v2373_v1, %v2372_v8  ;;  %v6722_v40 = vpop.f32.mrb[120].mxu1 }
 0x2b9   : > { %v3729_v57 = vadd.f32 %v8164_v37, %v3243_v17  ;;  %v3246_v18 = vadd.f32 %v6743_v58, %v7836_v62  ;;  %v3237_v36 = vpop.f32.mrb[139].mxu0  ;;  %v2234_v56 = vadd.f32 %v8127_v24, %v6722_v40  ;;  %v2225_v5 = vpop.f32.mrb[121].mxu1 }
 0x2ba   : > { %v3727_v52 = vadd.f32 %v8164_v37, %v3235_v49  ;;  %v3238_v4 = vadd.f32 %v3237_v36, %v7827_v50  ;;  %6872 = vmatprep.mubr.msk.bf16.mxu1 %vm1518_vm1, %v3977_v32  ;;  %v2226_v22 = vadd.f32 %v8127_v24, %v2225_v5  ;;  %v6723_v31 = vpop.f32.mrb[122].mxu1  ;;  %6848 = vmatprep.mubr.msk.bf16.mxu0 %vm416_vm0, %v2442_v2  ;;  %v8226_v23 = vpop.permute.xlu0 %2700 }
 0x2bb   : > { %v3730_v43 = vadd.f32 %v8164_v37, %v3246_v18  ;;  %6873 = vmatmul.mubr.msk.bf16.gmra.mrb[132].mxu1 %vm1518_vm1, %v3978_v51  ;;  %v2237_v46 = vadd.f32 %v8127_v24, %v6723_v31  ;;  %v2228_v7 = vpop.f32.mrb[123].mxu1  ;;  %6849 = vmatmul.mubr.msk.bf16.gmra.mrb[244].mxu0 %vm416_vm0, %v2443_v45  ;;  %v3857_v0 = vmax.f32 %v3729_v57, 0.0  ;;  %v2378_v42 = vmax.f32 %v2234_v56, 0.0  ;;  %v8229_v40 = vpop.permute.xlu1 %2702 }
 0x2bc   : > { %v3728_v62 = vadd.f32 %v8164_v37, %v3238_v4  ;;  %v2229_v14 = vadd.f32 %v8127_v24, %v2228_v7  ;;  %v3855_v21 = vmax.f32 %v3727_v52, 0.0  ;;  %v2376_v51 = vmax.f32 %v2226_v22, 0.0 }
 0x2bd   : > { %v3858_v50 = vmax.f32 %v3730_v43, 0.0  ;;  %v2379_v1 = vmax.f32 %v2237_v46, 0.0 }
 0x2be   : > { %v3856_v8 = vmax.f32 %v3728_v62, 0.0  ;;  %v6746_v17 = vpop.f32.mrb[140].mxu0  ;;  %v2377_v49 = vmax.f32 %v2229_v14, 0.0  ;;  %v8245_v14 = vpop.permute.xlu0 %2704 }
 0x2bf   : > { %v3980_v32 = vpack.c.bf16 %v3858_v50, %v3857_v0  ;;  %v3259_v58 = vadd.f32 %v6746_v17, %v7860_v26  ;;  %v3250_v2 = vpop.f32.mrb[141].mxu0  ;;  %v2445_v57 = vpack.c.bf16 %v2379_v1, %v2378_v42 }
 0x2c0   : > { %v3979_v45 = vpack.c.bf16 %v3856_v8, %v3855_v21  ;;  %v3251_v18 = vadd.f32 %v3250_v2, %v7848_v9  ;;  %v6747_v36 = vpop.f32.mrb[142].mxu0  ;;  %v2444_v52 = vpack.c.bf16 %v2377_v49, %v2376_v51  ;;  %v6726_v5 = vpop.f32.mrb[124].mxu1 }
 0x2c1   : > { %v3733_v56 = vadd.f32 %v8164_v37, %v3259_v58  ;;  %v3262_v4 = vadd.f32 %v6747_v36, %v7864_v30  ;;  %v3253_v43 = vpop.f32.mrb[143].mxu0  ;;  %v2250_v31 = vadd.f32 %v8127_v24, %v6726_v5  ;;  %v2241_v26 = vpop.f32.mrb[125].mxu1 }
 0x2c2   : > { %v3731_v22 = vadd.f32 %v8164_v37, %v3251_v18  ;;  %v3254_v62 = vadd.f32 %v3253_v43, %v7851_v13  ;;  %6876 = vmatprep.mubr.msk.bf16.mxu1 %vm1518_vm1, %v3979_v45  ;;  %v2242_v9 = vadd.f32 %v8127_v24, %v2241_v26  ;;  %v6727_v7 = vpop.f32.mrb[126].mxu1  ;;  %6852 = vmatprep.mubr.msk.bf16.mxu0 %vm416_vm0, %v2444_v52  ;;  %v8248_v8 = vpop.permute.xlu1 %2706 }
 0x2c3   : > { %v3734_v46 = vadd.f32 %v8164_v37, %v3262_v4  ;;  %6877 = vmatmul.mubr.msk.bf16.gmra.mrb[136].mxu1 %vm1518_vm1, %v3980_v32  ;;  %v2253_v0 = vadd.f32 %v8127_v24, %v6727_v7  ;;  %v2244_v50 = vpop.f32.mrb[127].mxu1  ;;  %6853 = vmatmul.mubr.msk.bf16.gmra.mrb[248].mxu0 %vm416_vm0, %v2445_v57  ;;  %v3861_v13 = vmax.f32 %v3733_v56, 0.0  ;;  %v2382_v17 = vmax.f32 %v2250_v31, 0.0 }
 0x2c4   : > { %v3732_v30 = vadd.f32 %v8164_v37, %v3254_v62  ;;  %v2245_v42 = vadd.f32 %v8127_v24, %v2244_v50  ;;  %v3859_v1 = vmax.f32 %v3731_v22, 0.0  ;;  %v2380_v2 = vmax.f32 %v2242_v9, 0.0  ;;  %v8257_v62 = vpop.permute.xlu0 %2708 }
 0x2c5   : > { %v3862_v21 = vmax.f32 %v3734_v46, 0.0  ;;  %v2383_v49 = vmax.f32 %v2253_v0, 0.0 }
 0x2c6   : > { %v3860_v51 = vmax.f32 %v3732_v30, 0.0  ;;  %v6750_v32 = vpop.f32.mrb[144].mxu0  ;;  %v2381_v45 = vmax.f32 %v2245_v42, 0.0 }
 0x2c7   : > { %v3982_v58 = vpack.c.bf16 %v3862_v21, %v3861_v13  ;;  %v3275_v18 = vadd.f32 %v6750_v32, %v7887_v60  ;;  %v3266_v36 = vpop.f32.mrb[145].mxu0  ;;  %v2447_v52 = vpack.c.bf16 %v2383_v49, %v2382_v17 }
 0x2c8   : > { %v3981_v57 = vpack.c.bf16 %v3860_v51, %v3859_v1  ;;  %v3267_v56 = vadd.f32 %v3266_v36, %v7869_v39  ;;  %v6751_v5 = vpop.f32.mrb[146].mxu0  ;;  %v2446_v4 = vpack.c.bf16 %v2381_v45, %v2380_v2  ;;  %v8262_v39 = vpop.permute.xlu1 %2710 }
 0x2c9   : > { %v3737_v24 = vadd.f32 %v8164_v37, %v3275_v18  ;;  %v3278_v43 = vadd.f32 %v6751_v5, %v7892_v6  ;;  %v3269_v22 = vpop.f32.mrb[147].mxu0  ;;  %v8268_v17 = vpop.permute.xlu0 %2712 }
 0x2ca   : > { %v3735_v31 = vadd.f32 %v8164_v37, %v3267_v56  ;;  %v3270_v26 = vadd.f32 %v3269_v22, %v7876_v47  ;;  %6880 = vmatprep.mubr.msk.bf16.mxu1 %vm1518_vm1, %v3981_v57  ;;  %6856 = vmatprep.mubr.msk.bf16.mxu0 %vm416_vm0, %v2446_v4 }
 0x2cb   : > { %v3738_v60 = vadd.f32 %v8164_v37, %v3278_v43  ;;  %6881 = vmatmul.mubr.msk.bf16.gmra.mrb[140].mxu1 %vm1518_vm1, %v3982_v58  ;;  %6857 = vmatmul.mubr.msk.bf16.gmra.mrb[252].mxu0 %vm416_vm0, %v2447_v52  ;;  %v3865_v6 = vmax.f32 %v3737_v24, 0.0 }
 0x2cc   : > { %v3736_v46 = vadd.f32 %v8164_v37, %v3270_v26  ;;  %v3863_v7 = vmax.f32 %v3735_v31, 0.0  ;;  %v8272_v58 = vpop.permute.xlu1 %2714 }
 0x2cd   : > { %v3866_v9 = vmax.f32 %v3738_v60, 0.0  ;;  %v8280_v56 = vpop.permute.xlu0 %2716 }
 0x2ce   : > { %v3864_v47 = vmax.f32 %v3736_v46, 0.0  ;;  %v6754_v30 = vpop.f32.mrb[148].mxu0 }
 0x2cf   : > { %v3984_v0 = vpack.c.bf16 %v3866_v9, %v3865_v6  ;;  %v3291_v50 = vadd.f32 %v6754_v30, %v7919_v63  ;;  %v3282_v13 = vpop.f32.mrb[149].mxu0 }
 0x2d0   : > { %v3983_v21 = vpack.c.bf16 %v3864_v47, %v3863_v7  ;;  %v3283_v42 = vadd.f32 %v3282_v13, %v7903_v28  ;;  %v6755_v1 = vpop.f32.mrb[150].mxu0 }
 0x2d1   : > { %v3741_v51 = vadd.f32 %v8164_v37, %v3291_v50  ;;  %v3294_v49 = vadd.f32 %v6755_v1, %v7925_v16  ;;  %v3285_v32 = vpop.f32.mrb[151].mxu0  ;;  %v8294_v47 = vpop.permute.xlu0 %2720 }
 0x2d2   : > { %v3739_v2 = vadd.f32 %v8164_v37, %v3283_v42  ;;  %v3286_v45 = vadd.f32 %v3285_v32, %v7907_v38  ;;  %6884 = vmatprep.mubr.msk.bf16.mxu1 %vm1518_vm1, %v3983_v21  ;;  %v8283_v38 = vpop.permute.xlu1 %2718 }
 0x2d3   : > { %v3742_v63 = vadd.f32 %v8164_v37, %v3294_v49  ;;  %6885 = vmatmul.mubr.msk.bf16.gmra.mrb[144].mxu1 %vm1518_vm1, %v3984_v0  ;;  %v3869_v18 = vmax.f32 %v3741_v51, 0.0 }
 0x2d4   : > { %v3740_v28 = vadd.f32 %v8164_v37, %v3286_v45  ;;  %v3867_v57 = vmax.f32 %v3739_v2, 0.0 }
 0x2d5   : > { %v3870_v36 = vmax.f32 %v3742_v63, 0.0 }
 0x2d6   : > { %v3868_v52 = vmax.f32 %v3740_v28, 0.0  ;;  %v6758_v16 = vpop.f32.mrb[152].mxu0  ;;  %v8296_v0 = vpop.permute.xlu1 %2722 }
 0x2d7   : > { %v3986_v5 = vpack.c.bf16 %v3870_v36, %v3869_v18  ;;  %v3307_v4 = vadd.f32 %v6758_v16, %v7949_v10  ;;  %v3298_v24 = vpop.f32.mrb[153].mxu0  ;;  %v8305_v18 = vpop.permute.xlu0 %2724 }
 0x2d8   : > { %v3985_v43 = vpack.c.bf16 %v3868_v52, %v3867_v57  ;;  %v3299_v22 = vadd.f32 %v3298_v24, %v7934_v34  ;;  %v6759_v31 = vpop.f32.mrb[154].mxu0 }
 0x2d9   : > { %v3745_v26 = vadd.f32 %v8164_v37, %v3307_v4  ;;  %v3310_v60 = vadd.f32 %v6759_v31, %v7958_v29  ;;  %v3301_v46 = vpop.f32.mrb[155].mxu0 }
 0x2da   : > { %v3743_v6 = vadd.f32 %v8164_v37, %v3299_v22  ;;  %v3302_v9 = vadd.f32 %v3301_v46, %v7943_v55  ;;  %6888 = vmatprep.mubr.msk.bf16.mxu1 %vm1518_vm1, %v3985_v43  ;;  %v8309_v36 = vpop.permute.xlu1 %2726 }
 0x2db   : > { %v3746_v10 = vadd.f32 %v8164_v37, %v3310_v60  ;;  %6889 = vmatmul.mubr.msk.bf16.gmra.mrb[148].mxu1 %vm1518_vm1, %v3986_v5  ;;  %v3873_v34 = vmax.f32 %v3745_v26, 0.0  ;;  %v8314_v26 = vpop.permute.xlu0 %2728 }
 0x2dc   : > { %v3744_v7 = vadd.f32 %v8164_v37, %v3302_v9  ;;  %v3871_v29 = vmax.f32 %v3743_v6, 0.0 }
 0x2dd   : > { %v3874_v30 = vmax.f32 %v3746_v10, 0.0 }
 0x2de   : > { %v3872_v50 = vmax.f32 %v3744_v7, 0.0  ;;  %v6762_v13 = vpop.f32.mrb[156].mxu0  ;;  %v8318_v9 = vpop.permute.xlu1 %2730 }
 0x2df   : > { %v3988_v21 = vpack.c.bf16 %v3874_v30, %v3873_v34  ;;  %v3323_v55 = vadd.f32 %v6762_v13, %v8086_v33  ;;  %v3314_v42 = vpop.f32.mrb[157].mxu0  ;;  %v8326_v13 = vpop.permute.xlu0 %2732 }
 0x2e0   : > { %v3987_v1 = vpack.c.bf16 %v3872_v50, %v3871_v29  ;;  %v3315_v51 = vadd.f32 %v3314_v42, %v7967_v54  ;;  %v6763_v49 = vpop.f32.mrb[158].mxu0 }
 0x2e1   : > { %v3749_v32 = vadd.f32 %v8164_v37, %v3323_v55  ;;  %v3326_v2 = vadd.f32 %v6763_v49, %v8088_v41  ;;  %v3317_v45 = vpop.f32.mrb[159].mxu0 }
 0x2e2   : > { %v3747_v63 = vadd.f32 %v8164_v37, %v3315_v51  ;;  %v3318_v28 = vadd.f32 %v3317_v45, %v7973_v27  ;;  %6892 = vmatprep.mubr.msk.bf16.mxu1 %vm1518_vm1, %v3987_v1 }
 0x2e3   : > { %v3750_v33 = vadd.f32 %v8164_v37, %v3326_v2  ;;  %6893 = vmatmul.mubr.msk.bf16.gmra.mrb[152].mxu1 %vm1518_vm1, %v3988_v21  ;;  %v3877_v57 = vmax.f32 %v3749_v32, 0.0 }
 0x2e4   : > { %v3748_v54 = vadd.f32 %v8164_v37, %v3318_v28  ;;  %v3875_v41 = vmax.f32 %v3747_v63, 0.0 }
 0x2e5   : > { %v3878_v52 = vmax.f32 %v3750_v33, 0.0 }
 0x2e6   : > { %v3876_v16 = vmax.f32 %v3748_v54, 0.0  ;;  %v6766_v5 = vpop.f32.mrb[160].mxu0  ;;  %v8340_v54 = vpop.permute.xlu0 %2736 }
 0x2e7   : > { %v3990_v4 = vpack.c.bf16 %v3878_v52, %v3877_v57  ;;  %v3339_v27 = vadd.f32 %v6766_v5, %v8101_v19  ;;  %v3330_v24 = vpop.f32.mrb[161].mxu0 }
 0x2e8   : > { %v3989_v43 = vpack.c.bf16 %v3876_v16, %v3875_v41  ;;  %v3331_v22 = vadd.f32 %v3330_v24, %v8095_v59  ;;  %v6767_v31 = vpop.f32.mrb[162].mxu0  ;;  %v9493_v24 = vld [vmem:[#allocation2_spill] sm:$0xff] }
 0x2e9   : > { %v3753_v60 = vadd.f32 %v8164_v37, %v3339_v27  ;;  %v3342_v46 = vadd.f32 %v6767_v31, %v8107_v25  ;;  %v3333_v6 = vpop.f32.mrb[163].mxu0 }
 0x2ea   : > { %v3751_v10 = vadd.f32 %v8164_v37, %v3331_v22  ;;  %v3334_v7 = vadd.f32 %v3333_v6, %v8098_v3  ;;  %6896 = vmatprep.mubr.msk.bf16.mxu1 %vm1518_vm1, %v3989_v43  ;;  %v8329_v3 = vpop.permute.xlu1 %2734 }
 0x2eb   : > { %v3754_v19 = vadd.f32 %v8164_v37, %v3342_v46  ;;  %6897 = vmatmul.mubr.msk.bf16.gmra.mrb[156].mxu1 %vm1518_vm1, %v3990_v4  ;;  %v3881_v34 = vmax.f32 %v3753_v60, 0.0  ;;  %v9494_v60 = vld [vmem:[#allocation4_spill] sm:$0xff] }
 0x2ec   : > { %v3752_v59 = vadd.f32 %v8164_v37, %v3334_v7  ;;  %v3879_v29 = vmax.f32 %v3751_v10, 0.0  ;;  %v9495_v7 = vld [vmem:[#allocation3_spill] sm:$0xff] }
 0x2ed   : > { %v3882_v30 = vmax.f32 %v3754_v19, 0.0 }
 0x2ee   : > { %v3880_v50 = vmax.f32 %v3752_v59, 0.0  ;;  %v6770_v25 = vpop.f32.mrb[164].mxu0  ;;  %v8342_v52 = vpop.permute.xlu1 %2738 }
 0x2ef   : > { %v3992_v21 = vpack.c.bf16 %v3882_v30, %v3881_v34  ;;  %v3355_v55 = vadd.f32 %v6770_v25, %v8120_v11  ;;  %v3346_v42 = vpop.f32.mrb[165].mxu0  ;;  %v8351_v59 = vpop.permute.xlu0 %2740 }
 0x2f0   : > { %v3991_v1 = vpack.c.bf16 %v3880_v50, %v3879_v29  ;;  %v3347_v51 = vadd.f32 %v3346_v42, %v8110_v44  ;;  %v6771_v49 = vpop.f32.mrb[166].mxu0 }
 0x2f1   : > { %v3757_v32 = vadd.f32 %v8164_v37, %v3355_v55  ;;  %v3358_v2 = vadd.f32 %v6771_v49, %v8122_v20  ;;  %v3349_v45 = vpop.f32.mrb[167].mxu0 }
 0x2f2   : > { %v3755_v63 = vadd.f32 %v8164_v37, %v3347_v51  ;;  %v3350_v28 = vadd.f32 %v3349_v45, %v8113_v53  ;;  %6900 = vmatprep.mubr.msk.bf16.mxu1 %vm1518_vm1, %v3991_v1  ;;  %v8355_v34 = vpop.permute.xlu1 %2742  ;;  %v9496_v1 = vld [vmem:[#allocation7_spill] sm:$0xff] }
 0x2f3   : > { %v3758_v11 = vadd.f32 %v8164_v37, %v3358_v2  ;;  %6901 = vmatmul.mubr.msk.bf16.gmra.mrb[160].mxu1 %vm1518_vm1, %v3992_v21  ;;  %v3885_v44 = vmax.f32 %v3757_v32, 0.0  ;;  %v9497_v2 = vld [vmem:[#allocation5_spill] sm:$0xff] }
 0x2f4   : > { %v3756_v33 = vadd.f32 %v8164_v37, %v3350_v28  ;;  %v3883_v20 = vmax.f32 %v3755_v63, 0.0  ;;  %v8360_v28 = vpop.permute.xlu0 %2744 }
 0x2f5   : > { %v3886_v57 = vmax.f32 %v3758_v11, 0.0 }
 0x2f6   : > { %v3884_v41 = vmax.f32 %v3756_v33, 0.0  ;;  %v6774_v16 = vpop.f32.mrb[168].mxu0  ;;  %v9498_v33 = vld [vmem:[#allocation8_spill] sm:$0xff] }
 0x2f7   : > { %v3994_v5 = vpack.c.bf16 %v3886_v57, %v3885_v44  ;;  %v3371_v53 = vadd.f32 %v6774_v16, %v8140_v12  ;;  %v3362_v4 = vpop.f32.mrb[169].mxu0  ;;  %v9499_v16 = vld [vmem:[#allocation6_spill] sm:$0xff] }
 0x2f8   : > { %v3993_v27 = vpack.c.bf16 %v3884_v41, %v3883_v20  ;;  %v3363_v43 = vadd.f32 %v3362_v4, %v9493_v24  ;;  %v6775_v22 = vpop.f32.mrb[170].mxu0  ;;  %v8364_v20 = vpop.permute.xlu1 %2746 }
 0x2f9   : > { %v3761_v31 = vadd.f32 %v8164_v37, %v3371_v53  ;;  %v3374_v46 = vadd.f32 %v6775_v22, %v9494_v60  ;;  %v3365_v6 = vpop.f32.mrb[171].mxu0  ;;  %v8372_v60 = vpop.permute.xlu0 %2748 }
 0x2fa   : > { %v3759_v10 = vadd.f32 %v8164_v37, %v3363_v43  ;;  %v3366_v19 = vadd.f32 %v3365_v6, %v9495_v7  ;;  %6904 = vmatprep.mubr.msk.bf16.mxu1 %vm1518_vm1, %v3993_v27 }
 0x2fb   : > { %v3762_v12 = vadd.f32 %v8164_v37, %v3374_v46  ;;  %6905 = vmatmul.mubr.msk.bf16.gmra.mrb[164].mxu1 %vm1518_vm1, %v3994_v5  ;;  %v3889_v29 = vmax.f32 %v3761_v31, 0.0 }
 0x2fc   : > { %v3760_v30 = vadd.f32 %v8164_v37, %v3366_v19  ;;  %v3887_v25 = vmax.f32 %v3759_v10, 0.0  ;;  %v8375_v7 = vpop.permute.xlu1 %2750 }
 0x2fd   : > { %v3890_v50 = vmax.f32 %v3762_v12, 0.0  ;;  %v9500_v12 = vld [vmem:[#allocation9_spill] sm:$0xff] }
 0x2fe   : > { %v3888_v21 = vmax.f32 %v3760_v30, 0.0  ;;  %v6778_v55 = vpop.f32.mrb[172].mxu0 }
 0x2ff   : > { %v3996_v42 = vpack.c.bf16 %v3890_v50, %v3889_v29  ;;  %v3387_v51 = vadd.f32 %v6778_v55, %v9496_v1  ;;  %v3378_v49 = vpop.f32.mrb[173].mxu0 }
 0x300   : > { %v3995_v32 = vpack.c.bf16 %v3888_v21, %v3887_v25  ;;  %v3379_v45 = vadd.f32 %v3378_v49, %v9497_v2  ;;  %v6779_v63 = vpop.f32.mrb[174].mxu0  ;;  %v8386_v49 = vpop.permute.xlu0 %2752 }
 0x301   : > { %v3765_v11 = vadd.f32 %v8164_v37, %v3387_v51  ;;  %v3390_v44 = vadd.f32 %v6779_v63, %v9498_v33  ;;  %v3381_v57 = vpop.f32.mrb[175].mxu0 }
 0x302   : > { %v3763_v41 = vadd.f32 %v8164_v37, %v3379_v45  ;;  %v3382_v5 = vadd.f32 %v3381_v57, %v9499_v16  ;;  %6908 = vmatprep.mubr.msk.bf16.mxu1 %vm1518_vm1, %v3995_v32  ;;  %v8388_v45 = vpop.permute.xlu1 %2754 }
 0x303   : > { %v3766_v53 = vadd.f32 %v8164_v37, %v3390_v44  ;;  %6909 = vmatmul.mubr.msk.bf16.gmra.mrb[168].mxu1 %vm1518_vm1, %v3996_v42  ;;  %v3893_v27 = vmax.f32 %v3765_v11, 0.0  ;;  %v9501_v42 = vld [vmem:[#allocation10_spill] sm:$0xff] }
 0x304   : > { %v3764_v4 = vadd.f32 %v8164_v37, %v3382_v5  ;;  %v3891_v43 = vmax.f32 %v3763_v41, 0.0 }
 0x305   : > { %v3894_v24 = vmax.f32 %v3766_v53, 0.0 }
 0x306   : > { %v3892_v22 = vmax.f32 %v3764_v4, 0.0  ;;  %v6782_v31 = vpop.f32.mrb[176].mxu0 }
 0x307   : > { %v3998_v46 = vpack.c.bf16 %v3894_v24, %v3893_v27  ;;  %v3403_v6 = vadd.f32 %v6782_v31, %v8190_v15  ;;  %v3394_v10 = vpop.f32.mrb[177].mxu0  ;;  %v8401_v31 = vpop.permute.xlu1 %2758 }
 0x308   : > { %v3997_v19 = vpack.c.bf16 %v3892_v22, %v3891_v43  ;;  %v3395_v30 = vadd.f32 %v3394_v10, %v9500_v12  ;;  %v6783_v29 = vpop.f32.mrb[178].mxu0  ;;  %v8397_v22 = vpop.permute.xlu0 %2756 }
 0x309   : > { %v3769_v50 = vadd.f32 %v8164_v37, %v3403_v6  ;;  %v3406_v25 = vadd.f32 %v6783_v29, %v8200_v35  ;;  %v3397_v21 = vpop.f32.mrb[179].mxu0 }
 0x30a   : > { %v3767_v55 = vadd.f32 %v8164_v37, %v3395_v30  ;;  %v3398_v1 = vadd.f32 %v3397_v21, %v9501_v42  ;;  %6912 = vmatprep.mubr.msk.bf16.mxu1 %vm1518_vm1, %v3997_v19 }
 0x30b   : > { %v3770_v15 = vadd.f32 %v8164_v37, %v3406_v25  ;;  %6913 = vmatmul.mubr.msk.bf16.gmra.mrb[172].mxu1 %vm1518_vm1, %v3998_v46  ;;  %v3897_v32 = vmax.f32 %v3769_v50, 0.0 }
 0x30c   : > { %v3768_v51 = vadd.f32 %v8164_v37, %v3398_v1  ;;  %v3895_v35 = vmax.f32 %v3767_v55, 0.0  ;;  %v8406_v21 = vpop.permute.xlu0 %2760 }
 0x30d   : > { %v3898_v2 = vmax.f32 %v3770_v15, 0.0  ;;  %v8410_v15 = vpop.permute.xlu1 %2762 }
 0x30e   : > { %v3896_v63 = vmax.f32 %v3768_v51, 0.0  ;;  %v6786_v11 = vpop.f32.mrb[180].mxu0 }
 0x30f   : > { %v4000_v33 = vpack.c.bf16 %v3898_v2, %v3897_v32  ;;  %v3419_v44 = vadd.f32 %v6786_v11, %v8226_v23  ;;  %v3410_v57 = vpop.f32.mrb[181].mxu0 }
 0x310   : > { %v3999_v41 = vpack.c.bf16 %v3896_v63, %v3895_v35  ;;  %v3411_v16 = vadd.f32 %v3410_v57, %v8207_v48  ;;  %v6787_v5 = vpop.f32.mrb[182].mxu0 }
 0x311   : > { %v3773_v53 = vadd.f32 %v8164_v37, %v3419_v44  ;;  %v3422_v4 = vadd.f32 %v6787_v5, %v8229_v40  ;;  %v3413_v27 = vpop.f32.mrb[183].mxu0 }
 0x312   : > { %v3771_v24 = vadd.f32 %v8164_v37, %v3411_v16  ;;  %v3414_v43 = vadd.f32 %v3413_v27, %v8212_v61  ;;  %6916 = vmatprep.mubr.msk.bf16.mxu1 %vm1518_vm1, %v3999_v41 }
 0x313   : > { %v3774_v23 = vadd.f32 %v8164_v37, %v3422_v4  ;;  %6917 = vmatmul.mubr.msk.bf16.gmra.mrb[176].mxu1 %vm1518_vm1, %v4000_v33  ;;  %v3901_v46 = vmax.f32 %v3773_v53, 0.0  ;;  %v8418_v33 = vpop.permute.xlu0 %2764 }
 0x314   : > { %v3772_v48 = vadd.f32 %v8164_v37, %v3414_v43  ;;  %v3899_v40 = vmax.f32 %v3771_v24, 0.0 }
 0x315   : > { %v3902_v6 = vmax.f32 %v3774_v23, 0.0 }
 0x316   : > { %v3900_v10 = vmax.f32 %v3772_v48, 0.0  ;;  %v6790_v19 = vpop.f32.mrb[184].mxu0 }
 0x317   : > { %v4002_v12 = vpack.c.bf16 %v3902_v6, %v3901_v46  ;;  %v3435_v61 = vadd.f32 %v6790_v19, %v8257_v62  ;;  %v3426_v30 = vpop.f32.mrb[185].mxu0  ;;  %v8432_v46 = vpop.permute.xlu0 %2768 }
 0x318   : > { %v4001_v29 = vpack.c.bf16 %v3900_v10, %v3899_v40  ;;  %v3427_v50 = vadd.f32 %v3426_v30, %v8245_v14  ;;  %v6791_v25 = vpop.f32.mrb[186].mxu0 }
 0x319   : > { %v3777_v55 = vadd.f32 %v8164_v37, %v3435_v61  ;;  %v3438_v42 = vadd.f32 %v6791_v25, %v8262_v39  ;;  %v3429_v1 = vpop.f32.mrb[187].mxu0 }
 0x31a   : > { %v3775_v51 = vadd.f32 %v8164_v37, %v3427_v50  ;;  %v3430_v32 = vadd.f32 %v3429_v1, %v8248_v8  ;;  %6920 = vmatprep.mubr.msk.bf16.mxu1 %vm1518_vm1, %v4001_v29  ;;  %v8421_v8 = vpop.permute.xlu1 %2766 }
 0x31b   : > { %v3778_v62 = vadd.f32 %v8164_v37, %v3438_v42  ;;  %6921 = vmatmul.mubr.msk.bf16.gmra.mrb[180].mxu1 %vm1518_vm1, %v4002_v12  ;;  %v3905_v2 = vmax.f32 %v3777_v55, 0.0 }
 0x31c   : > { %v3776_v14 = vadd.f32 %v8164_v37, %v3430_v32  ;;  %v3903_v63 = vmax.f32 %v3775_v51, 0.0  ;;  %v8443_v32 = vpop.permute.xlu0 %2772 }
 0x31d   : > { %v3906_v35 = vmax.f32 %v3778_v62, 0.0 }
 0x31e   : > { %v3904_v11 = vmax.f32 %v3776_v14, 0.0  ;;  %v6794_v39 = vpop.f32.mrb[188].mxu0  ;;  %v8434_v40 = vpop.permute.xlu1 %2770 }
 0x31f   : > { %v4004_v44 = vpack.c.bf16 %v3906_v35, %v3905_v2  ;;  %v3451_v57 = vadd.f32 %v6794_v39, %v8280_v56  ;;  %v3442_v41 = vpop.f32.mrb[189].mxu0 }
 0x320   : > { %v4003_v16 = vpack.c.bf16 %v3904_v11, %v3903_v63  ;;  %v3443_v5 = vadd.f32 %v3442_v41, %v8268_v17  ;;  %v6795_v53 = vpop.f32.mrb[190].mxu0 }
 0x321   : > { %v3781_v4 = vadd.f32 %v8164_v37, %v3451_v57  ;;  %v3454_v27 = vadd.f32 %v6795_v53, %v8283_v38  ;;  %v3445_v24 = vpop.f32.mrb[191].mxu0 }
 0x322   : > { %v3779_v43 = vadd.f32 %v8164_v37, %v3443_v5  ;;  %v3446_v23 = vadd.f32 %v3445_v24, %v8272_v58  ;;  %6924 = vmatprep.mubr.msk.bf16.mxu1 %vm1518_vm1, %v4003_v16  ;;  %v8447_v62 = vpop.permute.xlu1 %2774  ;;  %v8452_v16 = vpop.permute.xlu0 %2776 }
 0x323   : > { %v3782_v56 = vadd.f32 %v8164_v37, %v3454_v27  ;;  %6925 = vmatmul.mubr.msk.bf16.gmra.mrb[184].mxu1 %vm1518_vm1, %v4004_v44  ;;  %v3909_v17 = vmax.f32 %v3781_v4, 0.0 }
 0x324   : > { %v3780_v48 = vadd.f32 %v8164_v37, %v3446_v23  ;;  %v3907_v38 = vmax.f32 %v3779_v43, 0.0 }
 0x325   : > { %v3910_v6 = vmax.f32 %v3782_v56, 0.0 }
 0x326   : > { %v3908_v10 = vmax.f32 %v3780_v48, 0.0  ;;  %v6798_v19 = vpop.f32.mrb[192].mxu0  ;;  %v8456_v27 = vpop.permute.xlu1 %2778 }
 0x327   : > { %v4006_v12 = vpack.c.bf16 %v3910_v6, %v3909_v17  ;;  %v3467_v58 = vadd.f32 %v6798_v19, %v8305_v18  ;;  %v3458_v61 = vpop.f32.mrb[193].mxu0  ;;  %v8464_v6 = vpop.permute.xlu0 %2780 }
 0x328   : > { %v4005_v30 = vpack.c.bf16 %v3908_v10, %v3907_v38  ;;  %v3459_v29 = vadd.f32 %v3458_v61, %v8294_v47  ;;  %v6799_v50 = vpop.f32.mrb[194].mxu0 }
 0x329   : > { %v3785_v25 = vadd.f32 %v8164_v37, %v3467_v58  ;;  %v3470_v55 = vadd.f32 %v6799_v50, %v8309_v36  ;;  %v3461_v42 = vpop.f32.mrb[195].mxu0 }
 0x32a   : > { %v3783_v1 = vadd.f32 %v8164_v37, %v3459_v29  ;;  %v3462_v51 = vadd.f32 %v3461_v42, %v8296_v0  ;;  %6928 = vmatprep.mubr.msk.bf16.mxu1 %vm1518_vm1, %v4005_v30 }
 0x32b   : > { %v3786_v18 = vadd.f32 %v8164_v37, %v3470_v55  ;;  %6929 = vmatmul.mubr.msk.bf16.gmra.mrb[188].mxu1 %vm1518_vm1, %v4006_v12  ;;  %v3913_v14 = vmax.f32 %v3785_v25, 0.0 }
 0x32c   : > { %v3784_v47 = vadd.f32 %v8164_v37, %v3462_v51  ;;  %v3911_v36 = vmax.f32 %v3783_v1, 0.0  ;;  %v8478_v1 = vpop.permute.xlu0 %2784 }
 0x32d   : > { %v3914_v2 = vmax.f32 %v3786_v18, 0.0 }
 0x32e   : > { %v3912_v35 = vmax.f32 %v3784_v47, 0.0  ;;  %v6802_v63 = vpop.f32.mrb[196].mxu0 }
 0x32f   : > { %v4008_v11 = vpack.c.bf16 %v3914_v2, %v3913_v14  ;;  %v3483_v0 = vadd.f32 %v6802_v63, %v8326_v13  ;;  %v3474_v39 = vpop.f32.mrb[197].mxu0 }
 0x330   : > { %v4007_v44 = vpack.c.bf16 %v3912_v35, %v3911_v36  ;;  %v3475_v57 = vadd.f32 %v3474_v39, %v8314_v26  ;;  %v6803_v41 = vpop.f32.mrb[198].mxu0 }
 0x331   : > { %v3789_v5 = vadd.f32 %v8164_v37, %v3483_v0  ;;  %v3486_v53 = vadd.f32 %v6803_v41, %v8329_v3  ;;  %v3477_v4 = vpop.f32.mrb[199].mxu0 }
 0x332   : > { %v3787_v24 = vadd.f32 %v8164_v37, %v3475_v57  ;;  %v3478_v43 = vadd.f32 %v3477_v4, %v8318_v9  ;;  %6932 = vmatprep.mubr.msk.bf16.mxu1 %vm1518_vm1, %v4007_v44  ;;  %v8467_v9 = vpop.permute.xlu1 %2782 }
 0x333   : > { %v3790_v13 = vadd.f32 %v8164_v37, %v3486_v53  ;;  %6933 = vmatmul.mubr.msk.bf16.gmra.mrb[192].mxu1 %vm1518_vm1, %v4008_v11  ;;  %v3917_v23 = vmax.f32 %v3789_v5, 0.0  ;;  %v8489_v5 = vpop.permute.xlu0 %2788 }
 0x334   : > { %v3788_v26 = vadd.f32 %v8164_v37, %v3478_v43  ;;  %v3915_v48 = vmax.f32 %v3787_v24, 0.0 }
 0x335   : > { %v3918_v56 = vmax.f32 %v3790_v13, 0.0 }
 0x336   : > { %v3916_v17 = vmax.f32 %v3788_v26, 0.0  ;;  %v6806_v3 = vpop.f32.mrb[200].mxu0  ;;  %v8480_v18 = vpop.permute.xlu1 %2786 }
 0x337   : > { %v4010_v38 = vpack.c.bf16 %v3918_v56, %v3917_v23  ;;  %v3499_v10 = vadd.f32 %v6806_v3, %v8351_v59  ;;  %v3490_v19 = vpop.f32.mrb[201].mxu0  ;;  %v8503_v3 = vpop.permute.xlu0 %2792 }
 0x338   : > { %v4009_v12 = vpack.c.bf16 %v3916_v17, %v3915_v48  ;;  %v3491_v58 = vadd.f32 %v3490_v19, %v8340_v54  ;;  %v6807_v61 = vpop.f32.mrb[202].mxu0 }
 0x339   : > { %v3793_v30 = vadd.f32 %v8164_v37, %v3499_v10  ;;  %v3502_v29 = vadd.f32 %v6807_v61, %v8355_v34  ;;  %v3493_v50 = vpop.f32.mrb[203].mxu0 }
 0x33a   : > { %v3791_v25 = vadd.f32 %v8164_v37, %v3491_v58  ;;  %v3494_v55 = vadd.f32 %v3493_v50, %v8342_v52  ;;  %6936 = vmatprep.mubr.msk.bf16.mxu1 %vm1518_vm1, %v4009_v12  ;;  %v8493_v53 = vpop.permute.xlu1 %2790 }
 0x33b   : > { %v3794_v59 = vadd.f32 %v8164_v37, %v3502_v29  ;;  %6937 = vmatmul.mubr.msk.bf16.gmra.mrb[196].mxu1 %vm1518_vm1, %v4010_v38  ;;  %v3921_v54 = vmax.f32 %v3793_v30, 0.0 }
 0x33c   : > { %v3792_v42 = vadd.f32 %v8164_v37, %v3494_v55  ;;  %v3919_v34 = vmax.f32 %v3791_v25, 0.0  ;;  %v8515_v55 = vpop.permute.xlu0 %2796 }
 0x33d   : > { %v3922_v51 = vmax.f32 %v3794_v59, 0.0 }
 0x33e   : > { %v3920_v47 = vmax.f32 %v3792_v42, 0.0  ;;  %v6810_v14 = vpop.f32.mrb[204].mxu0  ;;  %v8507_v12 = vpop.permute.xlu1 %2794 }
 0x33f   : > { %v4012_v2 = vpack.c.bf16 %v3922_v51, %v3921_v54  ;;  %v3515_v52 = vadd.f32 %v6810_v14, %v8372_v60  ;;  %v3506_v36 = vpop.f32.mrb[205].mxu0 }
 0x340   : > { %v4011_v35 = vpack.c.bf16 %v3920_v47, %v3919_v34  ;;  %v3507_v63 = vadd.f32 %v3506_v36, %v8360_v28  ;;  %v6811_v11 = vpop.f32.mrb[206].mxu0  ;;  %v8498_v28 = vld [vmem:[%s9482_s3 + $0x2] ss:$0 sm:$0xff] }
 0x341   : > { %v3797_v0 = vadd.f32 %v8164_v37, %v3515_v52  ;;  %v3518_v39 = vadd.f32 %v6811_v11, %v8375_v7  ;;  %v3509_v44 = vpop.f32.mrb[207].mxu0  ;;  %v8529_v11 = vpop.permute.xlu0 %2800 }
 0x342   : > { %v3795_v57 = vadd.f32 %v8164_v37, %v3507_v63  ;;  %v3510_v41 = vadd.f32 %v3509_v44, %v8364_v20  ;;  %6940 = vmatprep.mubr.msk.bf16.mxu1 %vm1518_vm1, %v4011_v35 }
 0x343   : > { %v3798_v60 = vadd.f32 %v8164_v37, %v3518_v39  ;;  %6941 = vmatmul.mubr.msk.bf16.gmra.mrb[200].mxu1 %vm1518_vm1, %v4012_v2  ;;  %v3925_v4 = vmax.f32 %v3797_v0, 0.0 }
 0x344   : > { %v3796_v7 = vadd.f32 %v8498_v28, %v3510_v41  ;;  %v3923_v20 = vmax.f32 %v3795_v57, 0.0 }
 0x345   : > { %v3926_v24 = vmax.f32 %v3798_v60, 0.0 }
 0x346   : > { %v3924_v43 = vmax.f32 %v3796_v7, 0.0  ;;  %v6814_v13 = vpop.f32.mrb[208].mxu0 }
 0x347   : > { %v4014_v26 = vpack.c.bf16 %v3926_v24, %v3925_v4  ;;  %v3531_v23 = vadd.f32 %v6814_v13, %v8397_v22  ;;  %v3522_v37 = vpop.f32.mrb[209].mxu0 }
 0x348   : > { %v4013_v56 = vpack.c.bf16 %v3924_v43, %v3923_v20  ;;  %v3523_v48 = vadd.f32 %v3522_v37, %v8386_v49  ;;  %v6815_v17 = vpop.f32.mrb[210].mxu0  ;;  %v8540_v37 = vpop.permute.xlu0 %2804 }
 0x349   : > { %v3801_v38 = vadd.f32 %v8498_v28, %v3531_v23  ;;  %v3534_v10 = vadd.f32 %v6815_v17, %v8401_v31  ;;  %v3525_v19 = vpop.f32.mrb[211].mxu0 }
 0x34a   : > { %v3799_v58 = vadd.f32 %v8498_v28, %v3523_v48  ;;  %v3526_v61 = vadd.f32 %v3525_v19, %v8388_v45  ;;  %6944 = vmatprep.mubr.msk.bf16.mxu1 %vm1518_vm1, %v4013_v56  ;;  %v8518_v45 = vpop.permute.xlu1 %2798 }
 0x34b   : > { %v3802_v22 = vadd.f32 %v8498_v28, %v3534_v10  ;;  %6945 = vmatmul.mubr.msk.bf16.gmra.mrb[204].mxu1 %vm1518_vm1, %v4014_v26  ;;  %v3929_v30 = vmax.f32 %v3801_v38, 0.0 }
 0x34c   : > { %v3800_v49 = vadd.f32 %v8498_v28, %v3526_v61  ;;  %v3927_v50 = vmax.f32 %v3799_v58, 0.0 }
 0x34d   : > { %v3930_v29 = vmax.f32 %v3802_v22, 0.0 }
 0x34e   : > { %v3928_v25 = vmax.f32 %v3800_v49, 0.0  ;;  %v6818_v31 = vpop.f32.mrb[212].mxu0  ;;  %v8531_v39 = vpop.permute.xlu1 %2802 }
 0x34f   : > { %v4016_v59 = vpack.c.bf16 %v3930_v29, %v3929_v30  ;;  %v3547_v42 = vadd.f32 %v6818_v31, %v8418_v33  ;;  %v3538_v54 = vpop.f32.mrb[213].mxu0  ;;  %v8549_v30 = vpop.permute.xlu0 %2808 }
 0x350   : > { %v4015_v51 = vpack.c.bf16 %v3928_v25, %v3927_v50  ;;  %v3539_v34 = vadd.f32 %v3538_v54, %v8406_v21  ;;  %v6819_v47 = vpop.f32.mrb[214].mxu0 }
 0x351   : > { %v3805_v14 = vadd.f32 %v8498_v28, %v3547_v42  ;;  %v3550_v2 = vadd.f32 %v6819_v47, %v8421_v8  ;;  %v3541_v52 = vpop.f32.mrb[215].mxu0 }
 0x352   : > { %v3803_v36 = vadd.f32 %v8498_v28, %v3539_v34  ;;  %v3542_v35 = vadd.f32 %v3541_v52, %v8410_v15  ;;  %6948 = vmatprep.mubr.msk.bf16.mxu1 %vm1518_vm1, %v4015_v51  ;;  %v8544_v56 = vpop.permute.xlu1 %2806 }
 0x353   : > { %v3806_v33 = vadd.f32 %v8498_v28, %v3550_v2  ;;  %6949 = vmatmul.mubr.msk.bf16.gmra.mrb[208].mxu1 %vm1518_vm1, %v4016_v59  ;;  %v3933_v21 = vmax.f32 %v3805_v14, 0.0  ;;  %v8561_v14 = vpop.permute.xlu0 %2812 }
 0x354   : > { %v3804_v63 = vadd.f32 %v8498_v28, %v3542_v35  ;;  %v3931_v8 = vmax.f32 %v3803_v36, 0.0 }
 0x355   : > { %v3934_v0 = vmax.f32 %v3806_v33, 0.0 }
 0x356   : > { %v3932_v44 = vmax.f32 %v3804_v63, 0.0  ;;  %v6822_v57 = vpop.f32.mrb[216].mxu0  ;;  %v8553_v31 = vpop.permute.xlu1 %2810 }
 0x357   : > { %v4018_v41 = vpack.c.bf16 %v3934_v0, %v3933_v21  ;;  %v3563_v15 = vadd.f32 %v6822_v57, %v8443_v32  ;;  %v3554_v60 = vpop.f32.mrb[217].mxu0 }
 0x358   : > { %v4017_v7 = vpack.c.bf16 %v3932_v44, %v3931_v8  ;;  %v3555_v4 = vadd.f32 %v3554_v60, %v8432_v46  ;;  %v6823_v24 = vpop.f32.mrb[218].mxu0 }
 0x359   : > { %v3809_v20 = vadd.f32 %v8498_v28, %v3563_v15  ;;  %v3566_v43 = vadd.f32 %v6823_v24, %v8447_v62  ;;  %v3557_v13 = vpop.f32.mrb[219].mxu0  ;;  %v8575_v15 = vpop.permute.xlu0 %2816 }
 0x35a   : > { %v3807_v26 = vadd.f32 %v8498_v28, %v3555_v4  ;;  %v3558_v23 = vadd.f32 %v3557_v13, %v8434_v40  ;;  %6952 = vmatprep.mubr.msk.bf16.mxu1 %vm1518_vm1, %v4017_v7 }
 0x35b   : > { %v3810_v32 = vadd.f32 %v8498_v28, %v3566_v43  ;;  %6953 = vmatmul.mubr.msk.bf16.gmra.mrb[212].mxu1 %vm1518_vm1, %v4018_v41  ;;  %v3937_v48 = vmax.f32 %v3809_v20, 0.0 }
 0x35c   : > { %v3808_v46 = vadd.f32 %v8498_v28, %v3558_v23  ;;  %v3935_v62 = vmax.f32 %v3807_v26, 0.0 }
 0x35d   : > { %v3938_v17 = vmax.f32 %v3810_v32, 0.0 }
 0x35e   : > { %v3936_v38 = vmax.f32 %v3808_v46, 0.0  ;;  %v6826_v10 = vpop.f32.mrb[220].mxu0 }
 0x35f   : > { %v4020_v19 = vpack.c.bf16 %v3938_v17, %v3937_v48  ;;  %v3579_v40 = vadd.f32 %v6826_v10, %v8464_v6  ;;  %v3570_v58 = vpop.f32.mrb[221].mxu0 }
 0x360   : > { %v4019_v61 = vpack.c.bf16 %v3936_v38, %v3935_v62  ;;  %v3571_v22 = vadd.f32 %v3570_v58, %v8452_v16  ;;  %v6827_v49 = vpop.f32.mrb[222].mxu0  ;;  %v2821_v38 = vpop.permute.xlu0 %2820 }
 0x361   : > { %v3813_v29 = vadd.f32 %v8498_v28, %v3579_v40  ;;  %v3582_v50 = vadd.f32 %v6827_v49, %v8467_v9  ;;  %v3573_v25 = vpop.f32.mrb[223].mxu0 }
 0x362   : > { %v3811_v59 = vadd.f32 %v8498_v28, %v3571_v22  ;;  %v3574_v42 = vadd.f32 %v3573_v25, %v8456_v27  ;;  %6956 = vmatprep.mubr.msk.bf16.mxu1 %vm1518_vm1, %v4019_v61  ;;  %v8564_v27 = vpop.permute.xlu1 %2814 }
 0x363   : > { %v3814_v6 = vadd.f32 %v8498_v28, %v3582_v50  ;;  %6957 = vmatmul.mubr.msk.bf16.gmra.mrb[216].mxu1 %vm1518_vm1, %v4020_v19  ;;  %v3941_v54 = vmax.f32 %v3813_v29, 0.0 }
 0x364   : > { %v3812_v16 = vadd.f32 %v8498_v28, %v3574_v42  ;;  %v3939_v34 = vmax.f32 %v3811_v59, 0.0  ;;  %v8593_v59 = vpop.permute.xlu0 %2824 }
 0x365   : > { %v3942_v51 = vmax.f32 %v3814_v6, 0.0 }
 0x366   : > { %v3940_v47 = vmax.f32 %v3812_v16, 0.0  ;;  %v6830_v9 = vpop.f32.mrb[224].mxu0  ;;  %v8577_v7 = vpop.permute.xlu1 %2818 }
 0x367   : > { %v4022_v2 = vpack.c.bf16 %v3942_v51, %v3941_v54  ;;  %v3595_v52 = vadd.f32 %v6830_v9, %v8489_v5  ;;  %v3586_v36 = vpop.f32.mrb[225].mxu0 }
 0x368   : > { %v4021_v35 = vpack.c.bf16 %v3940_v47, %v3939_v34  ;;  %v3587_v33 = vadd.f32 %v3586_v36, %v8478_v1  ;;  %v6831_v63 = vpop.f32.mrb[226].mxu0  ;;  %v8605_v36 = vpop.permute.xlu0 %2828 }
 0x369   : > { %v3817_v21 = vadd.f32 %v8498_v28, %v3595_v52  ;;  %v3598_v0 = vadd.f32 %v6831_v63, %v8493_v53  ;;  %v3589_v8 = vpop.f32.mrb[227].mxu0 }
 0x36a   : > { %v3815_v44 = vadd.f32 %v8498_v28, %v3587_v33  ;;  %v3590_v57 = vadd.f32 %v3589_v8, %v8480_v18  ;;  %6960 = vmatprep.mubr.msk.bf16.mxu1 %vm1518_vm1, %v4021_v35 }
 0x36b   : > { %v3818_v5 = vadd.f32 %v8498_v28, %v3598_v0  ;;  %6961 = vmatmul.mubr.msk.bf16.gmra.mrb[220].mxu1 %vm1518_vm1, %v4022_v2  ;;  %v3945_v1 = vmax.f32 %v3817_v21, 0.0 }
 0x36c   : > { %v3816_v41 = vadd.f32 %v8498_v28, %v3590_v57  ;;  %v3943_v53 = vmax.f32 %v3815_v44, 0.0 }
 0x36d   : > { %v3946_v60 = vmax.f32 %v3818_v5, 0.0 }
 0x36e   : > { %v3944_v4 = vmax.f32 %v3816_v41, 0.0  ;;  %v6834_v24 = vpop.f32.mrb[228].mxu0 }
 0x36f   : > { %v4024_v20 = vpack.c.bf16 %v3946_v60, %v3945_v1  ;;  %v3611_v18 = vadd.f32 %v6834_v24, %v8515_v55  ;;  %v3602_v43 = vpop.f32.mrb[229].mxu0  ;;  %v8588_v55 = vpop.permute.xlu1 %2822 }
 0x370   : > { %v4023_v13 = vpack.c.bf16 %v3944_v4, %v3943_v53  ;;  %v3603_v26 = vadd.f32 %v3602_v43, %v8503_v3  ;;  %v6835_v23 = vpop.f32.mrb[230].mxu0  ;;  %v8624_v53 = vpop.permute.xlu0 %2832 }
 0x371   : > { %v3821_v32 = vadd.f32 %v8498_v28, %v3611_v18  ;;  %v3614_v46 = vadd.f32 %v6835_v23, %v8518_v45  ;;  %v3605_v48 = vpop.f32.mrb[231].mxu0 }
 0x372   : > { %v3819_v17 = vadd.f32 %v8498_v28, %v3603_v26  ;;  %v3606_v62 = vadd.f32 %v3605_v48, %v8507_v12  ;;  %6964 = vmatprep.mubr.msk.bf16.mxu1 %vm1518_vm1, %v4023_v13  ;;  %v8632_v48 = vld [vmem:[%s9482_s3 + $0x4] ss:$0 sm:$0xff] }
 0x373   : > { %v3822_v10 = vadd.f32 %v8498_v28, %v3614_v46  ;;  %6965 = vmatmul.mubr.msk.bf16.gmra.mrb[224].mxu1 %vm1518_vm1, %v4024_v20  ;;  %v3949_v19 = vmax.f32 %v3821_v32, 0.0  ;;  %v8597_v54 = vpop.permute.xlu1 %2826 }
 0x374   : > { %v3820_v3 = vadd.f32 %v8498_v28, %v3606_v62  ;;  %v3947_v58 = vmax.f32 %v3819_v17, 0.0 }
 0x375   : > { %v3950_v40 = vmax.f32 %v3822_v10, 0.0 }
 0x376   : > { %v3948_v45 = vmax.f32 %v3820_v3, 0.0  ;;  %v6838_v61 = vpop.f32.mrb[232].mxu0 }
 0x377   : > { %v4026_v22 = vpack.c.bf16 %v3950_v40, %v3949_v19  ;;  %v3627_v49 = vadd.f32 %v6838_v61, %v8540_v37  ;;  %v3618_v12 = vpop.f32.mrb[233].mxu0 }
 0x378   : > { %v4025_v29 = vpack.c.bf16 %v3948_v45, %v3947_v58  ;;  %v3619_v50 = vadd.f32 %v3618_v12, %v8529_v11  ;;  %v6839_v25 = vpop.f32.mrb[234].mxu0 }
 0x379   : > { %v3825_v42 = vadd.f32 %v8498_v28, %v3627_v49  ;;  %v3630_v6 = vadd.f32 %v6839_v25, %v8544_v56  ;;  %v3621_v16 = vpop.f32.mrb[235].mxu0 }
 0x37a   : > { %v3823_v51 = vadd.f32 %v8498_v28, %v3619_v50  ;;  %v3622_v34 = vadd.f32 %v3621_v16, %v8531_v39  ;;  %6968 = vmatprep.mubr.msk.bf16.mxu1 %vm1518_vm1, %v4025_v29  ;;  %v8608_v39 = vpop.permute.xlu1 %2830 }
 0x37b   : > { %v3826_v37 = vadd.f32 %v8498_v28, %v3630_v6  ;;  %6969 = vmatmul.mubr.msk.bf16.gmra.mrb[228].mxu1 %vm1518_vm1, %v4026_v22  ;;  %v3953_v47 = vmax.f32 %v3825_v42, 0.0 }
 0x37c   : > { %v3824_v11 = vadd.f32 %v8498_v28, %v3622_v34  ;;  %v3951_v2 = vmax.f32 %v3823_v51, 0.0 }
 0x37d   : > { %v3954_v9 = vmax.f32 %v3826_v37, 0.0 }
 0x37e   : > { %v3952_v52 = vmax.f32 %v3824_v11, 0.0  ;;  %v6842_v56 = vpop.f32.mrb[236].mxu0  ;;  %v8626_v24 = vpop.permute.xlu1 %2834 }
 0x37f   : > { %v4028_v35 = vpack.c.bf16 %v3954_v9, %v3953_v47  ;;  %v3643_v33 = vadd.f32 %v6842_v56, %v8561_v14  ;;  %v3634_v63 = vpop.f32.mrb[237].mxu0 }
 0x380   : > { %v4027_v21 = vpack.c.bf16 %v3952_v52, %v3951_v2  ;;  %v3635_v0 = vadd.f32 %v3634_v63, %v8549_v30  ;;  %v6843_v8 = vpop.f32.mrb[238].mxu0  ;;  %v8622_v30 = vld [vmem:[%s9482_s3 + $0x3] ss:$0 sm:$0xff] }
 0x381   : > { %v3829_v44 = vadd.f32 %v8498_v28, %v3643_v33  ;;  %v3646_v57 = vadd.f32 %v6843_v8, %v8564_v27  ;;  %v3637_v5 = vpop.f32.mrb[239].mxu0 }
 0x382   : > { %v3827_v41 = vadd.f32 %v8498_v28, %v3635_v0  ;;  %v3638_v1 = vadd.f32 %v3637_v5, %v8553_v31  ;;  %6972 = vmatprep.mubr.msk.bf16.mxu1 %vm1518_vm1, %v4027_v21  ;;  %v8651_v37 = vpop.permute.xlu1 %2838 }
 0x383   : > { %v3830_v14 = vadd.f32 %v8498_v28, %v3646_v57  ;;  %6973 = vmatmul.mubr.msk.bf16.gmra.mrb[232].mxu1 %vm1518_vm1, %v4028_v35  ;;  %v3957_v27 = vmax.f32 %v3829_v44, 0.0 }
 0x384   : > { %v3828_v60 = vadd.f32 %v8498_v28, %v3638_v1  ;;  %v3955_v31 = vmax.f32 %v3827_v41, 0.0 }
 0x385   : > { %v3958_v4 = vmax.f32 %v3830_v14, 0.0 }
 0x386   : > { %v3956_v20 = vmax.f32 %v3828_v60, 0.0  ;;  %v6870_v18 = vpop.f32.mrb[128].mxu1  ;;  %v6846_v13 = vpop.f32.mrb[240].mxu0 }
 0x387   : > { %v4030_v43 = vpack.c.bf16 %v3958_v4, %v3957_v27  ;;  %v4312_v26 = vadd.f32 %v6870_v18, %v8622_v30  ;;  %v4303_v23 = vpop.f32.mrb[129].mxu1  ;;  %v3659_v46 = vadd.f32 %v6846_v13, %v2821_v38  ;;  %v3650_v17 = vpop.f32.mrb[241].mxu0 }
 0x388   : > { %v4029_v32 = vpack.c.bf16 %v3956_v20, %v3955_v31  ;;  %v4304_v62 = vadd.f32 %v8622_v30, %v4303_v23  ;;  %v6871_v10 = vpop.f32.mrb[130].mxu1  ;;  %v3651_v19 = vadd.f32 %v3650_v17, %v8575_v15  ;;  %v6847_v40 = vpop.f32.mrb[242].mxu0 }
 0x389   : > { %v4816_v3 = vmax.f32 %v4312_v26, 0.0  ;;  %v4315_v58 = vadd.f32 %v6871_v10, %v8622_v30  ;;  %v4306_v45 = vpop.f32.mrb[131].mxu1  ;;  %v3833_v61 = vadd.f32 %v8498_v28, %v3659_v46  ;;  %v3662_v38 = vadd.f32 %v6847_v40, %v8588_v55  ;;  %v3653_v49 = vpop.f32.mrb[243].mxu0 }
 0x38a   : > { %v4814_v22 = vmax.f32 %v4304_v62, 0.0  ;;  %v4307_v12 = vadd.f32 %v8622_v30, %v4306_v45  ;;  %6976 = vmatprep.mubr.msk.bf16.mxu1 %vm1518_vm1, %v4029_v32  ;;  %v3831_v50 = vadd.f32 %v8498_v28, %v3651_v19  ;;  %v3654_v15 = vadd.f32 %v3653_v49, %v8577_v7  ;;  %v8647_v55 = vpop.permute.xlu0 %2836 }
 0x38b   : > { %v4950_v29 = vmul.f32 %v8632_v48, %v4816_v3  ;;  %v4817_v25 = vmax.f32 %v4315_v58, 0.0  ;;  %6977 = vmatmul.mubr.msk.bf16.gmra.mrb[236].mxu1 %vm1518_vm1, %v4030_v43  ;;  %v3834_v6 = vadd.f32 %v8498_v28, %v3662_v38  ;;  %v3961_v11 = vmax.f32 %v3833_v61, 0.0 }
 0x38c   : > { %v4948_v42 = vmul.f32 %v8632_v48, %v4814_v22  ;;  %v4815_v16 = vmax.f32 %v4307_v12, 0.0  ;;  %v3832_v51 = vadd.f32 %v8498_v28, %v3654_v15  ;;  %v3959_v47 = vmax.f32 %v3831_v50, 0.0 }
 0x38d   : > { %v5082_v34 = vsel %vm1518_vm1, %v4950_v29, 0.0  ;;  %v3962_v9 = vmax.f32 %v3834_v6, 0.0  ;;  %v4951_v52 = vmul.f32 %v8632_v48, %v4817_v25 }
 0x38e   : > { %v4949_v7 = vmul.f32 %v8632_v48, %v4815_v16  ;;  %5083 = vadd.xlane.f32.xlu0 %v5082_v34  ;;  %v6874_v2 = vpop.f32.mrb[132].mxu1  ;;  %v3960_v56 = vmax.f32 %v3832_v51, 0.0  ;;  %v6850_v35 = vpop.f32.mrb[244].mxu0  ;;  %v5076_v21 = vsel %vm1518_vm1, %v4948_v42, 0.0 }
 0x38f   : > { %v4328_v33 = vadd.f32 %v6874_v2, %v8622_v30  ;;  %v4319_v63 = vpop.f32.mrb[133].mxu1  ;;  %v4032_v0 = vpack.c.bf16 %v3962_v9, %v3961_v11  ;;  %v3675_v8 = vadd.f32 %v6850_v35, %v8605_v36  ;;  %v3666_v44 = vpop.f32.mrb[245].mxu0  ;;  %v5085_v40 = vsel %vm1518_vm1, %v4951_v52, 0.0 }
 0x390   : > { %v4320_v57 = vadd.f32 %v8622_v30, %v4319_v63  ;;  %v6875_v5 = vpop.f32.mrb[134].mxu1  ;;  %v5079_v41 = vsel %vm1518_vm1, %v4949_v7, 0.0  ;;  %v4031_v1 = vpack.c.bf16 %v3960_v56, %v3959_v47  ;;  %v3667_v60 = vadd.f32 %v3666_v44, %v8593_v59  ;;  %v6851_v27 = vpop.f32.mrb[246].mxu0 }
 0x391   : > { %v4820_v14 = vmax.f32 %v4328_v33, 0.0  ;;  %v4331_v4 = vadd.f32 %v6875_v5, %v8622_v30  ;;  %v4322_v31 = vpop.f32.mrb[135].mxu1  ;;  %5080 = vadd.xlane.f32.xlu1 %v5079_v41  ;;  %v3837_v20 = vadd.f32 %v8498_v28, %v3675_v8  ;;  %v3678_v36 = vadd.f32 %v6851_v27, %v8608_v39  ;;  %v3669_v43 = vpop.f32.mrb[247].mxu0 }
 0x392   : > { %v4818_v18 = vmax.f32 %v4320_v57, 0.0  ;;  %v4323_v13 = vadd.f32 %v8622_v30, %v4322_v31  ;;  %5077 = vadd.xlane.f32.xlu0 %v5076_v21  ;;  %v3835_v23 = vadd.f32 %v8498_v28, %v3667_v60  ;;  %v3670_v59 = vadd.f32 %v3669_v43, %v8597_v54  ;;  %6980 = vmatprep.mubr.msk.bf16.mxu1 %vm1518_vm1, %v4031_v1  ;;  %v8672_v39 = vpop.permute.xlu0 %2840  ;;  %v8678_v54 = vpop.permute.xlu1 %2842 }
 0x393   : > { %v4954_v26 = vmul.f32 %v8632_v48, %v4820_v14  ;;  %v4821_v32 = vmax.f32 %v4331_v4, 0.0  ;;  %v3838_v17 = vadd.f32 %v8498_v28, %v3678_v36  ;;  %6981 = vmatmul.mubr.msk.bf16.gmra.mrb[240].mxu1 %vm1518_vm1, %v4032_v0  ;;  %v3965_v58 = vmax.f32 %v3837_v20, 0.0 }
 0x394   : > { %v4952_v46 = vmul.f32 %v8632_v48, %v4818_v18  ;;  %v4819_v62 = vmax.f32 %v4323_v13, 0.0  ;;  %v3836_v3 = vadd.f32 %v8498_v28, %v3670_v59  ;;  %v3963_v45 = vmax.f32 %v3835_v23, 0.0 }
 0x395   : > { %v4955_v10 = vmul.f32 %v8632_v48, %v4821_v32  ;;  %v5094_v19 = vsel %vm1518_vm1, %v4954_v26, 0.0  ;;  %v3966_v61 = vmax.f32 %v3838_v17, 0.0 }
 0x396   : > { %v6878_v22 = vpop.f32.mrb[136].mxu1  ;;  %5095 = vadd.xlane.f32.xlu1 %v5094_v19  ;;  %5086 = vadd.xlane.f32.xlu0 %v5085_v40  ;;  %v3964_v38 = vmax.f32 %v3836_v3, 0.0  ;;  %v4953_v49 = vmul.f32 %v8632_v48, %v4819_v62  ;;  %v6854_v12 = vpop.f32.mrb[248].mxu0  ;;  %v5088_v25 = vsel %vm1518_vm1, %v4952_v46, 0.0 }
 0x397   : > { %v4344_v29 = vadd.f32 %v6878_v22, %v8622_v30  ;;  %v4335_v50 = vpop.f32.mrb[137].mxu1  ;;  %v4034_v15 = vpack.c.bf16 %v3966_v61, %v3965_v58  ;;  %v3691_v42 = vadd.f32 %v6854_v12, %v8647_v55  ;;  %v3682_v6 = vpop.f32.mrb[249].mxu0  ;;  %v5097_v34 = vsel %vm1518_vm1, %v4955_v10, 0.0 }
 0x398   : > { %v4336_v16 = vadd.f32 %v8622_v30, %v4335_v50  ;;  %v6879_v51 = vpop.f32.mrb[138].mxu1  ;;  %v4033_v11 = vpack.c.bf16 %v3964_v38, %v3963_v45  ;;  %v3683_v9 = vadd.f32 %v3682_v6, %v8624_v53  ;;  %v6855_v7 = vpop.f32.mrb[250].mxu0  ;;  %v5091_v60 = vsel %vm1518_vm1, %v4953_v49, 0.0 }
 0x399   : > { %v4824_v47 = vmax.f32 %v4344_v29, 0.0  ;;  %v4347_v2 = vadd.f32 %v6879_v51, %v8622_v30  ;;  %v4338_v52 = vpop.f32.mrb[139].mxu1  ;;  %v3841_v56 = vadd.f32 %v8498_v28, %v3691_v42  ;;  %v3694_v33 = vadd.f32 %v6855_v7, %v8651_v37  ;;  %v3685_v55 = vpop.f32.mrb[251].mxu0 }
 0x39a   : > { %v4822_v35 = vmax.f32 %v4336_v16, 0.0  ;;  %v4339_v63 = vadd.f32 %v8622_v30, %v4338_v52  ;;  %5089 = vadd.xlane.f32.xlu1 %v5088_v25  ;;  %5098 = vadd.xlane.f32.xlu0 %v5097_v34  ;;  %v3839_v0 = vadd.f32 %v8498_v28, %v3683_v9  ;;  %v3686_v53 = vadd.f32 %v3685_v55, %v8626_v24  ;;  %v2845_v37 = vpop.permute.xlu0 %2844  ;;  %v2847_v27 = vpop.permute.xlu1 %2846 }
 0x39b   : > { %v4958_v21 = vmul.f32 %v8632_v48, %v4824_v47  ;;  %v4825_v8 = vmax.f32 %v4347_v2, 0.0  ;;  %6984 = vmatprep.mubr.msk.bf16.mxu1 %vm1518_vm1, %v4033_v11  ;;  %v3842_v57 = vadd.f32 %v8498_v28, %v3694_v33  ;;  %v3969_v24 = vmax.f32 %v3841_v56, 0.0 }
 0x39c   : > { %v4956_v44 = vmul.f32 %v8632_v48, %v4822_v35  ;;  %v4823_v5 = vmax.f32 %v4339_v63, 0.0  ;;  %6985 = vmatmul.mubr.msk.bf16.gmra.mrb[244].mxu1 %vm1518_vm1, %v4034_v15  ;;  %v3840_v1 = vadd.f32 %v8498_v28, %v3686_v53  ;;  %v3967_v4 = vmax.f32 %v3839_v0, 0.0 }
 0x39d   : > { %v4959_v41 = vmul.f32 %v8632_v48, %v4825_v8  ;;  %v5106_v14 = vsel %vm1518_vm1, %v4958_v21, 0.0  ;;  %v3970_v31 = vmax.f32 %v3842_v57, 0.0 }
 0x39e   : > { %v6882_v20 = vpop.f32.mrb[140].mxu1  ;;  %5107 = vadd.xlane.f32.xlu1 %v5106_v14  ;;  %5092 = vadd.xlane.f32.xlu0 %v5091_v60  ;;  %v3968_v18 = vmax.f32 %v3840_v1, 0.0  ;;  %v4957_v36 = vmul.f32 %v8632_v48, %v4823_v5  ;;  %v6858_v13 = vpop.f32.mrb[252].mxu0  ;;  %v5100_v23 = vsel %vm1518_vm1, %v4956_v44, 0.0 }
 0x39f   : > { %v4360_v43 = vadd.f32 %v6882_v20, %v8622_v30  ;;  %v4351_v26 = vpop.f32.mrb[141].mxu1  ;;  %v4036_v32 = vpack.c.bf16 %v3970_v31, %v3969_v24  ;;  %v3707_v59 = vadd.f32 %v6858_v13, %v2845_v37  ;;  %v3698_v46 = vpop.f32.mrb[253].mxu0  ;;  %v5109_v10 = vsel %vm1518_vm1, %v4959_v41, 0.0 }
 0x3a0   : > { %v4352_v17 = vadd.f32 %v8622_v30, %v4351_v26  ;;  %v6883_v62 = vpop.f32.mrb[142].mxu1  ;;  %v4035_v3 = vpack.c.bf16 %v3968_v18, %v3967_v4  ;;  %v3699_v40 = vadd.f32 %v3698_v46, %v8672_v39  ;;  %v6859_v58 = vpop.f32.mrb[254].mxu0  ;;  %v5103_v47 = vsel %vm1518_vm1, %v4957_v36, 0.0 }
 0x3a1   : > { %v4828_v19 = vmax.f32 %v4360_v43, 0.0  ;;  %v4363_v45 = vadd.f32 %v6883_v62, %v8622_v30  ;;  %v4354_v61 = vpop.f32.mrb[143].mxu1  ;;  %v3845_v22 = vadd.f32 %v8498_v28, %v3707_v59  ;;  %v3710_v49 = vadd.f32 %v6859_v58, %v2847_v27  ;;  %v3701_v12 = vpop.f32.mrb[255].mxu0 }
 0x3a2   : > { %v4826_v38 = vmax.f32 %v4352_v17, 0.0  ;;  %v4355_v29 = vadd.f32 %v8622_v30, %v4354_v61  ;;  %5101 = vadd.xlane.f32.xlu1 %v5100_v23  ;;  %5110 = vadd.xlane.f32.xlu0 %v5109_v10  ;;  %v3843_v25 = vadd.f32 %v8498_v28, %v3699_v40  ;;  %v3702_v39 = vadd.f32 %v3701_v12, %v8678_v54 }
 0x3a3   : > { %v4962_v50 = vmul.f32 %v8632_v48, %v4828_v19  ;;  %v4829_v15 = vmax.f32 %v4363_v45, 0.0  ;;  %6988 = vmatprep.mubr.msk.bf16.mxu1 %vm1518_vm1, %v4035_v3  ;;  %v3846_v6 = vadd.f32 %v8498_v28, %v3710_v49  ;;  %v3973_v9 = vmax.f32 %v3845_v22, 0.0 }
 0x3a4   : > { %v4960_v42 = vmul.f32 %v8632_v48, %v4826_v38  ;;  %v4827_v16 = vmax.f32 %v4355_v29, 0.0  ;;  %6989 = vmatmul.mubr.msk.bf16.gmra.mrb[248].mxu1 %vm1518_vm1, %v4036_v32  ;;  %v3844_v34 = vadd.f32 %v8498_v28, %v3702_v39  ;;  %v3971_v2 = vmax.f32 %v3843_v25, 0.0 }
 0x3a5   : > { %v4963_v51 = vmul.f32 %v8632_v48, %v4829_v15  ;;  %v5118_v11 = vsel %vm1518_vm1, %v4962_v50, 0.0  ;;  %v3974_v7 = vmax.f32 %v3846_v6, 0.0 }
 0x3a6   : > { %v6886_v54 = vpop.f32.mrb[144].mxu1  ;;  %5119 = vadd.xlane.f32.xlu1 %v5118_v11  ;;  %5104 = vadd.xlane.f32.xlu0 %v5103_v47  ;;  %v3972_v52 = vmax.f32 %v3844_v34, 0.0  ;;  %v4961_v55 = vmul.f32 %v8632_v48, %v4827_v16  ;;  %v5112_v21 = vsel %vm1518_vm1, %v4960_v42, 0.0 }
 0x3a7   : > { %v4376_v56 = vadd.f32 %v6886_v54, %v8622_v30  ;;  %v4367_v35 = vpop.f32.mrb[145].mxu1  ;;  %v4038_v33 = vpack.c.bf16 %v3974_v7, %v3973_v9  ;;  %v5121_v57 = vsel %vm1518_vm1, %v4963_v51, 0.0 }
 0x3a8   : > { %v4368_v63 = vadd.f32 %v8622_v30, %v4367_v35  ;;  %v6887_v28 = vpop.f32.mrb[146].mxu1  ;;  %v4037_v0 = vpack.c.bf16 %v3972_v52, %v3971_v2  ;;  %v5115_v4 = vsel %vm1518_vm1, %v4961_v55, 0.0 }
 0x3a9   : > { %v4832_v8 = vmax.f32 %v4376_v56, 0.0  ;;  %v4379_v53 = vadd.f32 %v6887_v28, %v8622_v30  ;;  %v4370_v44 = vpop.f32.mrb[147].mxu1 }
 0x3aa   : > { %v4830_v5 = vmax.f32 %v4368_v63, 0.0  ;;  %v4371_v37 = vadd.f32 %v8622_v30, %v4370_v44  ;;  %5113 = vadd.xlane.f32.xlu1 %v5112_v21  ;;  %5122 = vadd.xlane.f32.xlu0 %v5121_v57 }
 0x3ab   : > { %v4966_v41 = vmul.f32 %v8632_v48, %v4832_v8  ;;  %v4833_v1 = vmax.f32 %v4379_v53, 0.0  ;;  %6992 = vmatprep.mubr.msk.bf16.mxu1 %vm1518_vm1, %v4037_v0 }
 0x3ac   : > { %v4831_v14 = vmax.f32 %v4371_v37, 0.0  ;;  %6993 = vmatmul.mubr.msk.bf16.gmra.mrb[252].mxu1 %vm1518_vm1, %v4038_v33  ;;  %v4964_v60 = vmul.f32 %v8632_v48, %v4830_v5 }
 0x3ad   : > { %v4967_v27 = vmul.f32 %v8632_v48, %v4833_v1  ;;  %v5130_v24 = vsel %vm1518_vm1, %v4966_v41, 0.0 }
 0x3ae   : > { %v6890_v31 = vpop.f32.mrb[148].mxu1  ;;  %5131 = vadd.xlane.f32.xlu1 %v5130_v24  ;;  %5116 = vadd.xlane.f32.xlu0 %v5115_v4  ;;  %v4965_v36 = vmul.f32 %v8632_v48, %v4831_v14  ;;  %v5124_v59 = vsel %vm1518_vm1, %v4964_v60, 0.0 }
 0x3af   : > { %v4392_v20 = vadd.f32 %v6890_v31, %v8622_v30  ;;  %v4383_v18 = vpop.f32.mrb[149].mxu1  ;;  %v5133_v46 = vsel %vm1518_vm1, %v4967_v27, 0.0 }
 0x3b0   : > { %v4384_v43 = vadd.f32 %v8622_v30, %v4383_v18  ;;  %v6891_v13 = vpop.f32.mrb[150].mxu1  ;;  %v5127_v61 = vsel %vm1518_vm1, %v4965_v36, 0.0 }
 0x3b1   : > { %v4836_v26 = vmax.f32 %v4392_v20, 0.0  ;;  %v4395_v23 = vadd.f32 %v6891_v13, %v8622_v30  ;;  %v4386_v32 = vpop.f32.mrb[151].mxu1 }
 0x3b2   : > { %v4834_v17 = vmax.f32 %v4384_v43, 0.0  ;;  %v4387_v62 = vadd.f32 %v8622_v30, %v4386_v32  ;;  %5125 = vadd.xlane.f32.xlu1 %v5124_v59  ;;  %5134 = vadd.xlane.f32.xlu0 %v5133_v46 }
 0x3b3   : > { %v4970_v10 = vmul.f32 %v8632_v48, %v4836_v26  ;;  %v4837_v3 = vmax.f32 %v4395_v23, 0.0 }
 0x3b4   : > { %v4835_v19 = vmax.f32 %v4387_v62, 0.0  ;;  %v4968_v40 = vmul.f32 %v8632_v48, %v4834_v17 }
 0x3b5   : > { %v4971_v58 = vmul.f32 %v8632_v48, %v4837_v3  ;;  %v5142_v45 = vsel %vm1518_vm1, %v4970_v10, 0.0 }
 0x3b6   : > { %v6894_v22 = vpop.f32.mrb[152].mxu1  ;;  %5143 = vadd.xlane.f32.xlu1 %v5142_v45  ;;  %5128 = vadd.xlane.f32.xlu0 %v5127_v61  ;;  %v4969_v12 = vmul.f32 %v8632_v48, %v4835_v19  ;;  %v5136_v42 = vsel %vm1518_vm1, %v4968_v40, 0.0 }
 0x3b7   : > { %v4408_v38 = vadd.f32 %v6894_v22, %v8622_v30  ;;  %v4399_v49 = vpop.f32.mrb[153].mxu1  ;;  %v5145_v6 = vsel %vm1518_vm1, %v4971_v58, 0.0 }
 0x3b8   : > { %v4400_v29 = vadd.f32 %v8622_v30, %v4399_v49  ;;  %v6895_v50 = vpop.f32.mrb[154].mxu1  ;;  %v5139_v2 = vsel %vm1518_vm1, %v4969_v12, 0.0 }
 0x3b9   : > { %v4840_v25 = vmax.f32 %v4408_v38, 0.0  ;;  %v4411_v15 = vadd.f32 %v6895_v50, %v8622_v30  ;;  %v4402_v39 = vpop.f32.mrb[155].mxu1 }
 0x3ba   : > { %v4838_v16 = vmax.f32 %v4400_v29, 0.0  ;;  %v4403_v51 = vadd.f32 %v8622_v30, %v4402_v39  ;;  %5137 = vadd.xlane.f32.xlu1 %v5136_v42  ;;  %5146 = vadd.xlane.f32.xlu0 %v5145_v6 }
 0x3bb   : > { %v4974_v34 = vmul.f32 %v8632_v48, %v4840_v25  ;;  %v4841_v11 = vmax.f32 %v4411_v15, 0.0 }
 0x3bc   : > { %v4839_v47 = vmax.f32 %v4403_v51, 0.0  ;;  %v4972_v9 = vmul.f32 %v8632_v48, %v4838_v16 }
 0x3bd   : > { %v4975_v7 = vmul.f32 %v8632_v48, %v4841_v11  ;;  %v5154_v54 = vsel %vm1518_vm1, %v4974_v34, 0.0 }
 0x3be   : > { %v6898_v52 = vpop.f32.mrb[156].mxu1  ;;  %5155 = vadd.xlane.f32.xlu1 %v5154_v54  ;;  %5140 = vadd.xlane.f32.xlu0 %v5139_v2  ;;  %v4973_v33 = vmul.f32 %v8632_v48, %v4839_v47  ;;  %v5148_v8 = vsel %vm1518_vm1, %v4972_v9, 0.0 }
 0x3bf   : > { %v4424_v56 = vadd.f32 %v6898_v52, %v8622_v30  ;;  %v4415_v35 = vpop.f32.mrb[157].mxu1  ;;  %v5157_v53 = vsel %vm1518_vm1, %v4975_v7, 0.0 }
 0x3c0   : > { %v4416_v55 = vadd.f32 %v8622_v30, %v4415_v35  ;;  %v6899_v63 = vpop.f32.mrb[158].mxu1  ;;  %v5151_v27 = vsel %vm1518_vm1, %v4973_v33, 0.0 }
 0x3c1   : > { %v4844_v28 = vmax.f32 %v4424_v56, 0.0  ;;  %v4427_v21 = vadd.f32 %v6899_v63, %v8622_v30  ;;  %v4418_v0 = vpop.f32.mrb[159].mxu1 }
 0x3c2   : > { %v4842_v44 = vmax.f32 %v4416_v55, 0.0  ;;  %v4419_v57 = vadd.f32 %v8622_v30, %v4418_v0  ;;  %5149 = vadd.xlane.f32.xlu1 %v5148_v8  ;;  %5158 = vadd.xlane.f32.xlu0 %v5157_v53 }
 0x3c3   : > { %v4978_v5 = vmul.f32 %v8632_v48, %v4844_v28  ;;  %v4845_v37 = vmax.f32 %v4427_v21, 0.0 }
 0x3c4   : > { %v4843_v41 = vmax.f32 %v4419_v57, 0.0  ;;  %v4976_v1 = vmul.f32 %v8632_v48, %v4842_v44 }
 0x3c5   : > { %v4979_v14 = vmul.f32 %v8632_v48, %v4845_v37  ;;  %v5166_v60 = vsel %vm1518_vm1, %v4978_v5, 0.0 }
 0x3c6   : > { %v6902_v24 = vpop.f32.mrb[160].mxu1  ;;  %5167 = vadd.xlane.f32.xlu1 %v5166_v60  ;;  %5152 = vadd.xlane.f32.xlu0 %v5151_v27  ;;  %v4977_v20 = vmul.f32 %v8632_v48, %v4843_v41  ;;  %v5160_v23 = vsel %vm1518_vm1, %v4976_v1, 0.0 }
 0x3c7   : > { %v4440_v4 = vadd.f32 %v6902_v24, %v8622_v30  ;;  %v4431_v31 = vpop.f32.mrb[161].mxu1  ;;  %v5169_v32 = vsel %vm1518_vm1, %v4979_v14, 0.0 }
 0x3c8   : > { %v4432_v18 = vadd.f32 %v8622_v30, %v4431_v31  ;;  %v6903_v36 = vpop.f32.mrb[162].mxu1  ;;  %v5163_v58 = vsel %vm1518_vm1, %v4977_v20, 0.0 }
 0x3c9   : > { %v4848_v43 = vmax.f32 %v4440_v4, 0.0  ;;  %v4443_v13 = vadd.f32 %v6903_v36, %v8622_v30  ;;  %v4434_v26 = vpop.f32.mrb[163].mxu1 }
 0x3ca   : > { %v4846_v59 = vmax.f32 %v4432_v18, 0.0  ;;  %v4435_v46 = vadd.f32 %v8622_v30, %v4434_v26  ;;  %5161 = vadd.xlane.f32.xlu1 %v5160_v23  ;;  %5170 = vadd.xlane.f32.xlu0 %v5169_v32 }
 0x3cb   : > { %v4982_v17 = vmul.f32 %v8632_v48, %v4848_v43  ;;  %v4849_v62 = vmax.f32 %v4443_v13, 0.0 }
 0x3cc   : > { %v4847_v10 = vmax.f32 %v4435_v46, 0.0  ;;  %v4980_v3 = vmul.f32 %v8632_v48, %v4846_v59 }
 0x3cd   : > { %v4983_v19 = vmul.f32 %v8632_v48, %v4849_v62  ;;  %v5178_v40 = vsel %vm1518_vm1, %v4982_v17, 0.0 }
 0x3ce   : > { %v6906_v45 = vpop.f32.mrb[164].mxu1  ;;  %5179 = vadd.xlane.f32.xlu1 %v5178_v40  ;;  %5164 = vadd.xlane.f32.xlu0 %v5163_v58  ;;  %v4981_v38 = vmul.f32 %v8632_v48, %v4847_v10  ;;  %v5172_v15 = vsel %vm1518_vm1, %v4980_v3, 0.0 }
 0x3cf   : > { %v4456_v61 = vadd.f32 %v6906_v45, %v8622_v30  ;;  %v4447_v22 = vpop.f32.mrb[165].mxu1  ;;  %v5181_v39 = vsel %vm1518_vm1, %v4983_v19, 0.0 }
 0x3d0   : > { %v4448_v49 = vadd.f32 %v8622_v30, %v4447_v22  ;;  %v6907_v12 = vpop.f32.mrb[166].mxu1  ;;  %v5175_v7 = vsel %vm1518_vm1, %v4981_v38, 0.0 }
 0x3d1   : > { %v4852_v29 = vmax.f32 %v4456_v61, 0.0  ;;  %v4459_v50 = vadd.f32 %v6907_v12, %v8622_v30  ;;  %v4450_v25 = vpop.f32.mrb[167].mxu1 }
 0x3d2   : > { %v4850_v42 = vmax.f32 %v4448_v49, 0.0  ;;  %v4451_v6 = vadd.f32 %v8622_v30, %v4450_v25  ;;  %5173 = vadd.xlane.f32.xlu1 %v5172_v15  ;;  %5182 = vadd.xlane.f32.xlu0 %v5181_v39 }
 0x3d3   : > { %v4986_v16 = vmul.f32 %v8632_v48, %v4852_v29  ;;  %v4853_v51 = vmax.f32 %v4459_v50, 0.0 }
 0x3d4   : > { %v4851_v34 = vmax.f32 %v4451_v6, 0.0  ;;  %v4984_v11 = vmul.f32 %v8632_v48, %v4850_v42 }
 0x3d5   : > { %v4987_v47 = vmul.f32 %v8632_v48, %v4853_v51  ;;  %v5190_v9 = vsel %vm1518_vm1, %v4986_v16, 0.0 }
 0x3d6   : > { %v6910_v54 = vpop.f32.mrb[168].mxu1  ;;  %5191 = vadd.xlane.f32.xlu1 %v5190_v9  ;;  %5176 = vadd.xlane.f32.xlu0 %v5175_v7  ;;  %v4985_v56 = vmul.f32 %v8632_v48, %v4851_v34  ;;  %v5184_v21 = vsel %vm1518_vm1, %v4984_v11, 0.0 }
 0x3d7   : > { %v4472_v2 = vadd.f32 %v6910_v54, %v8622_v30  ;;  %v4463_v52 = vpop.f32.mrb[169].mxu1  ;;  %v5193_v0 = vsel %vm1518_vm1, %v4987_v47, 0.0 }
 0x3d8   : > { %v4464_v35 = vadd.f32 %v8622_v30, %v4463_v52  ;;  %v6911_v33 = vpop.f32.mrb[170].mxu1  ;;  %v5187_v14 = vsel %vm1518_vm1, %v4985_v56, 0.0 }
 0x3d9   : > { %v4856_v55 = vmax.f32 %v4472_v2, 0.0  ;;  %v4475_v63 = vadd.f32 %v6911_v33, %v8622_v30  ;;  %v4466_v28 = vpop.f32.mrb[171].mxu1 }
 0x3da   : > { %v4854_v8 = vmax.f32 %v4464_v35, 0.0  ;;  %v4467_v53 = vadd.f32 %v8622_v30, %v4466_v28  ;;  %5185 = vadd.xlane.f32.xlu1 %v5184_v21  ;;  %5194 = vadd.xlane.f32.xlu0 %v5193_v0 }
 0x3db   : > { %v4990_v44 = vmul.f32 %v8632_v48, %v4856_v55  ;;  %v4857_v57 = vmax.f32 %v4475_v63, 0.0 }
 0x3dc   : > { %v4855_v5 = vmax.f32 %v4467_v53, 0.0  ;;  %v4988_v37 = vmul.f32 %v8632_v48, %v4854_v8 }
 0x3dd   : > { %v4991_v41 = vmul.f32 %v8632_v48, %v4857_v57  ;;  %v5202_v1 = vsel %vm1518_vm1, %v4990_v44, 0.0 }
 0x3de   : > { %v6914_v60 = vpop.f32.mrb[172].mxu1  ;;  %5203 = vadd.xlane.f32.xlu1 %v5202_v1  ;;  %5188 = vadd.xlane.f32.xlu0 %v5187_v14  ;;  %v4989_v4 = vmul.f32 %v8632_v48, %v4855_v5  ;;  %v5196_v13 = vsel %vm1518_vm1, %v4988_v37, 0.0 }
 0x3df   : > { %v4488_v27 = vadd.f32 %v6914_v60, %v8622_v30  ;;  %v4479_v24 = vpop.f32.mrb[173].mxu1  ;;  %v5205_v26 = vsel %vm1518_vm1, %v4991_v41, 0.0 }
 0x3e0   : > { %v4480_v31 = vadd.f32 %v8622_v30, %v4479_v24  ;;  %v6915_v20 = vpop.f32.mrb[174].mxu1  ;;  %v5199_v19 = vsel %vm1518_vm1, %v4989_v4, 0.0 }
 0x3e1   : > { %v4860_v18 = vmax.f32 %v4488_v27, 0.0  ;;  %v4491_v36 = vadd.f32 %v6915_v20, %v8622_v30  ;;  %v4482_v43 = vpop.f32.mrb[175].mxu1 }
 0x3e2   : > { %v4858_v23 = vmax.f32 %v4480_v31, 0.0  ;;  %v4483_v32 = vadd.f32 %v8622_v30, %v4482_v43  ;;  %5197 = vadd.xlane.f32.xlu1 %v5196_v13  ;;  %5206 = vadd.xlane.f32.xlu0 %v5205_v26 }
 0x3e3   : > { %v4994_v59 = vmul.f32 %v8632_v48, %v4860_v18  ;;  %v4861_v46 = vmax.f32 %v4491_v36, 0.0 }
 0x3e4   : > { %v4859_v17 = vmax.f32 %v4483_v32, 0.0  ;;  %v4992_v62 = vmul.f32 %v8632_v48, %v4858_v23 }
 0x3e5   : > { %v4995_v10 = vmul.f32 %v8632_v48, %v4861_v46  ;;  %v5214_v3 = vsel %vm1518_vm1, %v4994_v59, 0.0 }
 0x3e6   : > { %v6918_v40 = vpop.f32.mrb[176].mxu1  ;;  %5215 = vadd.xlane.f32.xlu1 %v5214_v3  ;;  %5200 = vadd.xlane.f32.xlu0 %v5199_v19  ;;  %v4993_v61 = vmul.f32 %v8632_v48, %v4859_v17  ;;  %v5208_v50 = vsel %vm1518_vm1, %v4992_v62, 0.0 }
 0x3e7   : > { %v4504_v58 = vadd.f32 %v6918_v40, %v8622_v30  ;;  %v4495_v45 = vpop.f32.mrb[177].mxu1  ;;  %v5217_v25 = vsel %vm1518_vm1, %v4995_v10, 0.0 }
 0x3e8   : > { %v4496_v22 = vadd.f32 %v8622_v30, %v4495_v45  ;;  %v6919_v38 = vpop.f32.mrb[178].mxu1  ;;  %v5211_v47 = vsel %vm1518_vm1, %v4993_v61, 0.0 }
 0x3e9   : > { %v4864_v49 = vmax.f32 %v4504_v58, 0.0  ;;  %v4507_v12 = vadd.f32 %v6919_v38, %v8622_v30  ;;  %v4498_v29 = vpop.f32.mrb[179].mxu1 }
 0x3ea   : > { %v4862_v15 = vmax.f32 %v4496_v22, 0.0  ;;  %v4499_v39 = vadd.f32 %v8622_v30, %v4498_v29  ;;  %5209 = vadd.xlane.f32.xlu1 %v5208_v50  ;;  %5218 = vadd.xlane.f32.xlu0 %v5217_v25 }
 0x3eb   : > { %v4998_v42 = vmul.f32 %v8632_v48, %v4864_v49  ;;  %v4865_v6 = vmax.f32 %v4507_v12, 0.0 }
 0x3ec   : > { %v4863_v16 = vmax.f32 %v4499_v39, 0.0  ;;  %v4996_v51 = vmul.f32 %v8632_v48, %v4862_v15 }
 0x3ed   : > { %v4999_v34 = vmul.f32 %v8632_v48, %v4865_v6  ;;  %v5226_v11 = vsel %vm1518_vm1, %v4998_v42, 0.0 }
 0x3ee   : > { %v6922_v9 = vpop.f32.mrb[180].mxu1  ;;  %5227 = vadd.xlane.f32.xlu1 %v5226_v11  ;;  %5212 = vadd.xlane.f32.xlu0 %v5211_v47  ;;  %v4997_v2 = vmul.f32 %v8632_v48, %v4863_v16  ;;  %v5220_v63 = vsel %vm1518_vm1, %v4996_v51, 0.0 }
 0x3ef   : > { %v4520_v7 = vadd.f32 %v6922_v9, %v8622_v30  ;;  %v4511_v54 = vpop.f32.mrb[181].mxu1  ;;  %v5229_v28 = vsel %vm1518_vm1, %v4999_v34, 0.0 }
 0x3f0   : > { %v4512_v52 = vadd.f32 %v8622_v30, %v4511_v54  ;;  %v6923_v56 = vpop.f32.mrb[182].mxu1  ;;  %v5223_v41 = vsel %vm1518_vm1, %v4997_v2, 0.0 }
 0x3f1   : > { %v4868_v35 = vmax.f32 %v4520_v7, 0.0  ;;  %v4523_v33 = vadd.f32 %v6923_v56, %v8622_v30  ;;  %v4514_v55 = vpop.f32.mrb[183].mxu1 }
 0x3f2   : > { %v4866_v21 = vmax.f32 %v4512_v52, 0.0  ;;  %v4515_v0 = vadd.f32 %v8622_v30, %v4514_v55  ;;  %5221 = vadd.xlane.f32.xlu1 %v5220_v63  ;;  %5230 = vadd.xlane.f32.xlu0 %v5229_v28 }
 0x3f3   : > { %v5002_v8 = vmul.f32 %v8632_v48, %v4868_v35  ;;  %v4869_v53 = vmax.f32 %v4523_v33, 0.0 }
 0x3f4   : > { %v4867_v44 = vmax.f32 %v4515_v0, 0.0  ;;  %v5000_v57 = vmul.f32 %v8632_v48, %v4866_v21 }
 0x3f5   : > { %v5003_v5 = vmul.f32 %v8632_v48, %v4869_v53  ;;  %v5238_v37 = vsel %vm1518_vm1, %v5002_v8, 0.0 }
 0x3f6   : > { %v6926_v1 = vpop.f32.mrb[184].mxu1  ;;  %5239 = vadd.xlane.f32.xlu1 %v5238_v37  ;;  %5224 = vadd.xlane.f32.xlu0 %v5223_v41  ;;  %v5001_v27 = vmul.f32 %v8632_v48, %v4867_v44  ;;  %v5232_v36 = vsel %vm1518_vm1, %v5000_v57, 0.0 }
 0x3f7   : > { %v4536_v14 = vadd.f32 %v6926_v1, %v8622_v30  ;;  %v4527_v60 = vpop.f32.mrb[185].mxu1  ;;  %v5241_v43 = vsel %vm1518_vm1, %v5003_v5, 0.0 }
 0x3f8   : > { %v4528_v24 = vadd.f32 %v8622_v30, %v4527_v60  ;;  %v6927_v4 = vpop.f32.mrb[186].mxu1  ;;  %v5235_v10 = vsel %vm1518_vm1, %v5001_v27, 0.0 }
 0x3f9   : > { %v4872_v31 = vmax.f32 %v4536_v14, 0.0  ;;  %v4539_v20 = vadd.f32 %v6927_v4, %v8622_v30  ;;  %v4530_v18 = vpop.f32.mrb[187].mxu1 }
 0x3fa   : > { %v4870_v13 = vmax.f32 %v4528_v24, 0.0  ;;  %v4531_v26 = vadd.f32 %v8622_v30, %v4530_v18  ;;  %5233 = vadd.xlane.f32.xlu1 %v5232_v36  ;;  %5242 = vadd.xlane.f32.xlu0 %v5241_v43 }
 0x3fb   : > { %v5006_v23 = vmul.f32 %v8632_v48, %v4872_v31  ;;  %v4873_v32 = vmax.f32 %v4539_v20, 0.0 }
 0x3fc   : > { %v4871_v59 = vmax.f32 %v4531_v26, 0.0  ;;  %v5004_v46 = vmul.f32 %v8632_v48, %v4870_v13 }
 0x3fd   : > { %v5007_v17 = vmul.f32 %v8632_v48, %v4873_v32  ;;  %v5250_v62 = vsel %vm1518_vm1, %v5006_v23, 0.0 }
 0x3fe   : > { %v6930_v3 = vpop.f32.mrb[188].mxu1  ;;  %5251 = vadd.xlane.f32.xlu1 %v5250_v62  ;;  %5236 = vadd.xlane.f32.xlu0 %v5235_v10  ;;  %v5005_v58 = vmul.f32 %v8632_v48, %v4871_v59  ;;  %v5244_v12 = vsel %vm1518_vm1, %v5004_v46, 0.0 }
 0x3ff   : > { %v4552_v19 = vadd.f32 %v6930_v3, %v8622_v30  ;;  %v4543_v40 = vpop.f32.mrb[189].mxu1  ;;  %v5253_v29 = vsel %vm1518_vm1, %v5007_v17, 0.0 }
 0x400   : > { %v4544_v45 = vadd.f32 %v8622_v30, %v4543_v40  ;;  %v6931_v61 = vpop.f32.mrb[190].mxu1  ;;  %v5247_v34 = vsel %vm1518_vm1, %v5005_v58, 0.0 }
 0x401   : > { %v4876_v22 = vmax.f32 %v4552_v19, 0.0  ;;  %v4555_v38 = vadd.f32 %v6931_v61, %v8622_v30  ;;  %v4546_v49 = vpop.f32.mrb[191].mxu1  ;;  %v8901_v19 = vld [vmem:[%s9482_s3 + $0x4] ss:$0 sm:$0xff] }
 0x402   : > { %v4874_v50 = vmax.f32 %v4544_v45, 0.0  ;;  %v4547_v25 = vadd.f32 %v8622_v30, %v4546_v49  ;;  %5245 = vadd.xlane.f32.xlu1 %v5244_v12  ;;  %5254 = vadd.xlane.f32.xlu0 %v5253_v29  ;;  %v8911_v12 = vld [vmem:[%s9482_s3 + $0x5] ss:$0 sm:$0xff] }
 0x403   : > { %v5010_v15 = vmul.f32 %v8632_v48, %v4876_v22  ;;  %v4877_v39 = vmax.f32 %v4555_v38, 0.0 }
 0x404   : > { %v4875_v42 = vmax.f32 %v4547_v25, 0.0  ;;  %v5008_v6 = vmul.f32 %v8632_v48, %v4874_v50 }
 0x405   : > { %v5011_v16 = vmul.f32 %v8632_v48, %v4877_v39  ;;  %v5262_v51 = vsel %vm1518_vm1, %v5010_v15, 0.0 }
 0x406   : > { %v6934_v11 = vpop.f32.mrb[192].mxu1  ;;  %5263 = vadd.xlane.f32.xlu1 %v5262_v51  ;;  %5248 = vadd.xlane.f32.xlu0 %v5247_v34  ;;  %v5009_v7 = vmul.f32 %v8632_v48, %v4875_v42  ;;  %v5256_v33 = vsel %vm1518_vm1, %v5008_v6, 0.0 }
 0x407   : > { %v4568_v47 = vadd.f32 %v6934_v11, %v8622_v30  ;;  %v4559_v9 = vpop.f32.mrb[193].mxu1  ;;  %v5265_v55 = vsel %vm1518_vm1, %v5011_v16, 0.0 }
 0x408   : > { %v4560_v54 = vadd.f32 %v8622_v30, %v4559_v9  ;;  %v6935_v2 = vpop.f32.mrb[194].mxu1  ;;  %v5259_v5 = vsel %vm1518_vm1, %v5009_v7, 0.0 }
 0x409   : > { %v4880_v52 = vmax.f32 %v4568_v47, 0.0  ;;  %v4571_v56 = vadd.f32 %v6935_v2, %v8622_v30  ;;  %v4562_v35 = vpop.f32.mrb[195].mxu1 }
 0x40a   : > { %v4878_v63 = vmax.f32 %v4560_v54, 0.0  ;;  %v4563_v28 = vadd.f32 %v8622_v30, %v4562_v35  ;;  %5257 = vadd.xlane.f32.xlu1 %v5256_v33  ;;  %5266 = vadd.xlane.f32.xlu0 %v5265_v55 }
 0x40b   : > { %v5014_v21 = vmul.f32 %v8632_v48, %v4880_v52  ;;  %v4881_v0 = vmax.f32 %v4571_v56, 0.0 }
 0x40c   : > { %v4879_v8 = vmax.f32 %v4563_v28, 0.0  ;;  %v5012_v53 = vmul.f32 %v8632_v48, %v4878_v63 }
 0x40d   : > { %v5015_v44 = vmul.f32 %v8632_v48, %v4881_v0  ;;  %v5274_v57 = vsel %vm1518_vm1, %v5014_v21, 0.0 }
 0x40e   : > { %v6938_v37 = vpop.f32.mrb[196].mxu1  ;;  %5275 = vadd.xlane.f32.xlu1 %v5274_v57  ;;  %5260 = vadd.xlane.f32.xlu0 %v5259_v5  ;;  %v5013_v14 = vmul.f32 %v8632_v48, %v4879_v8  ;;  %v5268_v20 = vsel %vm1518_vm1, %v5012_v53, 0.0 }
 0x40f   : > { %v4584_v41 = vadd.f32 %v6938_v37, %v8622_v30  ;;  %v4575_v1 = vpop.f32.mrb[197].mxu1  ;;  %v5277_v18 = vsel %vm1518_vm1, %v5015_v44, 0.0 }
 0x410   : > { %v4576_v60 = vadd.f32 %v8622_v30, %v4575_v1  ;;  %v6939_v27 = vpop.f32.mrb[198].mxu1  ;;  %v5271_v17 = vsel %vm1518_vm1, %v5013_v14, 0.0 }
 0x411   : > { %v4884_v24 = vmax.f32 %v4584_v41, 0.0  ;;  %v4587_v4 = vadd.f32 %v6939_v27, %v8622_v30  ;;  %v4578_v31 = vpop.f32.mrb[199].mxu1 }
 0x412   : > { %v4882_v36 = vmax.f32 %v4576_v60, 0.0  ;;  %v4579_v43 = vadd.f32 %v8622_v30, %v4578_v31  ;;  %5269 = vadd.xlane.f32.xlu1 %v5268_v20  ;;  %5278 = vadd.xlane.f32.xlu0 %v5277_v18  ;;  %v8895_v30 = vld [vmem:[%s9482_s3 + $0x3] ss:$0 sm:$0xff] }
 0x413   : > { %v5018_v13 = vmul.f32 %v8632_v48, %v4884_v24  ;;  %v4885_v26 = vmax.f32 %v4587_v4, 0.0 }
 0x414   : > { %v4883_v23 = vmax.f32 %v4579_v43, 0.0  ;;  %v5016_v32 = vmul.f32 %v8632_v48, %v4882_v36 }
 0x415   : > { %v5019_v59 = vmul.f32 %v8632_v48, %v4885_v26  ;;  %v5286_v46 = vsel %vm1518_vm1, %v5018_v13, 0.0 }
 0x416   : > { %v6942_v62 = vpop.f32.mrb[200].mxu1  ;;  %5287 = vadd.xlane.f32.xlu1 %v5286_v46  ;;  %5272 = vadd.xlane.f32.xlu0 %v5271_v17  ;;  %v5017_v48 = vmul.f32 %v8901_v19, %v4883_v23  ;;  %v5280_v38 = vsel %vm1518_vm1, %v5016_v32, 0.0 }
 0x417   : > { %v4600_v10 = vadd.f32 %v8895_v30, %v6942_v62  ;;  %v4591_v3 = vpop.f32.mrb[201].mxu1  ;;  %v5289_v49 = vsel %vm1518_vm1, %v5019_v59, 0.0 }
 0x418   : > { %v4592_v40 = vadd.f32 %v8895_v30, %v4591_v3  ;;  %v6943_v58 = vpop.f32.mrb[202].mxu1  ;;  %v5283_v11 = vsel %vm1518_vm1, %v5017_v48, 0.0 }
 0x419   : > { %v4888_v45 = vmax.f32 %v4600_v10, 0.0  ;;  %v4603_v61 = vadd.f32 %v8895_v30, %v6943_v58  ;;  %v4594_v22 = vpop.f32.mrb[203].mxu1 }
 0x41a   : > { %v4886_v29 = vmax.f32 %v4592_v40, 0.0  ;;  %v4595_v50 = vadd.f32 %v8895_v30, %v4594_v22  ;;  %5281 = vadd.xlane.f32.xlu1 %v5280_v38  ;;  %5290 = vadd.xlane.f32.xlu0 %v5289_v49 }
 0x41b   : > { %v5022_v25 = vmul.f32 %v8901_v19, %v4888_v45  ;;  %v4889_v15 = vmax.f32 %v4603_v61, 0.0  ;;  %v5084_v39 = vpop.xlane.xlu0 %5083 }
 0x41c   : > { %v5020_v42 = vmul.f32 %v8901_v19, %v4886_v29  ;;  %v4887_v6 = vmax.f32 %v4595_v50, 0.0  ;;  %v5468_v16 = vadd.f32 %v8911_v12, %v5084_v39 }
 0x41d   : > { %v5023_v51 = vmul.f32 %v8901_v19, %v4889_v15  ;;  %v5298_v34 = vsel %vm1518_vm1, %v5022_v25, 0.0 }
 0x41e   : > { %7017 = vtanh.f32 %v5468_v16  ;;  %v6946_v47 = vpop.f32.mrb[204].mxu1  ;;  %5299 = vadd.xlane.f32.xlu1 %v5298_v34  ;;  %v5081_v9 = vpop.xlane.xlu1 %5080  ;;  %5284 = vadd.xlane.f32.xlu0 %v5283_v11  ;;  %v5021_v56 = vmul.f32 %v8901_v19, %v4887_v6  ;;  %v5292_v63 = vsel %vm1518_vm1, %v5020_v42, 0.0 }
 0x41f   : > { %v4616_v7 = vadd.f32 %v8895_v30, %v6946_v47  ;;  %v5467_v54 = vadd.f32 %v8911_v12, %v5081_v9  ;;  %v4607_v2 = vpop.f32.mrb[205].mxu1  ;;  %v5078_v52 = vpop.xlane.xlu0 %5077  ;;  %v5301_v8 = vsel %vm1518_vm1, %v5023_v51, 0.0 }
 0x420   : > { %v4608_v35 = vadd.f32 %v8895_v30, %v4607_v2  ;;  %v5466_v33 = vadd.f32 %v8911_v12, %v5078_v52  ;;  %v6947_v55 = vpop.f32.mrb[206].mxu1  ;;  %v5295_v31 = vsel %vm1518_vm1, %v5021_v56, 0.0 }
 0x421   : > { %v4892_v28 = vmax.f32 %v4616_v7, 0.0  ;;  %7019 = vtanh.f32 %v5467_v54  ;;  %v4619_v21 = vadd.f32 %v8895_v30, %v6947_v55  ;;  %v4610_v0 = vpop.f32.mrb[207].mxu1 }
 0x422   : > { %v4890_v53 = vmax.f32 %v4608_v35, 0.0  ;;  %7021 = vtanh.f32 %v5466_v33  ;;  %v4611_v44 = vadd.f32 %v8895_v30, %v4610_v0  ;;  %5293 = vadd.xlane.f32.xlu1 %v5292_v63  ;;  %5302 = vadd.xlane.f32.xlu0 %v5301_v8 }
 0x423   : > { %v5026_v57 = vmul.f32 %v8901_v19, %v4892_v28  ;;  %v4893_v5 = vmax.f32 %v4619_v21, 0.0  ;;  %v5096_v37 = vpop.xlane.xlu1 %5095  ;;  %v5087_v41 = vpop.xlane.xlu0 %5086 }
 0x424   : > { %v5024_v1 = vmul.f32 %v8901_v19, %v4890_v53  ;;  %v4891_v14 = vmax.f32 %v4611_v44, 0.0  ;;  %v5472_v60 = vadd.f32 %v8911_v12, %v5096_v37  ;;  %v5469_v27 = vadd.f32 %v8911_v12, %v5087_v41 }
 0x425   : > { %v5027_v24 = vmul.f32 %v8901_v19, %v4893_v5  ;;  %v5310_v4 = vsel %vm1518_vm1, %v5026_v57, 0.0 }
 0x426   : > { %7023 = vtanh.f32 %v5472_v60  ;;  %v6950_v20 = vpop.f32.mrb[208].mxu1  ;;  %5311 = vadd.xlane.f32.xlu1 %v5310_v4  ;;  %5296 = vadd.xlane.f32.xlu0 %v5295_v31  ;;  %v5025_v26 = vmul.f32 %v8901_v19, %v4891_v14  ;;  %v5304_v17 = vsel %vm1518_vm1, %v5024_v1, 0.0 }
 0x427   : > { %7025 = vtanh.f32 %v5469_v27  ;;  %v4632_v18 = vadd.f32 %v8895_v30, %v6950_v20  ;;  %v4623_v36 = vpop.f32.mrb[209].mxu1  ;;  %v5090_v43 = vpop.xlane.xlu1 %5089  ;;  %v5313_v40 = vsel %vm1518_vm1, %v5027_v24, 0.0 }
 0x428   : > { %v7018_v13 = vpop.eup %7017  ;;  %v4624_v23 = vadd.f32 %v8895_v30, %v4623_v36  ;;  %v5470_v32 = vadd.f32 %v8911_v12, %v5090_v43  ;;  %v5099_v59 = vpop.xlane.xlu0 %5098  ;;  %v5307_v51 = vsel %vm1518_vm1, %v5025_v26, 0.0 }
 0x429   : > { %v6951_v46 = vpop.f32.mrb[210].mxu1  ;;  %5725 = vst.msk [vmem:[%s8941_s25 + $0x10] sm:$0xff] %vm5722_vm2, %v7018_v13  ;;  %v4896_v62 = vmax.f32 %v4632_v18, 0.0  ;;  %v5473_v10 = vadd.f32 %v8911_v12, %v5099_v59 }
 0x42a   : > { %v4635_v3 = vadd.f32 %v8895_v30, %v6951_v46  ;;  %v4626_v48 = vpop.f32.mrb[211].mxu1  ;;  %v4894_v58 = vmax.f32 %v4624_v23, 0.0  ;;  %7027 = vtanh.f32 %v5470_v32  ;;  %5305 = vadd.xlane.f32.xlu1 %v5304_v17  ;;  %5314 = vadd.xlane.f32.xlu0 %v5313_v40 }
 0x42b   : > { %v4627_v45 = vadd.f32 %v8895_v30, %v4626_v48  ;;  %v7020_v61 = vpop.eup %7019  ;;  %v5030_v22 = vmul.f32 %v8901_v19, %v4896_v62  ;;  %7029 = vtanh.f32 %v5473_v10  ;;  %v5108_v49 = vpop.xlane.xlu1 %5107 }
 0x42c   : > { %v4897_v38 = vmax.f32 %v4635_v3, 0.0  ;;  %v7022_v29 = vpop.eup %7021  ;;  %5724 = vst.msk [vmem:[%s8941_s25 + $0x8] sm:$0xff] %vm5722_vm2, %v7020_v61  ;;  %v5028_v50 = vmul.f32 %v8901_v19, %v4894_v58  ;;  %v5476_v15 = vadd.f32 %v8911_v12, %v5108_v49  ;;  %v5093_v39 = vpop.xlane.xlu0 %5092 }
 0x42d   : > { %v4895_v25 = vmax.f32 %v4627_v45, 0.0  ;;  %5723 = vst.msk [vmem:[%s8941_s25] sm:$0xff] %vm5722_vm2, %v7022_v29  ;;  %v5471_v6 = vadd.f32 %v8911_v12, %v5093_v39  ;;  %v5322_v16 = vsel %vm1518_vm1, %v5030_v22, 0.0 }
 0x42e   : > { %v5031_v42 = vmul.f32 %v8901_v19, %v4897_v38  ;;  %7031 = vtanh.f32 %v5476_v15  ;;  %v6954_v34 = vpop.f32.mrb[212].mxu1  ;;  %5323 = vadd.xlane.f32.xlu1 %v5322_v16  ;;  %5308 = vadd.xlane.f32.xlu0 %v5307_v51  ;;  %v5316_v33 = vsel %vm1518_vm1, %v5028_v50, 0.0 }
 0x42f   : > { %7033 = vtanh.f32 %v5471_v6  ;;  %v4648_v11 = vadd.f32 %v8895_v30, %v6954_v34  ;;  %v4639_v47 = vpop.f32.mrb[213].mxu1  ;;  %v5102_v9 = vpop.xlane.xlu1 %5101  ;;  %v5029_v54 = vmul.f32 %v8901_v19, %v4895_v25 }
 0x430   : > { %v7024_v7 = vpop.eup %7023  ;;  %v4640_v2 = vadd.f32 %v8895_v30, %v4639_v47  ;;  %v5474_v52 = vadd.f32 %v8911_v12, %v5102_v9  ;;  %v5111_v56 = vpop.xlane.xlu0 %5110  ;;  %v5325_v8 = vsel %vm1518_vm1, %v5031_v42, 0.0 }
 0x431   : > { %v6955_v35 = vpop.f32.mrb[214].mxu1  ;;  %v7026_v55 = vpop.eup %7025  ;;  %5729 = vst.msk [vmem:[%s8941_s25 + $0x30] sm:$0xff] %vm5722_vm2, %v7024_v7  ;;  %v4900_v63 = vmax.f32 %v4648_v11, 0.0  ;;  %v5477_v28 = vadd.f32 %v8911_v12, %v5111_v56  ;;  %v5319_v18 = vsel %vm1518_vm1, %v5029_v54, 0.0 }
 0x432   : > { %v4651_v21 = vadd.f32 %v8895_v30, %v6955_v35  ;;  %v4642_v0 = vpop.f32.mrb[215].mxu1  ;;  %5726 = vst.msk [vmem:[%s8941_s25 + $0x18] sm:$0xff] %vm5722_vm2, %v7026_v55  ;;  %v4898_v53 = vmax.f32 %v4640_v2, 0.0  ;;  %7035 = vtanh.f32 %v5474_v52  ;;  %5317 = vadd.xlane.f32.xlu1 %v5316_v33  ;;  %5326 = vadd.xlane.f32.xlu0 %v5325_v8 }
 0x433   : > { %v4643_v44 = vadd.f32 %v8895_v30, %v4642_v0  ;;  %v5034_v57 = vmul.f32 %v8901_v19, %v4900_v63  ;;  %7037 = vtanh.f32 %v5477_v28  ;;  %v5120_v37 = vpop.xlane.xlu1 %5119 }
 0x434   : > { %v4901_v5 = vmax.f32 %v4651_v21, 0.0  ;;  %v7028_v41 = vpop.eup %7027  ;;  %v5032_v1 = vmul.f32 %v8901_v19, %v4898_v53  ;;  %v5480_v60 = vadd.f32 %v8911_v12, %v5120_v37  ;;  %v5105_v27 = vpop.xlane.xlu0 %5104 }
 0x435   : > { %v4899_v14 = vmax.f32 %v4643_v44, 0.0  ;;  %v7030_v24 = vpop.eup %7029  ;;  %5727 = vst.msk [vmem:[%s8941_s25 + $0x20] sm:$0xff] %vm5722_vm2, %v7028_v41  ;;  %v5475_v31 = vadd.f32 %v8911_v12, %v5105_v27  ;;  %v5334_v20 = vsel %vm1518_vm1, %v5034_v57, 0.0 }
 0x436   : > { %v5035_v4 = vmul.f32 %v8901_v19, %v4901_v5  ;;  %5730 = vst.msk [vmem:[%s8941_s25 + $0x38] sm:$0xff] %vm5722_vm2, %v7030_v24  ;;  %7039 = vtanh.f32 %v5480_v60  ;;  %v6958_v36 = vpop.f32.mrb[216].mxu1  ;;  %5335 = vadd.xlane.f32.xlu1 %v5334_v20  ;;  %5320 = vadd.xlane.f32.xlu0 %v5319_v18  ;;  %v5328_v10 = vsel %vm1518_vm1, %v5032_v1, 0.0 }
 0x437   : > { %7041 = vtanh.f32 %v5475_v31  ;;  %v4664_v43 = vadd.f32 %v8895_v30, %v6958_v36  ;;  %v4655_v13 = vpop.f32.mrb[217].mxu1  ;;  %v5114_v26 = vpop.xlane.xlu1 %5113  ;;  %v5033_v32 = vmul.f32 %v8901_v19, %v4899_v14 }
 0x438   : > { %v7032_v23 = vpop.eup %7031  ;;  %v4656_v59 = vadd.f32 %v8895_v30, %v4655_v13  ;;  %v5478_v46 = vadd.f32 %v8911_v12, %v5114_v26  ;;  %v5123_v17 = vpop.xlane.xlu0 %5122  ;;  %v5337_v61 = vsel %vm1518_vm1, %v5035_v4, 0.0 }
 0x439   : > { %v6959_v62 = vpop.f32.mrb[218].mxu1  ;;  %v7034_v3 = vpop.eup %7033  ;;  %5733 = vst.msk [vmem:[%s8941_s25 + $0x50] sm:$0xff] %vm5722_vm2, %v7032_v23  ;;  %v4904_v48 = vmax.f32 %v4664_v43, 0.0  ;;  %v5481_v40 = vadd.f32 %v8911_v12, %v5123_v17  ;;  %v5331_v47 = vsel %vm1518_vm1, %v5033_v32, 0.0 }
 0x43a   : > { %v4667_v58 = vadd.f32 %v8895_v30, %v6959_v62  ;;  %v4658_v45 = vpop.f32.mrb[219].mxu1  ;;  %5728 = vst.msk [vmem:[%s8941_s25 + $0x28] sm:$0xff] %vm5722_vm2, %v7034_v3  ;;  %v4902_v22 = vmax.f32 %v4656_v59, 0.0  ;;  %7043 = vtanh.f32 %v5478_v46  ;;  %5329 = vadd.xlane.f32.xlu1 %v5328_v10  ;;  %5338 = vadd.xlane.f32.xlu0 %v5337_v61 }
 0x43b   : > { %v4659_v38 = vadd.f32 %v8895_v30, %v4658_v45  ;;  %v5038_v49 = vmul.f32 %v8901_v19, %v4904_v48  ;;  %7045 = vtanh.f32 %v5481_v40  ;;  %v5132_v50 = vpop.xlane.xlu1 %5131 }
 0x43c   : > { %v4905_v29 = vmax.f32 %v4667_v58, 0.0  ;;  %v7036_v25 = vpop.eup %7035  ;;  %v5036_v15 = vmul.f32 %v8901_v19, %v4902_v22  ;;  %v5484_v42 = vadd.f32 %v8911_v12, %v5132_v50  ;;  %v5117_v6 = vpop.xlane.xlu0 %5116 }
 0x43d   : > { %v4903_v39 = vmax.f32 %v4659_v38, 0.0  ;;  %v7038_v16 = vpop.eup %7037  ;;  %5731 = vst.msk [vmem:[%s8941_s25 + $0x40] sm:$0xff] %vm5722_vm2, %v7036_v25  ;;  %v5479_v34 = vadd.f32 %v8911_v12, %v5117_v6  ;;  %v5346_v11 = vsel %vm1518_vm1, %v5038_v49, 0.0 }
 0x43e   : > { %v5039_v51 = vmul.f32 %v8901_v19, %v4905_v29  ;;  %5734 = vst.msk [vmem:[%s8941_s25 + $0x58] sm:$0xff] %vm5722_vm2, %v7038_v16  ;;  %7047 = vtanh.f32 %v5484_v42  ;;  %v6962_v9 = vpop.f32.mrb[220].mxu1  ;;  %5347 = vadd.xlane.f32.xlu1 %v5346_v11  ;;  %5332 = vadd.xlane.f32.xlu0 %v5331_v47  ;;  %v5340_v28 = vsel %vm1518_vm1, %v5036_v15, 0.0 }
 0x43f   : > { %7049 = vtanh.f32 %v5479_v34  ;;  %v4680_v7 = vadd.f32 %v8895_v30, %v6962_v9  ;;  %v4671_v54 = vpop.f32.mrb[221].mxu1  ;;  %v5126_v2 = vpop.xlane.xlu1 %5125  ;;  %v5037_v56 = vmul.f32 %v8901_v19, %v4903_v39 }
 0x440   : > { %v7040_v52 = vpop.eup %7039  ;;  %v4672_v35 = vadd.f32 %v8895_v30, %v4671_v54  ;;  %v5482_v33 = vadd.f32 %v8911_v12, %v5126_v2  ;;  %v5135_v55 = vpop.xlane.xlu0 %5134  ;;  %v5349_v57 = vsel %vm1518_vm1, %v5039_v51, 0.0 }
 0x441   : > { %v6963_v63 = vpop.f32.mrb[222].mxu1  ;;  %v7042_v21 = vpop.eup %7041  ;;  %5737 = vst.msk [vmem:[%s8941_s25 + $0x70] sm:$0xff] %vm5722_vm2, %v7040_v52  ;;  %v4908_v0 = vmax.f32 %v4680_v7, 0.0  ;;  %v5485_v8 = vadd.f32 %v8911_v12, %v5135_v55  ;;  %v5343_v13 = vsel %vm1518_vm1, %v5037_v56, 0.0 }
 0x442   : > { %v4683_v53 = vadd.f32 %v8895_v30, %v6963_v63  ;;  %v4674_v44 = vpop.f32.mrb[223].mxu1  ;;  %5732 = vst.msk [vmem:[%s8941_s25 + $0x48] sm:$0xff] %vm5722_vm2, %v7042_v21  ;;  %v4906_v5 = vmax.f32 %v4672_v35, 0.0  ;;  %7051 = vtanh.f32 %v5482_v33  ;;  %5341 = vadd.xlane.f32.xlu1 %v5340_v28  ;;  %5350 = vadd.xlane.f32.xlu0 %v5349_v57 }
 0x443   : > { %v4675_v37 = vadd.f32 %v8895_v30, %v4674_v44  ;;  %v5042_v41 = vmul.f32 %v8901_v19, %v4908_v0  ;;  %7053 = vtanh.f32 %v5485_v8  ;;  %v5144_v14 = vpop.xlane.xlu1 %5143 }
 0x444   : > { %v4909_v1 = vmax.f32 %v4683_v53, 0.0  ;;  %v7044_v60 = vpop.eup %7043  ;;  %v5040_v27 = vmul.f32 %v8901_v19, %v4906_v5  ;;  %v5488_v4 = vadd.f32 %v8911_v12, %v5144_v14  ;;  %v5129_v31 = vpop.xlane.xlu0 %5128 }
 0x445   : > { %v4907_v24 = vmax.f32 %v4675_v37, 0.0  ;;  %v7046_v20 = vpop.eup %7045  ;;  %5735 = vst.msk [vmem:[%s8941_s25 + $0x60] sm:$0xff] %vm5722_vm2, %v7044_v60  ;;  %v5483_v36 = vadd.f32 %v8911_v12, %v5129_v31  ;;  %v5358_v43 = vsel %vm1518_vm1, %v5042_v41, 0.0 }
 0x446   : > { %v5043_v18 = vmul.f32 %v8901_v19, %v4909_v1  ;;  %5738 = vst.msk [vmem:[%s8941_s25 + $0x78] sm:$0xff] %vm5722_vm2, %v7046_v20  ;;  %7055 = vtanh.f32 %v5488_v4  ;;  %v6966_v26 = vpop.f32.mrb[224].mxu1  ;;  %5359 = vadd.xlane.f32.xlu1 %v5358_v43  ;;  %5344 = vadd.xlane.f32.xlu0 %v5343_v13  ;;  %v5352_v40 = vsel %vm1518_vm1, %v5040_v27, 0.0 }
 0x447   : > { %7057 = vtanh.f32 %v5483_v36  ;;  %v4696_v23 = vadd.f32 %v8895_v30, %v6966_v26  ;;  %v4687_v32 = vpop.f32.mrb[225].mxu1  ;;  %v5138_v59 = vpop.xlane.xlu1 %5137  ;;  %v5041_v17 = vmul.f32 %v8901_v19, %v4907_v24 }
 0x448   : > { %v7048_v46 = vpop.eup %7047  ;;  %v4688_v62 = vadd.f32 %v8895_v30, %v4687_v32  ;;  %v5486_v10 = vadd.f32 %v8911_v12, %v5138_v59  ;;  %v5147_v3 = vpop.xlane.xlu0 %5146  ;;  %v5361_v49 = vsel %vm1518_vm1, %v5043_v18, 0.0 }
 0x449   : > { %v6967_v48 = vpop.f32.mrb[226].mxu1  ;;  %v7050_v58 = vpop.eup %7049  ;;  %5741 = vst.msk [vmem:[%s8941_s25 + $0x90] sm:$0xff] %vm5722_vm2, %v7048_v46  ;;  %v4912_v45 = vmax.f32 %v4696_v23, 0.0  ;;  %v5489_v61 = vadd.f32 %v8911_v12, %v5147_v3  ;;  %v5355_v54 = vsel %vm1518_vm1, %v5041_v17, 0.0 }
 0x44a   : > { %v4699_v22 = vadd.f32 %v8895_v30, %v6967_v48  ;;  %v4690_v38 = vpop.f32.mrb[227].mxu1  ;;  %5736 = vst.msk [vmem:[%s8941_s25 + $0x68] sm:$0xff] %vm5722_vm2, %v7050_v58  ;;  %v4910_v29 = vmax.f32 %v4688_v62, 0.0  ;;  %7059 = vtanh.f32 %v5486_v10  ;;  %5353 = vadd.xlane.f32.xlu1 %v5352_v40  ;;  %5362 = vadd.xlane.f32.xlu0 %v5361_v49 }
 0x44b   : > { %v4691_v50 = vadd.f32 %v8895_v30, %v4690_v38  ;;  %v5046_v25 = vmul.f32 %v8901_v19, %v4912_v45  ;;  %7061 = vtanh.f32 %v5489_v61  ;;  %v5156_v39 = vpop.xlane.xlu1 %5155 }
 0x44c   : > { %v4913_v15 = vmax.f32 %v4699_v22, 0.0  ;;  %v7052_v42 = vpop.eup %7051  ;;  %v5044_v6 = vmul.f32 %v8901_v19, %v4910_v29  ;;  %v5492_v51 = vadd.f32 %v8911_v12, %v5156_v39  ;;  %v5141_v34 = vpop.xlane.xlu0 %5140 }
 0x44d   : > { %v4911_v16 = vmax.f32 %v4691_v50, 0.0  ;;  %v7054_v11 = vpop.eup %7053  ;;  %5739 = vst.msk [vmem:[%s8941_s25 + $0x80] sm:$0xff] %vm5722_vm2, %v7052_v42  ;;  %v5487_v9 = vadd.f32 %v8911_v12, %v5141_v34  ;;  %v5370_v7 = vsel %vm1518_vm1, %v5046_v25, 0.0 }
 0x44e   : > { %v5047_v47 = vmul.f32 %v8901_v19, %v4913_v15  ;;  %5742 = vst.msk [vmem:[%s8941_s25 + $0x98] sm:$0xff] %vm5722_vm2, %v7054_v11  ;;  %7063 = vtanh.f32 %v5492_v51  ;;  %v6970_v2 = vpop.f32.mrb[228].mxu1  ;;  %5371 = vadd.xlane.f32.xlu1 %v5370_v7  ;;  %5356 = vadd.xlane.f32.xlu0 %v5355_v54  ;;  %v5364_v8 = vsel %vm1518_vm1, %v5044_v6, 0.0 }
 0x44f   : > { %7065 = vtanh.f32 %v5487_v9  ;;  %v4712_v52 = vadd.f32 %v8895_v30, %v6970_v2  ;;  %v4703_v56 = vpop.f32.mrb[229].mxu1  ;;  %v5150_v35 = vpop.xlane.xlu1 %5149  ;;  %v5045_v55 = vmul.f32 %v8901_v19, %v4911_v16 }
 0x450   : > { %v7056_v33 = vpop.eup %7055  ;;  %v4704_v63 = vadd.f32 %v8895_v30, %v4703_v56  ;;  %v5490_v28 = vadd.f32 %v8911_v12, %v5150_v35  ;;  %v5159_v21 = vpop.xlane.xlu0 %5158  ;;  %v5373_v41 = vsel %vm1518_vm1, %v5047_v47, 0.0 }
 0x451   : > { %v6971_v0 = vpop.f32.mrb[230].mxu1  ;;  %v7058_v53 = vpop.eup %7057  ;;  %5745 = vst.msk [vmem:[%s8941_s25 + $0xb0] sm:$0xff] %vm5722_vm2, %v7056_v33  ;;  %v4916_v44 = vmax.f32 %v4712_v52, 0.0  ;;  %v5493_v57 = vadd.f32 %v8911_v12, %v5159_v21  ;;  %v5367_v32 = vsel %vm1518_vm1, %v5045_v55, 0.0 }
 0x452   : > { %v4715_v5 = vadd.f32 %v8895_v30, %v6971_v0  ;;  %v4706_v37 = vpop.f32.mrb[231].mxu1  ;;  %5740 = vst.msk [vmem:[%s8941_s25 + $0x88] sm:$0xff] %vm5722_vm2, %v7058_v53  ;;  %v4914_v1 = vmax.f32 %v4704_v63, 0.0  ;;  %7067 = vtanh.f32 %v5490_v28  ;;  %5365 = vadd.xlane.f32.xlu1 %v5364_v8  ;;  %5374 = vadd.xlane.f32.xlu0 %v5373_v41 }
 0x453   : > { %v4707_v14 = vadd.f32 %v8895_v30, %v4706_v37  ;;  %v5050_v60 = vmul.f32 %v8901_v19, %v4916_v44  ;;  %7069 = vtanh.f32 %v5493_v57  ;;  %v5168_v24 = vpop.xlane.xlu1 %5167 }
 0x454   : > { %v4917_v27 = vmax.f32 %v4715_v5, 0.0  ;;  %v7060_v4 = vpop.eup %7059  ;;  %v5048_v31 = vmul.f32 %v8901_v19, %v4914_v1  ;;  %v5496_v18 = vadd.f32 %v8911_v12, %v5168_v24  ;;  %v5153_v36 = vpop.xlane.xlu0 %5152 }
 0x455   : > { %v4915_v20 = vmax.f32 %v4707_v14, 0.0  ;;  %v7062_v43 = vpop.eup %7061  ;;  %5743 = vst.msk [vmem:[%s8941_s25 + $0xa0] sm:$0xff] %vm5722_vm2, %v7060_v4  ;;  %v5491_v26 = vadd.f32 %v8911_v12, %v5153_v36  ;;  %v5382_v23 = vsel %vm1518_vm1, %v5050_v60, 0.0 }
 0x456   : > { %v5051_v13 = vmul.f32 %v8901_v19, %v4917_v27  ;;  %5746 = vst.msk [vmem:[%s8941_s25 + $0xb8] sm:$0xff] %vm5722_vm2, %v7062_v43  ;;  %7071 = vtanh.f32 %v5496_v18  ;;  %v6974_v59 = vpop.f32.mrb[232].mxu1  ;;  %5383 = vadd.xlane.f32.xlu1 %v5382_v23  ;;  %5368 = vadd.xlane.f32.xlu0 %v5367_v32  ;;  %v5376_v61 = vsel %vm1518_vm1, %v5048_v31, 0.0 }
 0x457   : > { %7073 = vtanh.f32 %v5491_v26  ;;  %v4728_v46 = vadd.f32 %v8895_v30, %v6974_v59  ;;  %v4719_v17 = vpop.f32.mrb[233].mxu1  ;;  %v5162_v62 = vpop.xlane.xlu1 %5161  ;;  %v5049_v3 = vmul.f32 %v8901_v19, %v4915_v20 }
 0x458   : > { %v7064_v10 = vpop.eup %7063  ;;  %v4720_v48 = vadd.f32 %v8895_v30, %v4719_v17  ;;  %v5494_v40 = vadd.f32 %v8911_v12, %v5162_v62  ;;  %v5171_v58 = vpop.xlane.xlu0 %5170  ;;  %v5385_v25 = vsel %vm1518_vm1, %v5051_v13, 0.0 }
 0x459   : > { %v6975_v45 = vpop.f32.mrb[234].mxu1  ;;  %v7066_v22 = vpop.eup %7065  ;;  %5749 = vst.msk [vmem:[%s8941_s25 + $0xd0] sm:$0xff] %vm5722_vm2, %v7064_v10  ;;  %v4920_v38 = vmax.f32 %v4728_v46, 0.0  ;;  %v5497_v49 = vadd.f32 %v8911_v12, %v5171_v58  ;;  %v5379_v56 = vsel %vm1518_vm1, %v5049_v3, 0.0 }
 0x45a   : > { %v4731_v29 = vadd.f32 %v8895_v30, %v6975_v45  ;;  %v4722_v50 = vpop.f32.mrb[235].mxu1  ;;  %5744 = vst.msk [vmem:[%s8941_s25 + $0xa8] sm:$0xff] %vm5722_vm2, %v7066_v22  ;;  %v4918_v15 = vmax.f32 %v4720_v48, 0.0  ;;  %7075 = vtanh.f32 %v5494_v40  ;;  %5377 = vadd.xlane.f32.xlu1 %v5376_v61  ;;  %5386 = vadd.xlane.f32.xlu0 %v5385_v25 }
 0x45b   : > { %v4723_v39 = vadd.f32 %v8895_v30, %v4722_v50  ;;  %v5054_v42 = vmul.f32 %v8901_v19, %v4920_v38  ;;  %7077 = vtanh.f32 %v5497_v49  ;;  %v5180_v16 = vpop.xlane.xlu1 %5179 }
 0x45c   : > { %v4921_v6 = vmax.f32 %v4731_v29, 0.0  ;;  %v7068_v51 = vpop.eup %7067  ;;  %v5052_v34 = vmul.f32 %v8901_v19, %v4918_v15  ;;  %v5500_v47 = vadd.f32 %v8911_v12, %v5180_v16  ;;  %v5165_v9 = vpop.xlane.xlu0 %5164 }
 0x45d   : > { %v4919_v11 = vmax.f32 %v4723_v39, 0.0  ;;  %v7070_v7 = vpop.eup %7069  ;;  %5747 = vst.msk [vmem:[%s8941_s25 + $0xc0] sm:$0xff] %vm5722_vm2, %v7068_v51  ;;  %v5495_v2 = vadd.f32 %v8911_v12, %v5165_v9  ;;  %v5394_v52 = vsel %vm1518_vm1, %v5054_v42, 0.0 }
 0x45e   : > { %v5055_v54 = vmul.f32 %v8901_v19, %v4921_v6  ;;  %5750 = vst.msk [vmem:[%s8941_s25 + $0xd8] sm:$0xff] %vm5722_vm2, %v7070_v7  ;;  %7079 = vtanh.f32 %v5500_v47  ;;  %v6978_v35 = vpop.f32.mrb[236].mxu1  ;;  %5395 = vadd.xlane.f32.xlu1 %v5394_v52  ;;  %5380 = vadd.xlane.f32.xlu0 %v5379_v56  ;;  %v5388_v57 = vsel %vm1518_vm1, %v5052_v34, 0.0 }
 0x45f   : > { %7081 = vtanh.f32 %v5495_v2  ;;  %v4744_v33 = vadd.f32 %v8895_v30, %v6978_v35  ;;  %v4735_v55 = vpop.f32.mrb[237].mxu1  ;;  %v5174_v63 = vpop.xlane.xlu1 %5173  ;;  %v5053_v21 = vmul.f32 %v8901_v19, %v4919_v11 }
 0x460   : > { %v7072_v28 = vpop.eup %7071  ;;  %v4736_v0 = vadd.f32 %v8895_v30, %v4735_v55  ;;  %v5498_v8 = vadd.f32 %v8911_v12, %v5174_v63  ;;  %v5183_v53 = vpop.xlane.xlu0 %5182  ;;  %v5397_v60 = vsel %vm1518_vm1, %v5055_v54, 0.0 }
 0x461   : > { %v6979_v44 = vpop.f32.mrb[238].mxu1  ;;  %v7074_v5 = vpop.eup %7073  ;;  %5753 = vst.msk [vmem:[%s8941_s25 + $0xf0] sm:$0xff] %vm5722_vm2, %v7072_v28  ;;  %v4924_v37 = vmax.f32 %v4744_v33, 0.0  ;;  %v5501_v41 = vadd.f32 %v8911_v12, %v5183_v53  ;;  %v5391_v26 = vsel %vm1518_vm1, %v5053_v21, 0.0 }
 0x462   : > { %v4747_v1 = vadd.f32 %v8895_v30, %v6979_v44  ;;  %v4738_v14 = vpop.f32.mrb[239].mxu1  ;;  %5748 = vst.msk [vmem:[%s8941_s25 + $0xc8] sm:$0xff] %vm5722_vm2, %v7074_v5  ;;  %v4922_v27 = vmax.f32 %v4736_v0, 0.0  ;;  %7083 = vtanh.f32 %v5498_v8  ;;  %5389 = vadd.xlane.f32.xlu1 %v5388_v57  ;;  %5398 = vadd.xlane.f32.xlu0 %v5397_v60 }
 0x463   : > { %v4739_v24 = vadd.f32 %v8895_v30, %v4738_v14  ;;  %v5058_v4 = vmul.f32 %v8901_v19, %v4924_v37  ;;  %7085 = vtanh.f32 %v5501_v41  ;;  %v5192_v20 = vpop.xlane.xlu1 %5191 }
 0x464   : > { %v4925_v31 = vmax.f32 %v4747_v1, 0.0  ;;  %v7076_v18 = vpop.eup %7075  ;;  %v5504_v43 = vadd.f32 %v8911_v12, %v5192_v20  ;;  %v5177_v13 = vpop.xlane.xlu0 %5176  ;;  %v5056_v32 = vmul.f32 %v8901_v19, %v4922_v27 }
 0x465   : > { %v4923_v36 = vmax.f32 %v4739_v24, 0.0  ;;  %v7078_v23 = vpop.eup %7077  ;;  %5751 = vst.msk [vmem:[%s8941_s25 + $0xe0] sm:$0xff] %vm5722_vm2, %v7076_v18  ;;  %v5499_v46 = vadd.f32 %v8911_v12, %v5177_v13  ;;  %v5406_v17 = vsel %vm1518_vm1, %v5058_v4, 0.0 }
 0x466   : > { %v5059_v59 = vmul.f32 %v8901_v19, %v4925_v31  ;;  %5754 = vst.msk [vmem:[%s8941_s25 + $0xf8] sm:$0xff] %vm5722_vm2, %v7078_v23  ;;  %7087 = vtanh.f32 %v5504_v43  ;;  %5407 = vadd.xlane.f32.xlu1 %v5406_v17  ;;  %5392 = vadd.xlane.f32.xlu0 %v5391_v26  ;;  %v6982_v62 = vpop.f32.mrb[240].mxu1  ;;  %v5400_v50 = vsel %vm1518_vm1, %v5056_v32, 0.0 }
 0x467   : > { %7089 = vtanh.f32 %v5499_v46  ;;  %v5186_v10 = vpop.xlane.xlu1 %5185  ;;  %v5057_v48 = vmul.f32 %v8901_v19, %v4923_v36  ;;  %v4760_v40 = vadd.f32 %v8895_v30, %v6982_v62  ;;  %v4751_v58 = vpop.f32.mrb[241].mxu1 }
 0x468   : > { %v7080_v3 = vpop.eup %7079  ;;  %v5502_v45 = vadd.f32 %v8911_v12, %v5186_v10  ;;  %v5195_v61 = vpop.xlane.xlu0 %5194  ;;  %v4752_v38 = vadd.f32 %v8895_v30, %v4751_v58  ;;  %v5409_v25 = vsel %vm1518_vm1, %v5059_v59, 0.0 }
 0x469   : > { %v7082_v22 = vpop.eup %7081  ;;  %5757 = vst.msk [vmem:[%s8941_s25 + $0x110] sm:$0xff] %vm5722_vm2, %v7080_v3  ;;  %v5505_v49 = vadd.f32 %v8911_v12, %v5195_v61  ;;  %v6983_v29 = vpop.f32.mrb[242].mxu1  ;;  %v4928_v15 = vmax.f32 %v4760_v40, 0.0  ;;  %v5403_v56 = vsel %vm1518_vm1, %v5057_v48, 0.0 }
 0x46a   : > { %5752 = vst.msk [vmem:[%s8941_s25 + $0xe8] sm:$0xff] %vm5722_vm2, %v7082_v22  ;;  %7091 = vtanh.f32 %v5502_v45  ;;  %v4763_v39 = vadd.f32 %v8895_v30, %v6983_v29  ;;  %v4754_v42 = vpop.f32.mrb[243].mxu1  ;;  %5401 = vadd.xlane.f32.xlu1 %v5400_v50  ;;  %5410 = vadd.xlane.f32.xlu0 %v5409_v25  ;;  %v4926_v6 = vmax.f32 %v4752_v38, 0.0  ;;  %v7278_v50 = vld [vmem:[%s9482_s3 + $0x3] ss:$0 sm:$0xff] }
 0x46b   : > { %7093 = vtanh.f32 %v5505_v49  ;;  %v4755_v16 = vadd.f32 %v8895_v30, %v4754_v42  ;;  %v5204_v51 = vpop.xlane.xlu1 %5203  ;;  %v5062_v11 = vmul.f32 %v8901_v19, %v4928_v15 }
 0x46c   : > { %v7084_v34 = vpop.eup %7083  ;;  %v4929_v47 = vmax.f32 %v4763_v39, 0.0  ;;  %v5508_v9 = vadd.f32 %v8911_v12, %v5204_v51  ;;  %v5189_v7 = vpop.xlane.xlu0 %5188  ;;  %v5060_v35 = vmul.f32 %v8901_v19, %v4926_v6 }
 0x46d   : > { %v7086_v54 = vpop.eup %7085  ;;  %5755 = vst.msk [vmem:[%s8941_s25 + $0x100] sm:$0xff] %vm5722_vm2, %v7084_v34  ;;  %v4927_v2 = vmax.f32 %v4755_v16, 0.0  ;;  %v5503_v52 = vadd.f32 %v8911_v12, %v5189_v7  ;;  %v5418_v55 = vsel %vm1518_vm1, %v5062_v11, 0.0 }
 0x46e   : > { %5758 = vst.msk [vmem:[%s8941_s25 + $0x118] sm:$0xff] %vm5722_vm2, %v7086_v54  ;;  %v5063_v33 = vmul.f32 %v8901_v19, %v4929_v47  ;;  %7095 = vtanh.f32 %v5508_v9  ;;  %5404 = vadd.xlane.f32.xlu0 %v5403_v56  ;;  %5419 = vadd.xlane.f32.xlu1 %v5418_v55  ;;  %v5412_v4 = vsel %vm1518_vm1, %v5060_v35, 0.0  ;;  %v9197_v47 = vld [vmem:[%s9482_s3 + $0x4] ss:$0 sm:$0xff]  ;;  %v9203_v54 = vld [vmem:[%s9482_s3 + $0x5] ss:$0 sm:$0xff] }
 0x46f   : > { %7097 = vtanh.f32 %v5503_v52  ;;  %v6986_v63 = vpop.f32.mrb[244].mxu1  ;;  %v5198_v28 = vpop.xlane.xlu1 %5197  ;;  %v5061_v5 = vmul.f32 %v8901_v19, %v4927_v2 }
 0x470   : > { %v7088_v21 = vpop.eup %7087  ;;  %v4776_v0 = vadd.f32 %v8895_v30, %v6986_v63  ;;  %v4767_v8 = vpop.f32.mrb[245].mxu1  ;;  %v5506_v53 = vadd.f32 %v8911_v12, %v5198_v28  ;;  %v5421_v14 = vsel %vm1518_vm1, %v5063_v33, 0.0 }
 0x471   : > { %v5207_v44 = vpop.xlane.xlu0 %5206  ;;  %v7090_v57 = vpop.eup %7089  ;;  %5761 = vst.msk [vmem:[%s8941_s25 + $0x130] sm:$0xff] %vm5722_vm2, %v7088_v21  ;;  %v4768_v37 = vadd.f32 %v8895_v30, %v4767_v8  ;;  %v5415_v17 = vsel %vm1518_vm1, %v5061_v5, 0.0 }
 0x472   : > { %v5509_v41 = vadd.f32 %v8911_v12, %v5207_v44  ;;  %v6987_v1 = vpop.f32.mrb[246].mxu1  ;;  %5756 = vst.msk [vmem:[%s8941_s25 + $0x108] sm:$0xff] %vm5722_vm2, %v7090_v57  ;;  %v4932_v60 = vmax.f32 %v4776_v0, 0.0  ;;  %7099 = vtanh.f32 %v5506_v53  ;;  %5422 = vadd.xlane.f32.xlu0 %v5421_v14  ;;  %5413 = vadd.xlane.f32.xlu1 %v5412_v4 }
 0x473   : > { %v4779_v27 = vadd.f32 %v8895_v30, %v6987_v1  ;;  %v4770_v24 = vpop.f32.mrb[247].mxu1  ;;  %v4930_v31 = vmax.f32 %v4768_v37, 0.0  ;;  %v5216_v18 = vpop.xlane.xlu1 %5215 }
 0x474   : > { %7101 = vtanh.f32 %v5509_v41  ;;  %v4771_v20 = vadd.f32 %v8895_v30, %v4770_v24  ;;  %v7092_v36 = vpop.eup %7091  ;;  %v5066_v43 = vmul.f32 %v8901_v19, %v4932_v60  ;;  %v5512_v26 = vadd.f32 %v8911_v12, %v5216_v18 }
 0x475   : > { %v4933_v13 = vmax.f32 %v4779_v27, 0.0  ;;  %v5201_v23 = vpop.xlane.xlu0 %5200  ;;  %v7094_v32 = vpop.eup %7093  ;;  %5759 = vst.msk [vmem:[%s8941_s25 + $0x120] sm:$0xff] %vm5722_vm2, %v7092_v36  ;;  %v5064_v62 = vmul.f32 %v8901_v19, %v4930_v31 }
 0x476   : > { %v4931_v59 = vmax.f32 %v4771_v20, 0.0  ;;  %v5507_v46 = vadd.f32 %v8911_v12, %v5201_v23  ;;  %5762 = vst.msk [vmem:[%s8941_s25 + $0x138] sm:$0xff] %vm5722_vm2, %v7094_v32  ;;  %7103 = vtanh.f32 %v5512_v26  ;;  %v5430_v3 = vsel %vm1518_vm1, %v5066_v43, 0.0  ;;  %5416 = vadd.xlane.f32.xlu0 %v5415_v17 }
 0x477   : > { %v5067_v10 = vmul.f32 %v8901_v19, %v4933_v13  ;;  %v6990_v48 = vpop.f32.mrb[248].mxu1  ;;  %5431 = vadd.xlane.f32.xlu1 %v5430_v3  ;;  %v5210_v40 = vpop.xlane.xlu1 %5209  ;;  %v5424_v51 = vsel %vm1518_vm1, %v5064_v62, 0.0 }
 0x478   : > { %7105 = vtanh.f32 %v5507_v46  ;;  %v7096_v58 = vpop.eup %7095  ;;  %v4792_v45 = vadd.f32 %v8895_v30, %v6990_v48  ;;  %v4783_v61 = vpop.f32.mrb[249].mxu1  ;;  %v5510_v22 = vadd.f32 %v8911_v12, %v5210_v40  ;;  %v5065_v29 = vmul.f32 %v8901_v19, %v4931_v59 }
 0x479   : > { %v5219_v38 = vpop.xlane.xlu0 %5218  ;;  %v7098_v49 = vpop.eup %7097  ;;  %5765 = vst.msk [vmem:[%s8941_s25 + $0x150] sm:$0xff] %vm5722_vm2, %v7096_v58  ;;  %v4784_v25 = vadd.f32 %v7278_v50, %v4783_v61  ;;  %v5433_v42 = vsel %vm1518_vm1, %v5067_v10, 0.0 }
 0x47a   : > { %v5513_v15 = vadd.f32 %v8911_v12, %v5219_v38  ;;  %v6991_v39 = vpop.f32.mrb[250].mxu1  ;;  %5760 = vst.msk [vmem:[%s8941_s25 + $0x128] sm:$0xff] %vm5722_vm2, %v7098_v49  ;;  %v4936_v30 = vmax.f32 %v4792_v45, 0.0  ;;  %7107 = vtanh.f32 %v5510_v22  ;;  %5434 = vadd.xlane.f32.xlu0 %v5433_v42  ;;  %v5427_v55 = vsel %vm1518_vm1, %v5065_v29, 0.0 }
 0x47b   : > { %v4795_v6 = vadd.f32 %v7278_v50, %v6991_v39  ;;  %v4786_v16 = vpop.f32.mrb[251].mxu1  ;;  %v4934_v19 = vmax.f32 %v4784_v25, 0.0  ;;  %5425 = vadd.xlane.f32.xlu1 %v5424_v51  ;;  %v5228_v11 = vpop.xlane.xlu1 %5227 }
 0x47c   : > { %7109 = vtanh.f32 %v5513_v15  ;;  %v4787_v34 = vadd.f32 %v7278_v50, %v4786_v16  ;;  %v7100_v12 = vpop.eup %7099  ;;  %v5070_v9 = vmul.f32 %v9197_v47, %v4936_v30  ;;  %v5516_v2 = vadd.f32 %v9203_v54, %v5228_v11 }
 0x47d   : > { %v4937_v7 = vmax.f32 %v4795_v6, 0.0  ;;  %v5213_v52 = vpop.xlane.xlu0 %5212  ;;  %5763 = vst.msk [vmem:[%s8941_s25 + $0x140] sm:$0xff] %vm5722_vm2, %v7100_v12  ;;  %v5068_v63 = vmul.f32 %v9197_v47, %v4934_v19 }
 0x47e   : > { %v7102_v56 = vpop.eup %7101  ;;  %v4935_v35 = vmax.f32 %v4787_v34, 0.0  ;;  %v5511_v33 = vadd.f32 %v9203_v54, %v5213_v52  ;;  %7111 = vtanh.f32 %v5516_v2  ;;  %v5442_v21 = vsel %vm1518_vm1, %v5070_v9, 0.0  ;;  %5428 = vadd.xlane.f32.xlu0 %v5427_v55 }
 0x47f   : > { %5766 = vst.msk [vmem:[%s8941_s25 + $0x158] sm:$0xff] %vm5722_vm2, %v7102_v56  ;;  %v5071_v28 = vmul.f32 %v9197_v47, %v4937_v7  ;;  %5443 = vadd.xlane.f32.xlu1 %v5442_v21  ;;  %v6994_v0 = vpop.f32.mrb[252].mxu1  ;;  %v5222_v8 = vpop.xlane.xlu1 %5221  ;;  %v5436_v20 = vsel %vm1518_vm1, %v5068_v63, 0.0 }
 0x480   : > { %7113 = vtanh.f32 %v5511_v33  ;;  %v7104_v53 = vpop.eup %7103  ;;  %v5069_v44 = vmul.f32 %v9197_v47, %v4935_v35  ;;  %v4808_v57 = vadd.f32 %v7278_v50, %v6994_v0  ;;  %v5514_v5 = vadd.f32 %v9203_v54, %v5222_v8  ;;  %v4799_v41 = vpop.f32.mrb[253].mxu1 }
 0x481   : > { %v5231_v37 = vpop.xlane.xlu0 %5230  ;;  %5769 = vst.msk [vmem:[%s8941_s25 + $0x170] sm:$0xff] %vm5722_vm2, %v7104_v53  ;;  %v4800_v60 = vadd.f32 %v7278_v50, %v4799_v41  ;;  %v6995_v27 = vpop.f32.mrb[254].mxu1  ;;  %v5445_v24 = vsel %vm1518_vm1, %v5071_v28, 0.0 }
 0x482   : > { %v7106_v1 = vpop.eup %7105  ;;  %v5517_v14 = vadd.f32 %v9203_v54, %v5231_v37  ;;  %7115 = vtanh.f32 %v5514_v5  ;;  %v4811_v4 = vadd.f32 %v7278_v50, %v6995_v27  ;;  %v4802_v31 = vpop.f32.mrb[255].mxu1  ;;  %5446 = vadd.xlane.f32.xlu0 %v5445_v24  ;;  %v4940_v18 = vmax.f32 %v4808_v57, 0.0 }
 0x483   : > { %5764 = vst.msk [vmem:[%s8941_s25 + $0x148] sm:$0xff] %vm5722_vm2, %v7106_v1  ;;  %v4938_v36 = vmax.f32 %v4800_v60, 0.0  ;;  %v4803_v43 = vadd.f32 %v7278_v50, %v4802_v31  ;;  %5437 = vadd.xlane.f32.xlu1 %v5436_v20  ;;  %v5240_v13 = vpop.xlane.xlu1 %5239  ;;  %v5439_v59 = vsel %vm1518_vm1, %v5069_v44, 0.0 }
 0x484   : > { %7117 = vtanh.f32 %v5517_v14  ;;  %v7108_v26 = vpop.eup %7107  ;;  %v5520_v23 = vadd.f32 %v9203_v54, %v5240_v13  ;;  %v4941_v62 = vmax.f32 %v4811_v4, 0.0  ;;  %v5074_v48 = vmul.f32 %v9197_v47, %v4940_v18 }
 0x485   : > { %v5225_v32 = vpop.xlane.xlu0 %5224  ;;  %5767 = vst.msk [vmem:[%s8941_s25 + $0x160] sm:$0xff] %vm5722_vm2, %v7108_v26  ;;  %v5072_v17 = vmul.f32 %v9197_v47, %v4938_v36  ;;  %v4939_v10 = vmax.f32 %v4803_v43, 0.0 }
 0x486   : > { %v7110_v46 = vpop.eup %7109  ;;  %v5515_v3 = vadd.f32 %v9203_v54, %v5225_v32  ;;  %7119 = vtanh.f32 %v5520_v23  ;;  %5440 = vadd.xlane.f32.xlu0 %v5439_v59  ;;  %v5075_v29 = vmul.f32 %v9197_v47, %v4941_v62  ;;  %v5454_v39 = vsel %vm1518_vm1, %v5074_v48, 0.0 }
 0x487   : > { %5770 = vst.msk [vmem:[%s8941_s25 + $0x178] sm:$0xff] %vm5722_vm2, %v7110_v46  ;;  %v5073_v40 = vmul.f32 %v9197_v47, %v4939_v10  ;;  %v5234_v58 = vpop.xlane.xlu1 %5233  ;;  %v5448_v45 = vsel %vm1518_vm1, %v5072_v17, 0.0 }
 0x488   : > { %7121 = vtanh.f32 %v5515_v3  ;;  %v7112_v61 = vpop.eup %7111  ;;  %v5518_v22 = vadd.f32 %v9203_v54, %v5234_v58  ;;  %5449 = vadd.xlane.f32.xlu1 %v5448_v45  ;;  %v5457_v19 = vsel %vm1518_vm1, %v5075_v29, 0.0 }
 0x489   : > { %v5243_v38 = vpop.xlane.xlu0 %5242  ;;  %5773 = vst.msk [vmem:[%s8941_s25 + $0x190] sm:$0xff] %vm5722_vm2, %v7112_v61  ;;  %v5451_v25 = vsel %vm1518_vm1, %v5073_v40, 0.0 }
 0x48a   : > { %v7114_v49 = vpop.eup %7113  ;;  %v5521_v50 = vadd.f32 %v9203_v54, %v5243_v38  ;;  %7123 = vtanh.f32 %v5518_v22  ;;  %5452 = vadd.xlane.f32.xlu0 %v5451_v25 }
 0x48b   : > { %5768 = vst.msk [vmem:[%s8941_s25 + $0x168] sm:$0xff] %vm5722_vm2, %v7114_v49  ;;  %v5252_v15 = vpop.xlane.xlu1 %5251 }
 0x48c   : > { %7125 = vtanh.f32 %v5521_v50  ;;  %v7116_v42 = vpop.eup %7115  ;;  %v5524_v30 = vadd.f32 %v9203_v54, %v5252_v15  ;;  %5455 = vadd.xlane.f32.xlu1 %v5454_v39 }
 0x48d   : > { %v5237_v6 = vpop.xlane.xlu0 %5236  ;;  %5771 = vst.msk [vmem:[%s8941_s25 + $0x180] sm:$0xff] %vm5722_vm2, %v7116_v42 }
 0x48e   : > { %v7118_v16 = vpop.eup %7117  ;;  %v5519_v51 = vadd.f32 %v9203_v54, %v5237_v6  ;;  %7127 = vtanh.f32 %v5524_v30  ;;  %5458 = vadd.xlane.f32.xlu0 %v5457_v19 }
 0x48f   : > { %5774 = vst.msk [vmem:[%s8941_s25 + $0x198] sm:$0xff] %vm5722_vm2, %v7118_v16  ;;  %v5246_v34 = vpop.xlane.xlu1 %5245 }
 0x490   : > { %7129 = vtanh.f32 %v5519_v51  ;;  %v7120_v11 = vpop.eup %7119  ;;  %v5522_v12 = vadd.f32 %v9203_v54, %v5246_v34 }
 0x491   : > { %v5255_v47 = vpop.xlane.xlu0 %5254  ;;  %5777 = vst.msk [vmem:[%s8941_s25 + $0x1b0] sm:$0xff] %vm5722_vm2, %v7120_v11 }
 0x492   : > { %v7122_v9 = vpop.eup %7121  ;;  %v5525_v7 = vadd.f32 %v9203_v54, %v5255_v47  ;;  %7131 = vtanh.f32 %v5522_v12 }
 0x493   : > { %5772 = vst.msk [vmem:[%s8941_s25 + $0x188] sm:$0xff] %vm5722_vm2, %v7122_v9  ;;  %v5264_v2 = vpop.xlane.xlu1 %5263 }
 0x494   : > { %7133 = vtanh.f32 %v5525_v7  ;;  %v7124_v52 = vpop.eup %7123  ;;  %v5528_v56 = vadd.f32 %v9203_v54, %v5264_v2 }
 0x495   : > { %v5249_v35 = vpop.xlane.xlu0 %5248  ;;  %5775 = vst.msk [vmem:[%s8941_s25 + $0x1a0] sm:$0xff] %vm5722_vm2, %v7124_v52 }
 0x496   : > { %v7126_v33 = vpop.eup %7125  ;;  %v5523_v55 = vadd.f32 %v9203_v54, %v5249_v35  ;;  %7135 = vtanh.f32 %v5528_v56 }
 0x497   : > { %5778 = vst.msk [vmem:[%s8941_s25 + $0x1b8] sm:$0xff] %vm5722_vm2, %v7126_v33  ;;  %v5258_v63 = vpop.xlane.xlu1 %5257 }
 0x498   : > { %7137 = vtanh.f32 %v5523_v55  ;;  %v7128_v28 = vpop.eup %7127  ;;  %v5526_v21 = vadd.f32 %v9203_v54, %v5258_v63 }
 0x499   : > { %v5267_v0 = vpop.xlane.xlu0 %5266  ;;  %5781 = vst.msk [vmem:[%s8941_s25 + $0x1d0] sm:$0xff] %vm5722_vm2, %v7128_v28 }
 0x49a   : > { %v7130_v8 = vpop.eup %7129  ;;  %v5529_v53 = vadd.f32 %v9203_v54, %v5267_v0  ;;  %7139 = vtanh.f32 %v5526_v21 }
 0x49b   : > { %5776 = vst.msk [vmem:[%s8941_s25 + $0x1a8] sm:$0xff] %vm5722_vm2, %v7130_v8  ;;  %v5276_v44 = vpop.xlane.xlu1 %5275 }
 0x49c   : > { %7141 = vtanh.f32 %v5529_v53  ;;  %v7132_v57 = vpop.eup %7131  ;;  %v5532_v5 = vadd.f32 %v9203_v54, %v5276_v44 }
 0x49d   : > { %v5261_v37 = vpop.xlane.xlu0 %5260  ;;  %5779 = vst.msk [vmem:[%s8941_s25 + $0x1c0] sm:$0xff] %vm5722_vm2, %v7132_v57 }
 0x49e   : > { %v7134_v41 = vpop.eup %7133  ;;  %v5527_v1 = vadd.f32 %v9203_v54, %v5261_v37  ;;  %7143 = vtanh.f32 %v5532_v5 }
 0x49f   : > { %5782 = vst.msk [vmem:[%s8941_s25 + $0x1d8] sm:$0xff] %vm5722_vm2, %v7134_v41  ;;  %v5270_v14 = vpop.xlane.xlu1 %5269 }
 0x4a0   : > { %7145 = vtanh.f32 %v5527_v1  ;;  %v7136_v60 = vpop.eup %7135  ;;  %v5530_v27 = vadd.f32 %v9203_v54, %v5270_v14 }
 0x4a1   : > { %v5279_v24 = vpop.xlane.xlu0 %5278  ;;  %5785 = vst.msk [vmem:[%s8941_s25 + $0x1f0] sm:$0xff] %vm5722_vm2, %v7136_v60 }
 0x4a2   : > { %v7138_v4 = vpop.eup %7137  ;;  %v5533_v31 = vadd.f32 %v9203_v54, %v5279_v24  ;;  %7147 = vtanh.f32 %v5530_v27 }
 0x4a3   : > { %5780 = vst.msk [vmem:[%s8941_s25 + $0x1c8] sm:$0xff] %vm5722_vm2, %v7138_v4  ;;  %v5288_v20 = vpop.xlane.xlu1 %5287 }
 0x4a4   : > { %7149 = vtanh.f32 %v5533_v31  ;;  %v7140_v18 = vpop.eup %7139  ;;  %v5536_v36 = vadd.f32 %v9203_v54, %v5288_v20 }
 0x4a5   : > { %v5273_v43 = vpop.xlane.xlu0 %5272  ;;  %5783 = vst.msk [vmem:[%s8941_s25 + $0x1e0] sm:$0xff] %vm5722_vm2, %v7140_v18 }
 0x4a6   : > { %v7142_v13 = vpop.eup %7141  ;;  %v5531_v26 = vadd.f32 %v9203_v54, %v5273_v43  ;;  %7151 = vtanh.f32 %v5536_v36 }
 0x4a7   : > { %5786 = vst.msk [vmem:[%s8941_s25 + $0x1f8] sm:$0xff] %vm5722_vm2, %v7142_v13  ;;  %v5282_v23 = vpop.xlane.xlu1 %5281 }
 0x4a8   : > { %7153 = vtanh.f32 %v5531_v26  ;;  %v7144_v32 = vpop.eup %7143  ;;  %v5534_v59 = vadd.f32 %v9203_v54, %v5282_v23 }
 0x4a9   : > { %v5291_v46 = vpop.xlane.xlu0 %5290  ;;  %5789 = vst.msk [vmem:[%s8941_s25 + $0x210] sm:$0xff] %vm5722_vm2, %v7144_v32 }
 0x4aa   : > { %v7146_v17 = vpop.eup %7145  ;;  %v5537_v62 = vadd.f32 %v9203_v54, %v5291_v46  ;;  %7155 = vtanh.f32 %v5534_v59 }
 0x4ab   : > { %5784 = vst.msk [vmem:[%s8941_s25 + $0x1e8] sm:$0xff] %vm5722_vm2, %v7146_v17  ;;  %v5300_v10 = vpop.xlane.xlu1 %5299 }
 0x4ac   : > { %7157 = vtanh.f32 %v5537_v62  ;;  %v7148_v3 = vpop.eup %7147  ;;  %v5540_v48 = vadd.f32 %v9203_v54, %v5300_v10 }
 0x4ad   : > { %v5285_v40 = vpop.xlane.xlu0 %5284  ;;  %5787 = vst.msk [vmem:[%s8941_s25 + $0x200] sm:$0xff] %vm5722_vm2, %v7148_v3 }
 0x4ae   : > { %v7150_v58 = vpop.eup %7149  ;;  %v5535_v45 = vadd.f32 %v9203_v54, %v5285_v40  ;;  %7159 = vtanh.f32 %v5540_v48 }
 0x4af   : > { %5790 = vst.msk [vmem:[%s8941_s25 + $0x218] sm:$0xff] %vm5722_vm2, %v7150_v58  ;;  %v5294_v61 = vpop.xlane.xlu1 %5293 }
 0x4b0   : > { %7161 = vtanh.f32 %v5535_v45  ;;  %v7152_v22 = vpop.eup %7151  ;;  %v5538_v38 = vadd.f32 %v9203_v54, %v5294_v61 }
 0x4b1   : > { %v5303_v49 = vpop.xlane.xlu0 %5302  ;;  %5793 = vst.msk [vmem:[%s8941_s25 + $0x230] sm:$0xff] %vm5722_vm2, %v7152_v22 }
 0x4b2   : > { %v7154_v29 = vpop.eup %7153  ;;  %v5541_v50 = vadd.f32 %v9203_v54, %v5303_v49  ;;  %7163 = vtanh.f32 %v5538_v38 }
 0x4b3   : > { %5788 = vst.msk [vmem:[%s8941_s25 + $0x208] sm:$0xff] %vm5722_vm2, %v7154_v29  ;;  %v5312_v25 = vpop.xlane.xlu1 %5311 }
 0x4b4   : > { %7165 = vtanh.f32 %v5541_v50  ;;  %v7156_v15 = vpop.eup %7155  ;;  %v5544_v39 = vadd.f32 %v9203_v54, %v5312_v25 }
 0x4b5   : > { %v5297_v42 = vpop.xlane.xlu0 %5296  ;;  %5791 = vst.msk [vmem:[%s8941_s25 + $0x220] sm:$0xff] %vm5722_vm2, %v7156_v15 }
 0x4b6   : > { %v7158_v30 = vpop.eup %7157  ;;  %v5539_v6 = vadd.f32 %v9203_v54, %v5297_v42  ;;  %7167 = vtanh.f32 %v5544_v39 }
 0x4b7   : > { %5794 = vst.msk [vmem:[%s8941_s25 + $0x238] sm:$0xff] %vm5722_vm2, %v7158_v30  ;;  %v5306_v16 = vpop.xlane.xlu1 %5305 }
 0x4b8   : > { %7169 = vtanh.f32 %v5539_v6  ;;  %v7160_v51 = vpop.eup %7159  ;;  %v5542_v19 = vadd.f32 %v9203_v54, %v5306_v16 }
 0x4b9   : > { %v5315_v34 = vpop.xlane.xlu0 %5314  ;;  %5797 = vst.msk [vmem:[%s8941_s25 + $0x250] sm:$0xff] %vm5722_vm2, %v7160_v51 }
 0x4ba   : > { %v7162_v11 = vpop.eup %7161  ;;  %v5545_v12 = vadd.f32 %v9203_v54, %v5315_v34  ;;  %7171 = vtanh.f32 %v5542_v19 }
 0x4bb   : > { %5792 = vst.msk [vmem:[%s8941_s25 + $0x228] sm:$0xff] %vm5722_vm2, %v7162_v11  ;;  %v5324_v47 = vpop.xlane.xlu1 %5323 }
 0x4bc   : > { %7173 = vtanh.f32 %v5545_v12  ;;  %v7164_v9 = vpop.eup %7163  ;;  %v5548_v7 = vadd.f32 %v9203_v54, %v5324_v47 }
 0x4bd   : > { %v5309_v2 = vpop.xlane.xlu0 %5308  ;;  %5795 = vst.msk [vmem:[%s8941_s25 + $0x240] sm:$0xff] %vm5722_vm2, %v7164_v9 }
 0x4be   : > { %v7166_v52 = vpop.eup %7165  ;;  %v5543_v56 = vadd.f32 %v9203_v54, %v5309_v2  ;;  %7175 = vtanh.f32 %v5548_v7 }
 0x4bf   : > { %5798 = vst.msk [vmem:[%s8941_s25 + $0x258] sm:$0xff] %vm5722_vm2, %v7166_v52  ;;  %v5318_v35 = vpop.xlane.xlu1 %5317 }
 0x4c0   : > { %7177 = vtanh.f32 %v5543_v56  ;;  %v7168_v33 = vpop.eup %7167  ;;  %v5546_v55 = vadd.f32 %v9203_v54, %v5318_v35 }
 0x4c1   : > { %v5327_v63 = vpop.xlane.xlu0 %5326  ;;  %5801 = vst.msk [vmem:[%s8941_s25 + $0x270] sm:$0xff] %vm5722_vm2, %v7168_v33 }
 0x4c2   : > { %v7170_v28 = vpop.eup %7169  ;;  %v5549_v21 = vadd.f32 %v9203_v54, %v5327_v63  ;;  %7179 = vtanh.f32 %v5546_v55 }
 0x4c3   : > { %5796 = vst.msk [vmem:[%s8941_s25 + $0x248] sm:$0xff] %vm5722_vm2, %v7170_v28  ;;  %v5336_v0 = vpop.xlane.xlu1 %5335 }
 0x4c4   : > { %7181 = vtanh.f32 %v5549_v21  ;;  %v7172_v8 = vpop.eup %7171  ;;  %v5552_v53 = vadd.f32 %v9203_v54, %v5336_v0 }
 0x4c5   : > { %v5321_v44 = vpop.xlane.xlu0 %5320  ;;  %5799 = vst.msk [vmem:[%s8941_s25 + $0x260] sm:$0xff] %vm5722_vm2, %v7172_v8 }
 0x4c6   : > { %v7174_v57 = vpop.eup %7173  ;;  %v5547_v5 = vadd.f32 %v9203_v54, %v5321_v44  ;;  %7183 = vtanh.f32 %v5552_v53 }
 0x4c7   : > { %5802 = vst.msk [vmem:[%s8941_s25 + $0x278] sm:$0xff] %vm5722_vm2, %v7174_v57  ;;  %v5330_v37 = vpop.xlane.xlu1 %5329 }
 0x4c8   : > { %7185 = vtanh.f32 %v5547_v5  ;;  %v7176_v41 = vpop.eup %7175  ;;  %v5550_v1 = vadd.f32 %v9203_v54, %v5330_v37 }
 0x4c9   : > { %v5339_v14 = vpop.xlane.xlu0 %5338  ;;  %5805 = vst.msk [vmem:[%s8941_s25 + $0x290] sm:$0xff] %vm5722_vm2, %v7176_v41 }
 0x4ca   : > { %v7178_v60 = vpop.eup %7177  ;;  %v5553_v27 = vadd.f32 %v9203_v54, %v5339_v14  ;;  %7187 = vtanh.f32 %v5550_v1 }
 0x4cb   : > { %5800 = vst.msk [vmem:[%s8941_s25 + $0x268] sm:$0xff] %vm5722_vm2, %v7178_v60  ;;  %v5348_v24 = vpop.xlane.xlu1 %5347 }
 0x4cc   : > { %7189 = vtanh.f32 %v5553_v27  ;;  %v7180_v4 = vpop.eup %7179  ;;  %v5556_v31 = vadd.f32 %v9203_v54, %v5348_v24 }
 0x4cd   : > { %v5333_v20 = vpop.xlane.xlu0 %5332  ;;  %5803 = vst.msk [vmem:[%s8941_s25 + $0x280] sm:$0xff] %vm5722_vm2, %v7180_v4 }
 0x4ce   : > { %v7182_v18 = vpop.eup %7181  ;;  %v5551_v36 = vadd.f32 %v9203_v54, %v5333_v20  ;;  %7191 = vtanh.f32 %v5556_v31 }
 0x4cf   : > { %5806 = vst.msk [vmem:[%s8941_s25 + $0x298] sm:$0xff] %vm5722_vm2, %v7182_v18  ;;  %v5342_v43 = vpop.xlane.xlu1 %5341 }
 0x4d0   : > { %7193 = vtanh.f32 %v5551_v36  ;;  %v7184_v13 = vpop.eup %7183  ;;  %v5554_v26 = vadd.f32 %v9203_v54, %v5342_v43 }
 0x4d1   : > { %v5351_v23 = vpop.xlane.xlu0 %5350  ;;  %5809 = vst.msk [vmem:[%s8941_s25 + $0x2b0] sm:$0xff] %vm5722_vm2, %v7184_v13 }
 0x4d2   : > { %v7186_v32 = vpop.eup %7185  ;;  %v5557_v59 = vadd.f32 %v9203_v54, %v5351_v23  ;;  %7195 = vtanh.f32 %v5554_v26 }
 0x4d3   : > { %5804 = vst.msk [vmem:[%s8941_s25 + $0x288] sm:$0xff] %vm5722_vm2, %v7186_v32  ;;  %v5360_v46 = vpop.xlane.xlu1 %5359 }
 0x4d4   : > { %7197 = vtanh.f32 %v5557_v59  ;;  %v7188_v17 = vpop.eup %7187  ;;  %v5560_v62 = vadd.f32 %v9203_v54, %v5360_v46 }
 0x4d5   : > { %v5345_v10 = vpop.xlane.xlu0 %5344  ;;  %5807 = vst.msk [vmem:[%s8941_s25 + $0x2a0] sm:$0xff] %vm5722_vm2, %v7188_v17 }
 0x4d6   : > { %v7190_v3 = vpop.eup %7189  ;;  %v5555_v48 = vadd.f32 %v9203_v54, %v5345_v10  ;;  %7199 = vtanh.f32 %v5560_v62 }
 0x4d7   : > { %5810 = vst.msk [vmem:[%s8941_s25 + $0x2b8] sm:$0xff] %vm5722_vm2, %v7190_v3  ;;  %v5354_v40 = vpop.xlane.xlu1 %5353 }
 0x4d8   : > { %7201 = vtanh.f32 %v5555_v48  ;;  %v7192_v58 = vpop.eup %7191  ;;  %v5558_v45 = vadd.f32 %v9203_v54, %v5354_v40 }
 0x4d9   : > { %v5363_v61 = vpop.xlane.xlu0 %5362  ;;  %5813 = vst.msk [vmem:[%s8941_s25 + $0x2d0] sm:$0xff] %vm5722_vm2, %v7192_v58 }
 0x4da   : > { %v7194_v22 = vpop.eup %7193  ;;  %v5561_v38 = vadd.f32 %v9203_v54, %v5363_v61  ;;  %7203 = vtanh.f32 %v5558_v45 }
 0x4db   : > { %5808 = vst.msk [vmem:[%s8941_s25 + $0x2a8] sm:$0xff] %vm5722_vm2, %v7194_v22  ;;  %v5372_v49 = vpop.xlane.xlu1 %5371 }
 0x4dc   : > { %7205 = vtanh.f32 %v5561_v38  ;;  %v7196_v29 = vpop.eup %7195  ;;  %v5564_v50 = vadd.f32 %v9203_v54, %v5372_v49 }
 0x4dd   : > { %v5357_v25 = vpop.xlane.xlu0 %5356  ;;  %5811 = vst.msk [vmem:[%s8941_s25 + $0x2c0] sm:$0xff] %vm5722_vm2, %v7196_v29 }
 0x4de   : > { %v7198_v15 = vpop.eup %7197  ;;  %v5559_v39 = vadd.f32 %v9203_v54, %v5357_v25  ;;  %7207 = vtanh.f32 %v5564_v50 }
 0x4df   : > { %5814 = vst.msk [vmem:[%s8941_s25 + $0x2d8] sm:$0xff] %vm5722_vm2, %v7198_v15  ;;  %v5366_v42 = vpop.xlane.xlu1 %5365 }
 0x4e0   : > { %7209 = vtanh.f32 %v5559_v39  ;;  %v7200_v30 = vpop.eup %7199  ;;  %v5562_v6 = vadd.f32 %v9203_v54, %v5366_v42 }
 0x4e1   : > { %v5375_v16 = vpop.xlane.xlu0 %5374  ;;  %5817 = vst.msk [vmem:[%s8941_s25 + $0x2f0] sm:$0xff] %vm5722_vm2, %v7200_v30 }
 0x4e2   : > { %v7202_v51 = vpop.eup %7201  ;;  %v5565_v19 = vadd.f32 %v9203_v54, %v5375_v16  ;;  %7211 = vtanh.f32 %v5562_v6 }
 0x4e3   : > { %5812 = vst.msk [vmem:[%s8941_s25 + $0x2c8] sm:$0xff] %vm5722_vm2, %v7202_v51  ;;  %v5384_v34 = vpop.xlane.xlu1 %5383 }
 0x4e4   : > { %7213 = vtanh.f32 %v5565_v19  ;;  %v7204_v11 = vpop.eup %7203  ;;  %v5568_v12 = vadd.f32 %v9203_v54, %v5384_v34 }
 0x4e5   : > { %v5369_v47 = vpop.xlane.xlu0 %5368  ;;  %5815 = vst.msk [vmem:[%s8941_s25 + $0x2e0] sm:$0xff] %vm5722_vm2, %v7204_v11 }
 0x4e6   : > { %v7206_v9 = vpop.eup %7205  ;;  %v5563_v7 = vadd.f32 %v9203_v54, %v5369_v47  ;;  %7215 = vtanh.f32 %v5568_v12 }
 0x4e7   : > { %5818 = vst.msk [vmem:[%s8941_s25 + $0x2f8] sm:$0xff] %vm5722_vm2, %v7206_v9  ;;  %v5378_v2 = vpop.xlane.xlu1 %5377 }
 0x4e8   : > { %7217 = vtanh.f32 %v5563_v7  ;;  %v7208_v52 = vpop.eup %7207  ;;  %v5566_v56 = vadd.f32 %v9203_v54, %v5378_v2 }
 0x4e9   : > { %v5387_v35 = vpop.xlane.xlu0 %5386  ;;  %5821 = vst.msk [vmem:[%s8941_s25 + $0x310] sm:$0xff] %vm5722_vm2, %v7208_v52 }
 0x4ea   : > { %v7210_v33 = vpop.eup %7209  ;;  %v5569_v55 = vadd.f32 %v9203_v54, %v5387_v35  ;;  %7219 = vtanh.f32 %v5566_v56 }
 0x4eb   : > { %5816 = vst.msk [vmem:[%s8941_s25 + $0x2e8] sm:$0xff] %vm5722_vm2, %v7210_v33  ;;  %v5396_v63 = vpop.xlane.xlu1 %5395 }
 0x4ec   : > { %7221 = vtanh.f32 %v5569_v55  ;;  %v7212_v28 = vpop.eup %7211  ;;  %v5572_v21 = vadd.f32 %v9203_v54, %v5396_v63 }
 0x4ed   : > { %v5381_v0 = vpop.xlane.xlu0 %5380  ;;  %5819 = vst.msk [vmem:[%s8941_s25 + $0x300] sm:$0xff] %vm5722_vm2, %v7212_v28 }
 0x4ee   : > { %v7214_v8 = vpop.eup %7213  ;;  %v5567_v53 = vadd.f32 %v9203_v54, %v5381_v0  ;;  %7223 = vtanh.f32 %v5572_v21 }
 0x4ef   : > { %5822 = vst.msk [vmem:[%s8941_s25 + $0x318] sm:$0xff] %vm5722_vm2, %v7214_v8  ;;  %v5390_v44 = vpop.xlane.xlu1 %5389 }
 0x4f0   : > { %7225 = vtanh.f32 %v5567_v53  ;;  %v7216_v57 = vpop.eup %7215  ;;  %v5570_v5 = vadd.f32 %v9203_v54, %v5390_v44 }
 0x4f1   : > { %v5399_v37 = vpop.xlane.xlu0 %5398  ;;  %5825 = vst.msk [vmem:[%s8941_s25 + $0x330] sm:$0xff] %vm5722_vm2, %v7216_v57 }
 0x4f2   : > { %v7218_v41 = vpop.eup %7217  ;;  %v5573_v1 = vadd.f32 %v9203_v54, %v5399_v37  ;;  %7227 = vtanh.f32 %v5570_v5 }
 0x4f3   : > { %5820 = vst.msk [vmem:[%s8941_s25 + $0x308] sm:$0xff] %vm5722_vm2, %v7218_v41  ;;  %v5408_v14 = vpop.xlane.xlu1 %5407 }
 0x4f4   : > { %7229 = vtanh.f32 %v5573_v1  ;;  %v7220_v60 = vpop.eup %7219  ;;  %v5576_v27 = vadd.f32 %v9203_v54, %v5408_v14 }
 0x4f5   : > { %v5393_v24 = vpop.xlane.xlu0 %5392  ;;  %5823 = vst.msk [vmem:[%s8941_s25 + $0x320] sm:$0xff] %vm5722_vm2, %v7220_v60 }
 0x4f6   : > { %v7222_v4 = vpop.eup %7221  ;;  %v5571_v31 = vadd.f32 %v9203_v54, %v5393_v24  ;;  %7231 = vtanh.f32 %v5576_v27 }
 0x4f7   : > { %5826 = vst.msk [vmem:[%s8941_s25 + $0x338] sm:$0xff] %vm5722_vm2, %v7222_v4  ;;  %v5402_v20 = vpop.xlane.xlu1 %5401 }
 0x4f8   : > { %7233 = vtanh.f32 %v5571_v31  ;;  %v7224_v18 = vpop.eup %7223  ;;  %v5574_v36 = vadd.f32 %v9203_v54, %v5402_v20 }
 0x4f9   : > { %v5411_v43 = vpop.xlane.xlu0 %5410  ;;  %5829 = vst.msk [vmem:[%s8941_s25 + $0x350] sm:$0xff] %vm5722_vm2, %v7224_v18 }
 0x4fa   : > { %v7226_v13 = vpop.eup %7225  ;;  %v5577_v26 = vadd.f32 %v9203_v54, %v5411_v43  ;;  %7235 = vtanh.f32 %v5574_v36 }
 0x4fb   : > { %5824 = vst.msk [vmem:[%s8941_s25 + $0x328] sm:$0xff] %vm5722_vm2, %v7226_v13  ;;  %v5420_v32 = vpop.xlane.xlu1 %5419 }
 0x4fc   : > { %7237 = vtanh.f32 %v5577_v26  ;;  %v7228_v23 = vpop.eup %7227  ;;  %v5580_v17 = vadd.f32 %v9203_v54, %v5420_v32 }
 0x4fd   : > { %v5405_v59 = vpop.xlane.xlu0 %5404  ;;  %5827 = vst.msk [vmem:[%s8941_s25 + $0x340] sm:$0xff] %vm5722_vm2, %v7228_v23 }
 0x4fe   : > { %v7230_v46 = vpop.eup %7229  ;;  %v5575_v62 = vadd.f32 %v9203_v54, %v5405_v59  ;;  %7239 = vtanh.f32 %v5580_v17 }
 0x4ff   : > { %5830 = vst.msk [vmem:[%s8941_s25 + $0x358] sm:$0xff] %vm5722_vm2, %v7230_v46  ;;  %v5414_v3 = vpop.xlane.xlu1 %5413 }
 0x500   : > { %v7232_v10 = vpop.eup %7231  ;;  %7241 = vtanh.f32 %v5575_v62  ;;  %v5578_v58 = vadd.f32 %v9203_v54, %v5414_v3 }
 0x501   : > { %v5423_v48 = vpop.xlane.xlu0 %5422  ;;  %5833 = vst.msk [vmem:[%s8941_s25 + $0x370] sm:$0xff] %vm5722_vm2, %v7232_v10 }
 0x502   : > { %v7234_v40 = vpop.eup %7233  ;;  %v5581_v45 = vadd.f32 %v9203_v54, %v5423_v48  ;;  %7243 = vtanh.f32 %v5578_v58 }
 0x503   : > { %5828 = vst.msk [vmem:[%s8941_s25 + $0x348] sm:$0xff] %vm5722_vm2, %v7234_v40 }
 0x504   : > { %v7236_v61 = vpop.eup %7235  ;;  %7245 = vtanh.f32 %v5581_v45  ;;  %v5432_v22 = vpop.xlane.xlu1 %5431 }
 0x505   : > { %v5417_v38 = vpop.xlane.xlu0 %5416  ;;  %5831 = vst.msk [vmem:[%s8941_s25 + $0x360] sm:$0xff] %vm5722_vm2, %v7236_v61  ;;  %v5584_v29 = vadd.f32 %v9203_v54, %v5432_v22 }
 0x506   : > { %v7238_v49 = vpop.eup %7237  ;;  %v5579_v50 = vadd.f32 %v9203_v54, %v5417_v38 }
 0x507   : > { %5834 = vst.msk [vmem:[%s8941_s25 + $0x378] sm:$0xff] %vm5722_vm2, %v7238_v49  ;;  %7247 = vtanh.f32 %v5584_v29 }
 0x508   : > { %7249 = vtanh.f32 %v5579_v50  ;;  %v5426_v25 = vpop.xlane.xlu1 %5425  ;;  %v7240_v39 = vpop.eup %7239 }
 0x509   : > { %v5435_v15 = vpop.xlane.xlu0 %5434  ;;  %v5582_v42 = vadd.f32 %v9203_v54, %v5426_v25  ;;  %5837 = vst.msk [vmem:[%s8941_s25 + $0x390] sm:$0xff] %vm5722_vm2, %v7240_v39 }
 0x50a   : > { %v5585_v30 = vadd.f32 %v9203_v54, %v5435_v15  ;;  %v7242_v6 = vpop.eup %7241 }
 0x50b   : > { %5832 = vst.msk [vmem:[%s8941_s25 + $0x368] sm:$0xff] %vm5722_vm2, %v7242_v6  ;;  %7251 = vtanh.f32 %v5582_v42 }
 0x50c   : > { %7253 = vtanh.f32 %v5585_v30  ;;  %v5444_v16 = vpop.xlane.xlu1 %5443  ;;  %v7244_v19 = vpop.eup %7243 }
 0x50d   : > { %v5429_v51 = vpop.xlane.xlu0 %5428  ;;  %v5588_v34 = vadd.f32 %v9203_v54, %v5444_v16  ;;  %5835 = vst.msk [vmem:[%s8941_s25 + $0x380] sm:$0xff] %vm5722_vm2, %v7244_v19 }
 0x50e   : > { %v5583_v11 = vadd.f32 %v9203_v54, %v5429_v51  ;;  %v7246_v12 = vpop.eup %7245 }
 0x50f   : > { %5838 = vst.msk [vmem:[%s8941_s25 + $0x398] sm:$0xff] %vm5722_vm2, %v7246_v12  ;;  %7255 = vtanh.f32 %v5588_v34 }
 0x510   : > { %7257 = vtanh.f32 %v5583_v11  ;;  %v5438_v47 = vpop.xlane.xlu1 %5437 }
 0x511   : > { %v5447_v9 = vpop.xlane.xlu0 %5446  ;;  %v7248_v7 = vpop.eup %7247  ;;  %v5586_v2 = vadd.f32 %v9203_v54, %v5438_v47 }
 0x512   : > { %v5589_v52 = vadd.f32 %v9203_v54, %v5447_v9  ;;  %v7250_v56 = vpop.eup %7249  ;;  %5841 = vst.msk [vmem:[%s8941_s25 + $0x3b0] sm:$0xff] %vm5722_vm2, %v7248_v7 }
 0x513   : > { %5836 = vst.msk [vmem:[%s8941_s25 + $0x388] sm:$0xff] %vm5722_vm2, %v7250_v56  ;;  %7259 = vtanh.f32 %v5586_v2 }
 0x514   : > { %7261 = vtanh.f32 %v5589_v52 }
 0x515   : > { %v5441_v35 = vpop.xlane.xlu0 %5440  ;;  %v7252_v33 = vpop.eup %7251 }
 0x516   : > { %v5587_v55 = vadd.f32 %v9203_v54, %v5441_v35  ;;  %v5450_v63 = vpop.xlane.xlu1 %5449  ;;  %v7254_v28 = vpop.eup %7253  ;;  %5839 = vst.msk [vmem:[%s8941_s25 + $0x3a0] sm:$0xff] %vm5722_vm2, %v7252_v33 }
 0x517   : > { %v5590_v21 = vadd.f32 %v9203_v54, %v5450_v63  ;;  %5842 = vst.msk [vmem:[%s8941_s25 + $0x3b8] sm:$0xff] %vm5722_vm2, %v7254_v28 }
 0x518   : > { %7263 = vtanh.f32 %v5587_v55 }
 0x519   : > { %7265 = vtanh.f32 %v5590_v21  ;;  %v5453_v0 = vpop.xlane.xlu0 %5452  ;;  %v7256_v8 = vpop.eup %7255 }
 0x51a   : > { %v5591_v53 = vadd.f32 %v9203_v54, %v5453_v0  ;;  %v5456_v44 = vpop.xlane.xlu1 %5455  ;;  %v7258_v57 = vpop.eup %7257  ;;  %5845 = vst.msk [vmem:[%s8941_s25 + $0x3d0] sm:$0xff] %vm5722_vm2, %v7256_v8 }
 0x51b   : > { %v5592_v5 = vadd.f32 %v9203_v54, %v5456_v44  ;;  %5840 = vst.msk [vmem:[%s8941_s25 + $0x3a8] sm:$0xff] %vm5722_vm2, %v7258_v57 }
 0x51c   : > { %7267 = vtanh.f32 %v5591_v53 }
 0x51d   : > { %7269 = vtanh.f32 %v5592_v5  ;;  %v5459_v37 = vpop.xlane.xlu0 %5458  ;;  %v7260_v41 = vpop.eup %7259 }
 0x51e   : > { %v5593_v1 = vadd.f32 %v9203_v54, %v5459_v37  ;;  %v7262_v14 = vpop.eup %7261  ;;  %5843 = vst.msk [vmem:[%s8941_s25 + $0x3c0] sm:$0xff] %vm5722_vm2, %v7260_v41 }
 0x51f   : > { %5846 = vst.msk [vmem:[%s8941_s25 + $0x3d8] sm:$0xff] %vm5722_vm2, %v7262_v14 }
 0x520   : > { %7271 = vtanh.f32 %v5593_v1 }
 0x522   : > { %v7264_v60 = vpop.eup %7263 }
 0x523   : > { %v7266_v27 = vpop.eup %7265  ;;  %5844 = vst.msk [vmem:[%s8941_s25 + $0x3c8] sm:$0xff] %vm5722_vm2, %v7264_v60 }
 0x524   : > { %5847 = vst.msk [vmem:[%s8941_s25 + $0x3e0] sm:$0xff] %vm5722_vm2, %v7266_v27 }
 0x526   : > { %v7268_v24 = vpop.eup %7267 }
 0x527   : > { %v7270_v4 = vpop.eup %7269  ;;  %5848 = vst.msk [vmem:[%s8941_s25 + $0x3e8] sm:$0xff] %vm5722_vm2, %v7268_v24 }
 0x528   : > { %5849 = vst.msk [vmem:[%s8941_s25 + $0x3f0] sm:$0xff] %vm5722_vm2, %v7270_v4 }
 0x52a   : > { %v7272_v31 = vpop.eup %7271 }
 0x52b   : > { %5850 = vst.msk [vmem:[%s8941_s25 + $0x3f8] sm:$0xff] %vm5722_vm2, %v7272_v31 }
 0x52c PF: > { %s14_s15 = sadd.s32 1, %s7287_s15  }
 0x52d   : > { %p11_p4 = scmp.ge.s32.totalorder %s14_s15, 4  }
 0x52f   :  { %13 = sbr.rel (!%p11_p4) target bundleno = 1 (0x1), region = 66 }

</bundles_post_ra>
